<compile_context>
chip_gen: v7x
topology: tpu7x:2x2x1
jax: 0.10.0
libtpu: 0.0.40
codegen_flags: <defaults>
</compile_context>

<pallas_src>
import string

import jax
import jax.numpy as jnp
from jax.experimental import pallas as pl
from jax.experimental.pallas import tpu as pltpu

_OUT_PAD = 128  # lane-dense padded width of the fused-kernel output


# --------------------------------------------------------------------------
# Fused kernel: bi-LSTM + time-mean + conv-as-matmul + rel + linear + out.
# --------------------------------------------------------------------------
def _network_kernel(len_ref, x_ref,
                    wih_f_ref, whh_f_ref, b_f_ref,
                    wih_b_ref, whh_b_ref, b_b_ref,
                    net_ref, convw_ref, convb_ref,
                    rel_tf_ref, rel_tb_ref, rel_n_ref,
                    lin_f_ref, lin_bwd_ref, lin_n_ref, lin_bias_ref,
                    outw_ref, outb_ref,
                    o_ref):
    T, B, _ = x_ref.shape
    H = whh_f_ref.shape[0]

    lens = len_ref[...]                                   # (B, 1) int32
    wih_f = wih_f_ref[...]; whh_f = whh_f_ref[...]; b_f = b_f_ref[...]
    wih_b = wih_b_ref[...]; whh_b = whh_b_ref[...]; b_b = b_b_ref[...]

    def cell(x, h, c, wih, whh, b):
        # One fused (B, 4H) gate matmul per direction (4H == 128 lanes),
        # then static lane slices in PyTorch gate order i, f, g, o.
        g = (jnp.dot(x, wih, preferred_element_type=jnp.float32)
             + jnp.dot(h, whh, preferred_element_type=jnp.float32) + b)
        i_g = jax.nn.sigmoid(g[:, 0 * H:1 * H])
        f_g = jax.nn.sigmoid(g[:, 1 * H:2 * H])
        g_g = jnp.tanh(g[:, 2 * H:3 * H])
        o_g = jax.nn.sigmoid(g[:, 3 * H:4 * H])
        c_new = f_g * c + i_g * g_g
        h_new = o_g * jnp.tanh(c_new)
        return h_new, c_new

    zero = jnp.zeros((B, H), jnp.float32)
    hf, cf, sf = zero, zero, zero
    hb, cb, sb = zero, zero, zero

    # Fully unrolled time recurrence (T is small & static); all LSTM state
    # stays in vregs — no grid-step overhead, no scratch writebacks.
    for t in range(T):
        # forward direction processes time index t
        hn, cn = cell(x_ref[t], hf, cf, wih_f, whh_f, b_f)
        mf = t < lens                                     # (B,1): pad steps frozen
        hf = jnp.where(mf, hn, hf)
        cf = jnp.where(mf, cn, cf)
        sf = sf + jnp.where(mf, hn, 0.0)

        # backward direction processes time index T-1-t; each row's state only
        # starts updating at that row's last valid token (mask false before).
        tb = T - 1 - t
        hn, cn = cell(x_ref[tb], hb, cb, wih_b, whh_b, b_b)
        mb = tb < lens
        hb = jnp.where(mb, hn, hb)
        cb = jnp.where(mb, cn, cb)
        sb = sb + jnp.where(mb, hn, 0.0)

    # pad_packed_sequence pads to max(length); torch.mean divides by it.
    inv = 1.0 / jnp.max(lens.astype(jnp.float32))
    mean_f = sf * inv                                     # fwd half of bi-LSTM mean
    mean_b = sb * inv                                     # bwd half

    # --- head: conv-as-matmul, rel elementwise, Linear+ReLU, out Linear ---
    conv_out = (jnp.dot(net_ref[...], convw_ref[...],
                        preferred_element_type=jnp.float32) + convb_ref[...])
    h = (jnp.dot(mean_f * rel_tf_ref[...], lin_f_ref[...],
                 preferred_element_type=jnp.float32)
         + jnp.dot(mean_b * rel_tb_ref[...], lin_bwd_ref[...],
                   preferred_element_type=jnp.float32)
         + jnp.dot(conv_out * rel_n_ref[...], lin_n_ref[...],
                   preferred_element_type=jnp.float32)
         + lin_bias_ref[...])
    h = jnp.maximum(h, 0.0)                               # F.relu
    # Lane-dense (B, 128) store; true output is the first `width` lanes.
    o_ref[...] = (jnp.dot(h, outw_ref[...], preferred_element_type=jnp.float32)
                  + outb_ref[...])


# --------------------------------------------------------------------------
# Parameters (deterministic synthetic init) and forward wrapper.
# --------------------------------------------------------------------------
def init_params(key, char_dim, hidden, in_channel, height, width,
                channel_size, rel_len, node_len, linear_dim):
    n_letters = len(string.printable)
    vec_len = channel_size + 2 * hidden
    ks = jax.random.split(key, 11)
    u = lambda k, shape, s=0.1: jax.random.uniform(k, shape, jnp.float32, -s, s)
    p = {}
    p["char_emb"] = u(ks[0], (n_letters, char_dim), 1.0)
    p["node_emb"] = u(ks[1], (node_len, width), 1.0)
    p["rel_emb"] = u(ks[2], (rel_len, vec_len), 1.0)

    # LSTM: PyTorch stores W_ih (4H, D) / W_hh (4H, H) in gate order i,f,g,o.
    # Transpose to (D, 4H) / (H, 4H) so each timestep is one lane-dense matmul
    # per direction (4H = 128 lanes); biases are pre-summed (b_ih + b_hh).
    def lstm_dir(k):
        k1, k2, k3, k4 = jax.random.split(k, 4)
        w_ih = u(k1, (4 * hidden, char_dim))
        w_hh = u(k2, (4 * hidden, hidden))
        b_ih = u(k3, (4 * hidden,))
        b_hh = u(k4, (4 * hidden,))
        return w_ih.T, w_hh.T, (b_ih + b_hh).reshape(1, 4 * hidden)

    p["lstm_f"] = lstm_dir(ks[3])
    p["lstm_b"] = lstm_dir(ks[4])

    # Conv2d kernel covers the full spatial extent -> single (Cin*H*W, Cs) matmul.
    conv_w = u(ks[5], (channel_size, in_channel, height, width))
    p["conv_wT"] = conv_w.reshape(channel_size, -1).T
    p["conv_b"] = u(ks[6], (1, channel_size))

    # Split the post-concat Linear along its input so torch.cat is never built:
    # rows [0:H) multiply the fwd-LSTM mean, [H:2H) the bwd mean, [2H:) the conv.
    lin_w = u(ks[7], (linear_dim, vec_len))
    lin_wT = lin_w.T
    p["lin_wT_f"] = lin_wT[:hidden]
    p["lin_wT_b"] = lin_wT[hidden:2 * hidden]
    p["lin_wT_net"] = lin_wT[2 * hidden:]
    p["lin_b"] = u(ks[8], (1, linear_dim))

    # Output Linear zero-padded to 128 lanes (lane-dense final matmul + store).
    out_w = u(ks[9], (width, linear_dim))
    out_b = u(ks[10], (1, width))
    p["out_wT_pad"] = (jnp.zeros((linear_dim, _OUT_PAD), jnp.float32)
                       .at[:, :width].set(out_w.T))
    p["out_b_pad"] = (jnp.zeros((1, _OUT_PAD), jnp.float32)
                      .at[:, :width].set(out_b))
    p["out_width"] = width
    return p


def network_forward(p, hidden, data_text, text_len, data_net, rel_id, pos_id, neg_id):
    B, _ = data_text.shape
    width = p["out_width"]

    # --- glue: embedding gathers (XLA jnp.take; no clean Pallas equivalent) ---
    x = jnp.take(p["char_emb"], data_text, axis=0)           # (B, T, char_dim)
    x_tm = jnp.transpose(x, (1, 0, 2)).astype(jnp.float32)   # time-major (T, B, D)
    net = jnp.take(p["node_emb"], data_net, axis=0)          # (B, Cin, Hh, W) NCHW
    net_flat = net.reshape(B, -1)
    relw = jnp.take(p["rel_emb"], rel_id, axis=0)            # (B, vec_len)
    rel_tf = relw[:, :hidden]                                # multiplies fwd mean
    rel_tb = relw[:, hidden:2 * hidden]                      # multiplies bwd mean
    rel_n = relw[:, 2 * hidden:]                             # multiplies conv output

    lens2d = text_len.reshape(B, 1).astype(jnp.int32)
    wih_f, whh_f, b_f = p["lstm_f"]
    wih_b, whh_b, b_b = p["lstm_b"]

    vmem = pl.BlockSpec(memory_space=pltpu.MemorySpace.VMEM)
    out_pad = pl.pallas_call(
        _network_kernel,
        out_shape=jax.ShapeDtypeStruct((B, _OUT_PAD), jnp.float32),
        in_specs=[vmem] * 20,
        out_specs=vmem,
    )(lens2d, x_tm,
      wih_f, whh_f, b_f, wih_b, whh_b, b_b,
      net_flat, p["conv_wT"], p["conv_b"],
      rel_tf, rel_tb, rel_n,
      p["lin_wT_f"], p["lin_wT_b"], p["lin_wT_net"], p["lin_b"],
      p["out_wT_pad"], p["out_b_pad"])
    out_net = out_pad[:, :width]

    # --- pos / neg node embeddings (pure gathers, glue) ---
    out_pos = jnp.take(p["node_emb"], pos_id, axis=0)
    out_neg = jnp.take(p["node_emb"], neg_id, axis=0)
    return out_net, out_pos, out_neg


if __name__ == "__main__":
    B, T = 8, 8
    char_dim, hidden = 32, 32
    in_channel, height, width = 4, 8, 16
    channel_size, rel_len, node_len, linear_dim = 8, 10, 20, 32

    key = jax.random.PRNGKey(0)
    pkey, dkey = jax.random.split(key)
    params = init_params(pkey, char_dim, hidden, in_channel, height, width,
                         channel_size, rel_len, node_len, linear_dim)

    k1, k2, k3, k4, k5, k6 = jax.random.split(dkey, 6)
    n_letters = len(string.printable)
    data_text = jax.random.randint(k1, (B, T), 0, n_letters, dtype=jnp.int32)
    text_len = jax.random.randint(k2, (B,), 3, T + 1, dtype=jnp.int32)
    data_net = jax.random.randint(k3, (B, in_channel, height), 0, node_len,
                                  dtype=jnp.int32)
    rel_id = jax.random.randint(k4, (B,), 0, rel_len, dtype=jnp.int32)
    pos_id = jax.random.randint(k5, (B,), 0, node_len, dtype=jnp.int32)
    neg_id = jax.random.randint(k6, (B,), 0, node_len, dtype=jnp.int32)

    out_net, out_pos, out_neg = network_forward(
        params, hidden, data_text, text_len, data_net, rel_id, pos_id, neg_id)
    jax.block_until_ready((out_net, out_pos, out_neg))

    assert out_net.shape == (B, width)
    assert out_pos.shape == (B, width) and out_neg.shape == (B, width)
    print("KERNEL_OK")
</pallas_src>

<mosaic_0001>
module attributes {stable_mosaic.version = 11 : i64} {
  func.func @_network_kernel(%arg0: memref<8x1xi32, #tpu.memory_space<vmem>>, %arg1: memref<8x8x32xf32, #tpu.memory_space<vmem>>, %arg2: memref<32x128xf32, #tpu.memory_space<vmem>>, %arg3: memref<32x128xf32, #tpu.memory_space<vmem>>, %arg4: memref<1x128xf32, #tpu.memory_space<vmem>>, %arg5: memref<32x128xf32, #tpu.memory_space<vmem>>, %arg6: memref<32x128xf32, #tpu.memory_space<vmem>>, %arg7: memref<1x128xf32, #tpu.memory_space<vmem>>, %arg8: memref<8x512xf32, #tpu.memory_space<vmem>>, %arg9: memref<512x8xf32, #tpu.memory_space<vmem>>, %arg10: memref<1x8xf32, #tpu.memory_space<vmem>>, %arg11: memref<8x32xf32, #tpu.memory_space<vmem>>, %arg12: memref<8x32xf32, #tpu.memory_space<vmem>>, %arg13: memref<8x8xf32, #tpu.memory_space<vmem>>, %arg14: memref<32x32xf32, #tpu.memory_space<vmem>>, %arg15: memref<32x32xf32, #tpu.memory_space<vmem>>, %arg16: memref<8x32xf32, #tpu.memory_space<vmem>>, %arg17: memref<1x32xf32, #tpu.memory_space<vmem>>, %arg18: memref<32x128xf32, #tpu.memory_space<vmem>>, %arg19: memref<1x128xf32, #tpu.memory_space<vmem>>, %arg20: memref<8x128xf32, #tpu.memory_space<vmem>>) attributes {dimension_semantics = [], scalar_prefetch = 0 : i64, scratch_operands = 0 : i64, tpu.core_type = #tpu.core_type<tc>} {
    %c0 = arith.constant 0 : index
    %c0_0 = arith.constant 0 : index
    %0 = vector.load %arg0[%c0, %c0_0] : memref<8x1xi32, #tpu.memory_space<vmem>>, vector<8x1xi32>
    %c0_1 = arith.constant 0 : index
    %c0_2 = arith.constant 0 : index
    %1 = vector.load %arg2[%c0_1, %c0_2] : memref<32x128xf32, #tpu.memory_space<vmem>>, vector<32x128xf32>
    %c0_3 = arith.constant 0 : index
    %c0_4 = arith.constant 0 : index
    %2 = vector.load %arg3[%c0_3, %c0_4] : memref<32x128xf32, #tpu.memory_space<vmem>>, vector<32x128xf32>
    %c0_5 = arith.constant 0 : index
    %c0_6 = arith.constant 0 : index
    %3 = vector.load %arg4[%c0_5, %c0_6] : memref<1x128xf32, #tpu.memory_space<vmem>>, vector<1x128xf32>
    %c0_7 = arith.constant 0 : index
    %c0_8 = arith.constant 0 : index
    %4 = vector.load %arg5[%c0_7, %c0_8] : memref<32x128xf32, #tpu.memory_space<vmem>>, vector<32x128xf32>
    %c0_9 = arith.constant 0 : index
    %c0_10 = arith.constant 0 : index
    %5 = vector.load %arg6[%c0_9, %c0_10] : memref<32x128xf32, #tpu.memory_space<vmem>>, vector<32x128xf32>
    %c0_11 = arith.constant 0 : index
    %c0_12 = arith.constant 0 : index
    %6 = vector.load %arg7[%c0_11, %c0_12] : memref<1x128xf32, #tpu.memory_space<vmem>>, vector<1x128xf32>
    %cst = arith.constant 0.000000e+00 : f32
    %7 = vector.broadcast %cst : f32 to vector<8x32xf32>
    %c0_13 = arith.constant 0 : index
    %c0_14 = arith.constant 0 : index
    %c0_15 = arith.constant 0 : index
    %8 = vector.load %arg1[%c0_13, %c0_14, %c0_15] : memref<8x8x32xf32, #tpu.memory_space<vmem>>, vector<1x8x32xf32>
    %9 = vector.shape_cast %8 : vector<1x8x32xf32> to vector<8x32xf32>
    %cst_16 = arith.constant dense<0.000000e+00> : vector<8x128xf32>
    %10 = tpu.matmul %9, %1, %cst_16 {dimension_numbers = #tpu.dot_dimension_numbers<[1], [0], [0], [1], [0, 0, 1, 1], [], []>} : vector<8x32xf32>, vector<32x128xf32>, vector<8x128xf32> -> vector<8x128xf32>
    %cst_17 = arith.constant dense<0.000000e+00> : vector<8x128xf32>
    %11 = tpu.matmul %7, %2, %cst_17 {dimension_numbers = #tpu.dot_dimension_numbers<[1], [0], [0], [1], [0, 0, 1, 1], [], []>} : vector<8x32xf32>, vector<32x128xf32>, vector<8x128xf32> -> vector<8x128xf32>
    %12 = arith.addf %10, %11 : vector<8x128xf32>
    %13 = vector.broadcast %3 : vector<1x128xf32> to vector<8x128xf32>
    %14 = arith.addf %12, %13 : vector<8x128xf32>
    %15 = vector.extract_strided_slice %14 {offsets = [0, 0], sizes = [8, 32], strides = [1, 1]} : vector<8x128xf32> to vector<8x32xf32>
    %16 = arith.negf %15 : vector<8x32xf32>
    %17 = math.exp %16 : vector<8x32xf32>
    %cst_18 = arith.constant 1.000000e+00 : f32
    %18 = vector.broadcast %cst_18 : f32 to vector<8x32xf32>
    %19 = arith.addf %18, %17 : vector<8x32xf32>
    %20 = arith.divf %18, %19 : vector<8x32xf32>
    %21 = vector.extract_strided_slice %14 {offsets = [0, 32], sizes = [8, 32], strides = [1, 1]} : vector<8x128xf32> to vector<8x32xf32>
    %22 = arith.negf %21 : vector<8x32xf32>
    %23 = math.exp %22 : vector<8x32xf32>
    %cst_19 = arith.constant 1.000000e+00 : f32
    %24 = vector.broadcast %cst_19 : f32 to vector<8x32xf32>
    %25 = arith.addf %24, %23 : vector<8x32xf32>
    %26 = arith.divf %24, %25 : vector<8x32xf32>
    %27 = vector.extract_strided_slice %14 {offsets = [0, 64], sizes = [8, 32], strides = [1, 1]} : vector<8x128xf32> to vector<8x32xf32>
    %28 = math.tanh %27 : vector<8x32xf32>
    %29 = vector.extract_strided_slice %14 {offsets = [0, 96], sizes = [8, 32], strides = [1, 1]} : vector<8x128xf32> to vector<8x32xf32>
    %30 = arith.negf %29 : vector<8x32xf32>
    %31 = math.exp %30 : vector<8x32xf32>
    %cst_20 = arith.constant 1.000000e+00 : f32
    %32 = vector.broadcast %cst_20 : f32 to vector<8x32xf32>
    %33 = arith.addf %32, %31 : vector<8x32xf32>
    %34 = arith.divf %32, %33 : vector<8x32xf32>
    %35 = arith.mulf %26, %7 : vector<8x32xf32>
    %36 = arith.mulf %20, %28 : vector<8x32xf32>
    %37 = arith.addf %35, %36 : vector<8x32xf32>
    %38 = math.tanh %37 : vector<8x32xf32>
    %39 = arith.mulf %34, %38 : vector<8x32xf32>
    %c0_i32 = arith.constant 0 : i32
    %40 = vector.broadcast %c0_i32 : i32 to vector<8x1xi32>
    %41 = arith.cmpi sgt, %0, %40 : vector<8x1xi32>
    %42 = vector.shape_cast %41 : vector<8x1xi1> to vector<8x1xi1>
    %43 = vector.broadcast %42 : vector<8x1xi1> to vector<8x32xi1>
    %44 = arith.select %43, %39, %7 : vector<8x32xi1>, vector<8x32xf32>
    %45 = vector.shape_cast %41 : vector<8x1xi1> to vector<8x1xi1>
    %46 = vector.broadcast %45 : vector<8x1xi1> to vector<8x32xi1>
    %47 = arith.select %46, %37, %7 : vector<8x32xi1>, vector<8x32xf32>
    %cst_21 = arith.constant 0.000000e+00 : f32
    %48 = vector.shape_cast %41 : vector<8x1xi1> to vector<8x1xi1>
    %49 = vector.broadcast %48 : vector<8x1xi1> to vector<8x32xi1>
    %50 = vector.broadcast %cst_21 : f32 to vector<8x32xf32>
    %51 = arith.select %49, %39, %50 : vector<8x32xi1>, vector<8x32xf32>
    %52 = arith.addf %7, %51 : vector<8x32xf32>
    %c7 = arith.constant 7 : index
    %c0_22 = arith.constant 0 : index
    %c0_23 = arith.constant 0 : index
    %53 = vector.load %arg1[%c7, %c0_22, %c0_23] : memref<8x8x32xf32, #tpu.memory_space<vmem>>, vector<1x8x32xf32>
    %54 = vector.shape_cast %53 : vector<1x8x32xf32> to vector<8x32xf32>
    %cst_24 = arith.constant dense<0.000000e+00> : vector<8x128xf32>
    %55 = tpu.matmul %54, %4, %cst_24 {dimension_numbers = #tpu.dot_dimension_numbers<[1], [0], [0], [1], [0, 0, 1, 1], [], []>} : vector<8x32xf32>, vector<32x128xf32>, vector<8x128xf32> -> vector<8x128xf32>
    %cst_25 = arith.constant dense<0.000000e+00> : vector<8x128xf32>
    %56 = tpu.matmul %7, %5, %cst_25 {dimension_numbers = #tpu.dot_dimension_numbers<[1], [0], [0], [1], [0, 0, 1, 1], [], []>} : vector<8x32xf32>, vector<32x128xf32>, vector<8x128xf32> -> vector<8x128xf32>
    %57 = arith.addf %55, %56 : vector<8x128xf32>
    %58 = vector.broadcast %6 : vector<1x128xf32> to vector<8x128xf32>
    %59 = arith.addf %57, %58 : vector<8x128xf32>
    %60 = vector.extract_strided_slice %59 {offsets = [0, 0], sizes = [8, 32], strides = [1, 1]} : vector<8x128xf32> to vector<8x32xf32>
    %61 = arith.negf %60 : vector<8x32xf32>
    %62 = math.exp %61 : vector<8x32xf32>
    %cst_26 = arith.constant 1.000000e+00 : f32
    %63 = vector.broadcast %cst_26 : f32 to vector<8x32xf32>
    %64 = arith.addf %63, %62 : vector<8x32xf32>
    %65 = arith.divf %63, %64 : vector<8x32xf32>
    %66 = vector.extract_strided_slice %59 {offsets = [0, 32], sizes = [8, 32], strides = [1, 1]} : vector<8x128xf32> to vector<8x32xf32>
    %67 = arith.negf %66 : vector<8x32xf32>
    %68 = math.exp %67 : vector<8x32xf32>
    %cst_27 = arith.constant 1.000000e+00 : f32
    %69 = vector.broadcast %cst_27 : f32 to vector<8x32xf32>
    %70 = arith.addf %69, %68 : vector<8x32xf32>
    %71 = arith.divf %69, %70 : vector<8x32xf32>
    %72 = vector.extract_strided_slice %59 {offsets = [0, 64], sizes = [8, 32], strides = [1, 1]} : vector<8x128xf32> to vector<8x32xf32>
    %73 = math.tanh %72 : vector<8x32xf32>
    %74 = vector.extract_strided_slice %59 {offsets = [0, 96], sizes = [8, 32], strides = [1, 1]} : vector<8x128xf32> to vector<8x32xf32>
    %75 = arith.negf %74 : vector<8x32xf32>
    %76 = math.exp %75 : vector<8x32xf32>
    %cst_28 = arith.constant 1.000000e+00 : f32
    %77 = vector.broadcast %cst_28 : f32 to vector<8x32xf32>
    %78 = arith.addf %77, %76 : vector<8x32xf32>
    %79 = arith.divf %77, %78 : vector<8x32xf32>
    %80 = arith.mulf %71, %7 : vector<8x32xf32>
    %81 = arith.mulf %65, %73 : vector<8x32xf32>
    %82 = arith.addf %80, %81 : vector<8x32xf32>
    %83 = math.tanh %82 : vector<8x32xf32>
    %84 = arith.mulf %79, %83 : vector<8x32xf32>
    %c7_i32 = arith.constant 7 : i32
    %85 = vector.broadcast %c7_i32 : i32 to vector<8x1xi32>
    %86 = arith.cmpi sgt, %0, %85 : vector<8x1xi32>
    %87 = vector.shape_cast %86 : vector<8x1xi1> to vector<8x1xi1>
    %88 = vector.broadcast %87 : vector<8x1xi1> to vector<8x32xi1>
    %89 = arith.select %88, %84, %7 : vector<8x32xi1>, vector<8x32xf32>
    %90 = vector.shape_cast %86 : vector<8x1xi1> to vector<8x1xi1>
    %91 = vector.broadcast %90 : vector<8x1xi1> to vector<8x32xi1>
    %92 = arith.select %91, %82, %7 : vector<8x32xi1>, vector<8x32xf32>
    %cst_29 = arith.constant 0.000000e+00 : f32
    %93 = vector.shape_cast %86 : vector<8x1xi1> to vector<8x1xi1>
    %94 = vector.broadcast %93 : vector<8x1xi1> to vector<8x32xi1>
    %95 = vector.broadcast %cst_29 : f32 to vector<8x32xf32>
    %96 = arith.select %94, %84, %95 : vector<8x32xi1>, vector<8x32xf32>
    %97 = arith.addf %7, %96 : vector<8x32xf32>
    %c1 = arith.constant 1 : index
    %c0_30 = arith.constant 0 : index
    %c0_31 = arith.constant 0 : index
    %98 = vector.load %arg1[%c1, %c0_30, %c0_31] : memref<8x8x32xf32, #tpu.memory_space<vmem>>, vector<1x8x32xf32>
    %99 = vector.shape_cast %98 : vector<1x8x32xf32> to vector<8x32xf32>
    %cst_32 = arith.constant dense<0.000000e+00> : vector<8x128xf32>
    %100 = tpu.matmul %99, %1, %cst_32 {dimension_numbers = #tpu.dot_dimension_numbers<[1], [0], [0], [1], [0, 0, 1, 1], [], []>} : vector<8x32xf32>, vector<32x128xf32>, vector<8x128xf32> -> vector<8x128xf32>
    %cst_33 = arith.constant dense<0.000000e+00> : vector<8x128xf32>
    %101 = tpu.matmul %44, %2, %cst_33 {dimension_numbers = #tpu.dot_dimension_numbers<[1], [0], [0], [1], [0, 0, 1, 1], [], []>} : vector<8x32xf32>, vector<32x128xf32>, vector<8x128xf32> -> vector<8x128xf32>
    %102 = arith.addf %100, %101 : vector<8x128xf32>
    %103 = vector.broadcast %3 : vector<1x128xf32> to vector<8x128xf32>
    %104 = arith.addf %102, %103 : vector<8x128xf32>
    %105 = vector.extract_strided_slice %104 {offsets = [0, 0], sizes = [8, 32], strides = [1, 1]} : vector<8x128xf32> to vector<8x32xf32>
    %106 = arith.negf %105 : vector<8x32xf32>
    %107 = math.exp %106 : vector<8x32xf32>
    %cst_34 = arith.constant 1.000000e+00 : f32
    %108 = vector.broadcast %cst_34 : f32 to vector<8x32xf32>
    %109 = arith.addf %108, %107 : vector<8x32xf32>
    %110 = arith.divf %108, %109 : vector<8x32xf32>
    %111 = vector.extract_strided_slice %104 {offsets = [0, 32], sizes = [8, 32], strides = [1, 1]} : vector<8x128xf32> to vector<8x32xf32>
    %112 = arith.negf %111 : vector<8x32xf32>
    %113 = math.exp %112 : vector<8x32xf32>
    %cst_35 = arith.constant 1.000000e+00 : f32
    %114 = vector.broadcast %cst_35 : f32 to vector<8x32xf32>
    %115 = arith.addf %114, %113 : vector<8x32xf32>
    %116 = arith.divf %114, %115 : vector<8x32xf32>
    %117 = vector.extract_strided_slice %104 {offsets = [0, 64], sizes = [8, 32], strides = [1, 1]} : vector<8x128xf32> to vector<8x32xf32>
    %118 = math.tanh %117 : vector<8x32xf32>
    %119 = vector.extract_strided_slice %104 {offsets = [0, 96], sizes = [8, 32], strides = [1, 1]} : vector<8x128xf32> to vector<8x32xf32>
    %120 = arith.negf %119 : vector<8x32xf32>
    %121 = math.exp %120 : vector<8x32xf32>
    %cst_36 = arith.constant 1.000000e+00 : f32
    %122 = vector.broadcast %cst_36 : f32 to vector<8x32xf32>
    %123 = arith.addf %122, %121 : vector<8x32xf32>
    %124 = arith.divf %122, %123 : vector<8x32xf32>
    %125 = arith.mulf %116, %47 : vector<8x32xf32>
    %126 = arith.mulf %110, %118 : vector<8x32xf32>
    %127 = arith.addf %125, %126 : vector<8x32xf32>
    %128 = math.tanh %127 : vector<8x32xf32>
    %129 = arith.mulf %124, %128 : vector<8x32xf32>
    %c1_i32 = arith.constant 1 : i32
    %130 = vector.broadcast %c1_i32 : i32 to vector<8x1xi32>
    %131 = arith.cmpi sgt, %0, %130 : vector<8x1xi32>
    %132 = vector.shape_cast %131 : vector<8x1xi1> to vector<8x1xi1>
    %133 = vector.broadcast %132 : vector<8x1xi1> to vector<8x32xi1>
    %134 = arith.select %133, %129, %44 : vector<8x32xi1>, vector<8x32xf32>
    %135 = vector.shape_cast %131 : vector<8x1xi1> to vector<8x1xi1>
    %136 = vector.broadcast %135 : vector<8x1xi1> to vector<8x32xi1>
    %137 = arith.select %136, %127, %47 : vector<8x32xi1>, vector<8x32xf32>
    %cst_37 = arith.constant 0.000000e+00 : f32
    %138 = vector.shape_cast %131 : vector<8x1xi1> to vector<8x1xi1>
    %139 = vector.broadcast %138 : vector<8x1xi1> to vector<8x32xi1>
    %140 = vector.broadcast %cst_37 : f32 to vector<8x32xf32>
    %141 = arith.select %139, %129, %140 : vector<8x32xi1>, vector<8x32xf32>
    %142 = arith.addf %52, %141 : vector<8x32xf32>
    %c6 = arith.constant 6 : index
    %c0_38 = arith.constant 0 : index
    %c0_39 = arith.constant 0 : index
    %143 = vector.load %arg1[%c6, %c0_38, %c0_39] : memref<8x8x32xf32, #tpu.memory_space<vmem>>, vector<1x8x32xf32>
    %144 = vector.shape_cast %143 : vector<1x8x32xf32> to vector<8x32xf32>
    %cst_40 = arith.constant dense<0.000000e+00> : vector<8x128xf32>
    %145 = tpu.matmul %144, %4, %cst_40 {dimension_numbers = #tpu.dot_dimension_numbers<[1], [0], [0], [1], [0, 0, 1, 1], [], []>} : vector<8x32xf32>, vector<32x128xf32>, vector<8x128xf32> -> vector<8x128xf32>
    %cst_41 = arith.constant dense<0.000000e+00> : vector<8x128xf32>
    %146 = tpu.matmul %89, %5, %cst_41 {dimension_numbers = #tpu.dot_dimension_numbers<[1], [0], [0], [1], [0, 0, 1, 1], [], []>} : vector<8x32xf32>, vector<32x128xf32>, vector<8x128xf32> -> vector<8x128xf32>
    %147 = arith.addf %145, %146 : vector<8x128xf32>
    %148 = vector.broadcast %6 : vector<1x128xf32> to vector<8x128xf32>
    %149 = arith.addf %147, %148 : vector<8x128xf32>
    %150 = vector.extract_strided_slice %149 {offsets = [0, 0], sizes = [8, 32], strides = [1, 1]} : vector<8x128xf32> to vector<8x32xf32>
    %151 = arith.negf %150 : vector<8x32xf32>
    %152 = math.exp %151 : vector<8x32xf32>
    %cst_42 = arith.constant 1.000000e+00 : f32
    %153 = vector.broadcast %cst_42 : f32 to vector<8x32xf32>
    %154 = arith.addf %153, %152 : vector<8x32xf32>
    %155 = arith.divf %153, %154 : vector<8x32xf32>
    %156 = vector.extract_strided_slice %149 {offsets = [0, 32], sizes = [8, 32], strides = [1, 1]} : vector<8x128xf32> to vector<8x32xf32>
    %157 = arith.negf %156 : vector<8x32xf32>
    %158 = math.exp %157 : vector<8x32xf32>
    %cst_43 = arith.constant 1.000000e+00 : f32
    %159 = vector.broadcast %cst_43 : f32 to vector<8x32xf32>
    %160 = arith.addf %159, %158 : vector<8x32xf32>
    %161 = arith.divf %159, %160 : vector<8x32xf32>
    %162 = vector.extract_strided_slice %149 {offsets = [0, 64], sizes = [8, 32], strides = [1, 1]} : vector<8x128xf32> to vector<8x32xf32>
    %163 = math.tanh %162 : vector<8x32xf32>
    %164 = vector.extract_strided_slice %149 {offsets = [0, 96], sizes = [8, 32], strides = [1, 1]} : vector<8x128xf32> to vector<8x32xf32>
    %165 = arith.negf %164 : vector<8x32xf32>
    %166 = math.exp %165 : vector<8x32xf32>
    %cst_44 = arith.constant 1.000000e+00 : f32
    %167 = vector.broadcast %cst_44 : f32 to vector<8x32xf32>
    %168 = arith.addf %167, %166 : vector<8x32xf32>
    %169 = arith.divf %167, %168 : vector<8x32xf32>
    %170 = arith.mulf %161, %92 : vector<8x32xf32>
    %171 = arith.mulf %155, %163 : vector<8x32xf32>
    %172 = arith.addf %170, %171 : vector<8x32xf32>
    %173 = math.tanh %172 : vector<8x32xf32>
    %174 = arith.mulf %169, %173 : vector<8x32xf32>
    %c6_i32 = arith.constant 6 : i32
    %175 = vector.broadcast %c6_i32 : i32 to vector<8x1xi32>
    %176 = arith.cmpi sgt, %0, %175 : vector<8x1xi32>
    %177 = vector.shape_cast %176 : vector<8x1xi1> to vector<8x1xi1>
    %178 = vector.broadcast %177 : vector<8x1xi1> to vector<8x32xi1>
    %179 = arith.select %178, %174, %89 : vector<8x32xi1>, vector<8x32xf32>
    %180 = vector.shape_cast %176 : vector<8x1xi1> to vector<8x1xi1>
    %181 = vector.broadcast %180 : vector<8x1xi1> to vector<8x32xi1>
    %182 = arith.select %181, %172, %92 : vector<8x32xi1>, vector<8x32xf32>
    %cst_45 = arith.constant 0.000000e+00 : f32
    %183 = vector.shape_cast %176 : vector<8x1xi1> to vector<8x1xi1>
    %184 = vector.broadcast %183 : vector<8x1xi1> to vector<8x32xi1>
    %185 = vector.broadcast %cst_45 : f32 to vector<8x32xf32>
    %186 = arith.select %184, %174, %185 : vector<8x32xi1>, vector<8x32xf32>
    %187 = arith.addf %97, %186 : vector<8x32xf32>
    %c2 = arith.constant 2 : index
    %c0_46 = arith.constant 0 : index
    %c0_47 = arith.constant 0 : index
    %188 = vector.load %arg1[%c2, %c0_46, %c0_47] : memref<8x8x32xf32, #tpu.memory_space<vmem>>, vector<1x8x32xf32>
    %189 = vector.shape_cast %188 : vector<1x8x32xf32> to vector<8x32xf32>
    %cst_48 = arith.constant dense<0.000000e+00> : vector<8x128xf32>
    %190 = tpu.matmul %189, %1, %cst_48 {dimension_numbers = #tpu.dot_dimension_numbers<[1], [0], [0], [1], [0, 0, 1, 1], [], []>} : vector<8x32xf32>, vector<32x128xf32>, vector<8x128xf32> -> vector<8x128xf32>
    %cst_49 = arith.constant dense<0.000000e+00> : vector<8x128xf32>
    %191 = tpu.matmul %134, %2, %cst_49 {dimension_numbers = #tpu.dot_dimension_numbers<[1], [0], [0], [1], [0, 0, 1, 1], [], []>} : vector<8x32xf32>, vector<32x128xf32>, vector<8x128xf32> -> vector<8x128xf32>
    %192 = arith.addf %190, %191 : vector<8x128xf32>
    %193 = vector.broadcast %3 : vector<1x128xf32> to vector<8x128xf32>
    %194 = arith.addf %192, %193 : vector<8x128xf32>
    %195 = vector.extract_strided_slice %194 {offsets = [0, 0], sizes = [8, 32], strides = [1, 1]} : vector<8x128xf32> to vector<8x32xf32>
    %196 = arith.negf %195 : vector<8x32xf32>
    %197 = math.exp %196 : vector<8x32xf32>
    %cst_50 = arith.constant 1.000000e+00 : f32
    %198 = vector.broadcast %cst_50 : f32 to vector<8x32xf32>
    %199 = arith.addf %198, %197 : vector<8x32xf32>
    %200 = arith.divf %198, %199 : vector<8x32xf32>
    %201 = vector.extract_strided_slice %194 {offsets = [0, 32], sizes = [8, 32], strides = [1, 1]} : vector<8x128xf32> to vector<8x32xf32>
    %202 = arith.negf %201 : vector<8x32xf32>
    %203 = math.exp %202 : vector<8x32xf32>
    %cst_51 = arith.constant 1.000000e+00 : f32
    %204 = vector.broadcast %cst_51 : f32 to vector<8x32xf32>
    %205 = arith.addf %204, %203 : vector<8x32xf32>
    %206 = arith.divf %204, %205 : vector<8x32xf32>
    %207 = vector.extract_strided_slice %194 {offsets = [0, 64], sizes = [8, 32], strides = [1, 1]} : vector<8x128xf32> to vector<8x32xf32>
    %208 = math.tanh %207 : vector<8x32xf32>
    %209 = vector.extract_strided_slice %194 {offsets = [0, 96], sizes = [8, 32], strides = [1, 1]} : vector<8x128xf32> to vector<8x32xf32>
    %210 = arith.negf %209 : vector<8x32xf32>
    %211 = math.exp %210 : vector<8x32xf32>
    %cst_52 = arith.constant 1.000000e+00 : f32
    %212 = vector.broadcast %cst_52 : f32 to vector<8x32xf32>
    %213 = arith.addf %212, %211 : vector<8x32xf32>
    %214 = arith.divf %212, %213 : vector<8x32xf32>
    %215 = arith.mulf %206, %137 : vector<8x32xf32>
    %216 = arith.mulf %200, %208 : vector<8x32xf32>
    %217 = arith.addf %215, %216 : vector<8x32xf32>
    %218 = math.tanh %217 : vector<8x32xf32>
    %219 = arith.mulf %214, %218 : vector<8x32xf32>
    %c2_i32 = arith.constant 2 : i32
    %220 = vector.broadcast %c2_i32 : i32 to vector<8x1xi32>
    %221 = arith.cmpi sgt, %0, %220 : vector<8x1xi32>
    %222 = vector.shape_cast %221 : vector<8x1xi1> to vector<8x1xi1>
    %223 = vector.broadcast %222 : vector<8x1xi1> to vector<8x32xi1>
    %224 = arith.select %223, %219, %134 : vector<8x32xi1>, vector<8x32xf32>
    %225 = vector.shape_cast %221 : vector<8x1xi1> to vector<8x1xi1>
    %226 = vector.broadcast %225 : vector<8x1xi1> to vector<8x32xi1>
    %227 = arith.select %226, %217, %137 : vector<8x32xi1>, vector<8x32xf32>
    %cst_53 = arith.constant 0.000000e+00 : f32
    %228 = vector.shape_cast %221 : vector<8x1xi1> to vector<8x1xi1>
    %229 = vector.broadcast %228 : vector<8x1xi1> to vector<8x32xi1>
    %230 = vector.broadcast %cst_53 : f32 to vector<8x32xf32>
    %231 = arith.select %229, %219, %230 : vector<8x32xi1>, vector<8x32xf32>
    %232 = arith.addf %142, %231 : vector<8x32xf32>
    %c5 = arith.constant 5 : index
    %c0_54 = arith.constant 0 : index
    %c0_55 = arith.constant 0 : index
    %233 = vector.load %arg1[%c5, %c0_54, %c0_55] : memref<8x8x32xf32, #tpu.memory_space<vmem>>, vector<1x8x32xf32>
    %234 = vector.shape_cast %233 : vector<1x8x32xf32> to vector<8x32xf32>
    %cst_56 = arith.constant dense<0.000000e+00> : vector<8x128xf32>
    %235 = tpu.matmul %234, %4, %cst_56 {dimension_numbers = #tpu.dot_dimension_numbers<[1], [0], [0], [1], [0, 0, 1, 1], [], []>} : vector<8x32xf32>, vector<32x128xf32>, vector<8x128xf32> -> vector<8x128xf32>
    %cst_57 = arith.constant dense<0.000000e+00> : vector<8x128xf32>
    %236 = tpu.matmul %179, %5, %cst_57 {dimension_numbers = #tpu.dot_dimension_numbers<[1], [0], [0], [1], [0, 0, 1, 1], [], []>} : vector<8x32xf32>, vector<32x128xf32>, vector<8x128xf32> -> vector<8x128xf32>
    %237 = arith.addf %235, %236 : vector<8x128xf32>
    %238 = vector.broadcast %6 : vector<1x128xf32> to vector<8x128xf32>
    %239 = arith.addf %237, %238 : vector<8x128xf32>
    %240 = vector.extract_strided_slice %239 {offsets = [0, 0], sizes = [8, 32], strides = [1, 1]} : vector<8x128xf32> to vector<8x32xf32>
    %241 = arith.negf %240 : vector<8x32xf32>
    %242 = math.exp %241 : vector<8x32xf32>
    %cst_58 = arith.constant 1.000000e+00 : f32
    %243 = vector.broadcast %cst_58 : f32 to vector<8x32xf32>
    %244 = arith.addf %243, %242 : vector<8x32xf32>
    %245 = arith.divf %243, %244 : vector<8x32xf32>
    %246 = vector.extract_strided_slice %239 {offsets = [0, 32], sizes = [8, 32], strides = [1, 1]} : vector<8x128xf32> to vector<8x32xf32>
    %247 = arith.negf %246 : vector<8x32xf32>
    %248 = math.exp %247 : vector<8x32xf32>
    %cst_59 = arith.constant 1.000000e+00 : f32
    %249 = vector.broadcast %cst_59 : f32 to vector<8x32xf32>
    %250 = arith.addf %249, %248 : vector<8x32xf32>
    %251 = arith.divf %249, %250 : vector<8x32xf32>
    %252 = vector.extract_strided_slice %239 {offsets = [0, 64], sizes = [8, 32], strides = [1, 1]} : vector<8x128xf32> to vector<8x32xf32>
    %253 = math.tanh %252 : vector<8x32xf32>
    %254 = vector.extract_strided_slice %239 {offsets = [0, 96], sizes = [8, 32], strides = [1, 1]} : vector<8x128xf32> to vector<8x32xf32>
    %255 = arith.negf %254 : vector<8x32xf32>
    %256 = math.exp %255 : vector<8x32xf32>
    %cst_60 = arith.constant 1.000000e+00 : f32
    %257 = vector.broadcast %cst_60 : f32 to vector<8x32xf32>
    %258 = arith.addf %257, %256 : vector<8x32xf32>
    %259 = arith.divf %257, %258 : vector<8x32xf32>
    %260 = arith.mulf %251, %182 : vector<8x32xf32>
    %261 = arith.mulf %245, %253 : vector<8x32xf32>
    %262 = arith.addf %260, %261 : vector<8x32xf32>
    %263 = math.tanh %262 : vector<8x32xf32>
    %264 = arith.mulf %259, %263 : vector<8x32xf32>
    %c5_i32 = arith.constant 5 : i32
    %265 = vector.broadcast %c5_i32 : i32 to vector<8x1xi32>
    %266 = arith.cmpi sgt, %0, %265 : vector<8x1xi32>
    %267 = vector.shape_cast %266 : vector<8x1xi1> to vector<8x1xi1>
    %268 = vector.broadcast %267 : vector<8x1xi1> to vector<8x32xi1>
    %269 = arith.select %268, %264, %179 : vector<8x32xi1>, vector<8x32xf32>
    %270 = vector.shape_cast %266 : vector<8x1xi1> to vector<8x1xi1>
    %271 = vector.broadcast %270 : vector<8x1xi1> to vector<8x32xi1>
    %272 = arith.select %271, %262, %182 : vector<8x32xi1>, vector<8x32xf32>
    %cst_61 = arith.constant 0.000000e+00 : f32
    %273 = vector.shape_cast %266 : vector<8x1xi1> to vector<8x1xi1>
    %274 = vector.broadcast %273 : vector<8x1xi1> to vector<8x32xi1>
    %275 = vector.broadcast %cst_61 : f32 to vector<8x32xf32>
    %276 = arith.select %274, %264, %275 : vector<8x32xi1>, vector<8x32xf32>
    %277 = arith.addf %187, %276 : vector<8x32xf32>
    %c3 = arith.constant 3 : index
    %c0_62 = arith.constant 0 : index
    %c0_63 = arith.constant 0 : index
    %278 = vector.load %arg1[%c3, %c0_62, %c0_63] : memref<8x8x32xf32, #tpu.memory_space<vmem>>, vector<1x8x32xf32>
    %279 = vector.shape_cast %278 : vector<1x8x32xf32> to vector<8x32xf32>
    %cst_64 = arith.constant dense<0.000000e+00> : vector<8x128xf32>
    %280 = tpu.matmul %279, %1, %cst_64 {dimension_numbers = #tpu.dot_dimension_numbers<[1], [0], [0], [1], [0, 0, 1, 1], [], []>} : vector<8x32xf32>, vector<32x128xf32>, vector<8x128xf32> -> vector<8x128xf32>
    %cst_65 = arith.constant dense<0.000000e+00> : vector<8x128xf32>
    %281 = tpu.matmul %224, %2, %cst_65 {dimension_numbers = #tpu.dot_dimension_numbers<[1], [0], [0], [1], [0, 0, 1, 1], [], []>} : vector<8x32xf32>, vector<32x128xf32>, vector<8x128xf32> -> vector<8x128xf32>
    %282 = arith.addf %280, %281 : vector<8x128xf32>
    %283 = vector.broadcast %3 : vector<1x128xf32> to vector<8x128xf32>
    %284 = arith.addf %282, %283 : vector<8x128xf32>
    %285 = vector.extract_strided_slice %284 {offsets = [0, 0], sizes = [8, 32], strides = [1, 1]} : vector<8x128xf32> to vector<8x32xf32>
    %286 = arith.negf %285 : vector<8x32xf32>
    %287 = math.exp %286 : vector<8x32xf32>
    %cst_66 = arith.constant 1.000000e+00 : f32
    %288 = vector.broadcast %cst_66 : f32 to vector<8x32xf32>
    %289 = arith.addf %288, %287 : vector<8x32xf32>
    %290 = arith.divf %288, %289 : vector<8x32xf32>
    %291 = vector.extract_strided_slice %284 {offsets = [0, 32], sizes = [8, 32], strides = [1, 1]} : vector<8x128xf32> to vector<8x32xf32>
    %292 = arith.negf %291 : vector<8x32xf32>
    %293 = math.exp %292 : vector<8x32xf32>
    %cst_67 = arith.constant 1.000000e+00 : f32
    %294 = vector.broadcast %cst_67 : f32 to vector<8x32xf32>
    %295 = arith.addf %294, %293 : vector<8x32xf32>
    %296 = arith.divf %294, %295 : vector<8x32xf32>
    %297 = vector.extract_strided_slice %284 {offsets = [0, 64], sizes = [8, 32], strides = [1, 1]} : vector<8x128xf32> to vector<8x32xf32>
    %298 = math.tanh %297 : vector<8x32xf32>
    %299 = vector.extract_strided_slice %284 {offsets = [0, 96], sizes = [8, 32], strides = [1, 1]} : vector<8x128xf32> to vector<8x32xf32>
    %300 = arith.negf %299 : vector<8x32xf32>
    %301 = math.exp %300 : vector<8x32xf32>
    %cst_68 = arith.constant 1.000000e+00 : f32
    %302 = vector.broadcast %cst_68 : f32 to vector<8x32xf32>
    %303 = arith.addf %302, %301 : vector<8x32xf32>
    %304 = arith.divf %302, %303 : vector<8x32xf32>
    %305 = arith.mulf %296, %227 : vector<8x32xf32>
    %306 = arith.mulf %290, %298 : vector<8x32xf32>
    %307 = arith.addf %305, %306 : vector<8x32xf32>
    %308 = math.tanh %307 : vector<8x32xf32>
    %309 = arith.mulf %304, %308 : vector<8x32xf32>
    %c3_i32 = arith.constant 3 : i32
    %310 = vector.broadcast %c3_i32 : i32 to vector<8x1xi32>
    %311 = arith.cmpi sgt, %0, %310 : vector<8x1xi32>
    %312 = vector.shape_cast %311 : vector<8x1xi1> to vector<8x1xi1>
    %313 = vector.broadcast %312 : vector<8x1xi1> to vector<8x32xi1>
    %314 = arith.select %313, %309, %224 : vector<8x32xi1>, vector<8x32xf32>
    %315 = vector.shape_cast %311 : vector<8x1xi1> to vector<8x1xi1>
    %316 = vector.broadcast %315 : vector<8x1xi1> to vector<8x32xi1>
    %317 = arith.select %316, %307, %227 : vector<8x32xi1>, vector<8x32xf32>
    %cst_69 = arith.constant 0.000000e+00 : f32
    %318 = vector.shape_cast %311 : vector<8x1xi1> to vector<8x1xi1>
    %319 = vector.broadcast %318 : vector<8x1xi1> to vector<8x32xi1>
    %320 = vector.broadcast %cst_69 : f32 to vector<8x32xf32>
    %321 = arith.select %319, %309, %320 : vector<8x32xi1>, vector<8x32xf32>
    %322 = arith.addf %232, %321 : vector<8x32xf32>
    %c4 = arith.constant 4 : index
    %c0_70 = arith.constant 0 : index
    %c0_71 = arith.constant 0 : index
    %323 = vector.load %arg1[%c4, %c0_70, %c0_71] : memref<8x8x32xf32, #tpu.memory_space<vmem>>, vector<1x8x32xf32>
    %324 = vector.shape_cast %323 : vector<1x8x32xf32> to vector<8x32xf32>
    %cst_72 = arith.constant dense<0.000000e+00> : vector<8x128xf32>
    %325 = tpu.matmul %324, %4, %cst_72 {dimension_numbers = #tpu.dot_dimension_numbers<[1], [0], [0], [1], [0, 0, 1, 1], [], []>} : vector<8x32xf32>, vector<32x128xf32>, vector<8x128xf32> -> vector<8x128xf32>
    %cst_73 = arith.constant dense<0.000000e+00> : vector<8x128xf32>
    %326 = tpu.matmul %269, %5, %cst_73 {dimension_numbers = #tpu.dot_dimension_numbers<[1], [0], [0], [1], [0, 0, 1, 1], [], []>} : vector<8x32xf32>, vector<32x128xf32>, vector<8x128xf32> -> vector<8x128xf32>
    %327 = arith.addf %325, %326 : vector<8x128xf32>
    %328 = vector.broadcast %6 : vector<1x128xf32> to vector<8x128xf32>
    %329 = arith.addf %327, %328 : vector<8x128xf32>
    %330 = vector.extract_strided_slice %329 {offsets = [0, 0], sizes = [8, 32], strides = [1, 1]} : vector<8x128xf32> to vector<8x32xf32>
    %331 = arith.negf %330 : vector<8x32xf32>
    %332 = math.exp %331 : vector<8x32xf32>
    %cst_74 = arith.constant 1.000000e+00 : f32
    %333 = vector.broadcast %cst_74 : f32 to vector<8x32xf32>
    %334 = arith.addf %333, %332 : vector<8x32xf32>
    %335 = arith.divf %333, %334 : vector<8x32xf32>
    %336 = vector.extract_strided_slice %329 {offsets = [0, 32], sizes = [8, 32], strides = [1, 1]} : vector<8x128xf32> to vector<8x32xf32>
    %337 = arith.negf %336 : vector<8x32xf32>
    %338 = math.exp %337 : vector<8x32xf32>
    %cst_75 = arith.constant 1.000000e+00 : f32
    %339 = vector.broadcast %cst_75 : f32 to vector<8x32xf32>
    %340 = arith.addf %339, %338 : vector<8x32xf32>
    %341 = arith.divf %339, %340 : vector<8x32xf32>
    %342 = vector.extract_strided_slice %329 {offsets = [0, 64], sizes = [8, 32], strides = [1, 1]} : vector<8x128xf32> to vector<8x32xf32>
    %343 = math.tanh %342 : vector<8x32xf32>
    %344 = vector.extract_strided_slice %329 {offsets = [0, 96], sizes = [8, 32], strides = [1, 1]} : vector<8x128xf32> to vector<8x32xf32>
    %345 = arith.negf %344 : vector<8x32xf32>
    %346 = math.exp %345 : vector<8x32xf32>
    %cst_76 = arith.constant 1.000000e+00 : f32
    %347 = vector.broadcast %cst_76 : f32 to vector<8x32xf32>
    %348 = arith.addf %347, %346 : vector<8x32xf32>
    %349 = arith.divf %347, %348 : vector<8x32xf32>
    %350 = arith.mulf %341, %272 : vector<8x32xf32>
    %351 = arith.mulf %335, %343 : vector<8x32xf32>
    %352 = arith.addf %350, %351 : vector<8x32xf32>
    %353 = math.tanh %352 : vector<8x32xf32>
    %354 = arith.mulf %349, %353 : vector<8x32xf32>
    %c4_i32 = arith.constant 4 : i32
    %355 = vector.broadcast %c4_i32 : i32 to vector<8x1xi32>
    %356 = arith.cmpi sgt, %0, %355 : vector<8x1xi32>
    %357 = vector.shape_cast %356 : vector<8x1xi1> to vector<8x1xi1>
    %358 = vector.broadcast %357 : vector<8x1xi1> to vector<8x32xi1>
    %359 = arith.select %358, %354, %269 : vector<8x32xi1>, vector<8x32xf32>
    %360 = vector.shape_cast %356 : vector<8x1xi1> to vector<8x1xi1>
    %361 = vector.broadcast %360 : vector<8x1xi1> to vector<8x32xi1>
    %362 = arith.select %361, %352, %272 : vector<8x32xi1>, vector<8x32xf32>
    %cst_77 = arith.constant 0.000000e+00 : f32
    %363 = vector.shape_cast %356 : vector<8x1xi1> to vector<8x1xi1>
    %364 = vector.broadcast %363 : vector<8x1xi1> to vector<8x32xi1>
    %365 = vector.broadcast %cst_77 : f32 to vector<8x32xf32>
    %366 = arith.select %364, %354, %365 : vector<8x32xi1>, vector<8x32xf32>
    %367 = arith.addf %277, %366 : vector<8x32xf32>
    %c4_78 = arith.constant 4 : index
    %c0_79 = arith.constant 0 : index
    %c0_80 = arith.constant 0 : index
    %368 = vector.load %arg1[%c4_78, %c0_79, %c0_80] : memref<8x8x32xf32, #tpu.memory_space<vmem>>, vector<1x8x32xf32>
    %369 = vector.shape_cast %368 : vector<1x8x32xf32> to vector<8x32xf32>
    %cst_81 = arith.constant dense<0.000000e+00> : vector<8x128xf32>
    %370 = tpu.matmul %369, %1, %cst_81 {dimension_numbers = #tpu.dot_dimension_numbers<[1], [0], [0], [1], [0, 0, 1, 1], [], []>} : vector<8x32xf32>, vector<32x128xf32>, vector<8x128xf32> -> vector<8x128xf32>
    %cst_82 = arith.constant dense<0.000000e+00> : vector<8x128xf32>
    %371 = tpu.matmul %314, %2, %cst_82 {dimension_numbers = #tpu.dot_dimension_numbers<[1], [0], [0], [1], [0, 0, 1, 1], [], []>} : vector<8x32xf32>, vector<32x128xf32>, vector<8x128xf32> -> vector<8x128xf32>
    %372 = arith.addf %370, %371 : vector<8x128xf32>
    %373 = vector.broadcast %3 : vector<1x128xf32> to vector<8x128xf32>
    %374 = arith.addf %372, %373 : vector<8x128xf32>
    %375 = vector.extract_strided_slice %374 {offsets = [0, 0], sizes = [8, 32], strides = [1, 1]} : vector<8x128xf32> to vector<8x32xf32>
    %376 = arith.negf %375 : vector<8x32xf32>
    %377 = math.exp %376 : vector<8x32xf32>
    %cst_83 = arith.constant 1.000000e+00 : f32
    %378 = vector.broadcast %cst_83 : f32 to vector<8x32xf32>
    %379 = arith.addf %378, %377 : vector<8x32xf32>
    %380 = arith.divf %378, %379 : vector<8x32xf32>
    %381 = vector.extract_strided_slice %374 {offsets = [0, 32], sizes = [8, 32], strides = [1, 1]} : vector<8x128xf32> to vector<8x32xf32>
    %382 = arith.negf %381 : vector<8x32xf32>
    %383 = math.exp %382 : vector<8x32xf32>
    %cst_84 = arith.constant 1.000000e+00 : f32
    %384 = vector.broadcast %cst_84 : f32 to vector<8x32xf32>
    %385 = arith.addf %384, %383 : vector<8x32xf32>
    %386 = arith.divf %384, %385 : vector<8x32xf32>
    %387 = vector.extract_strided_slice %374 {offsets = [0, 64], sizes = [8, 32], strides = [1, 1]} : vector<8x128xf32> to vector<8x32xf32>
    %388 = math.tanh %387 : vector<8x32xf32>
    %389 = vector.extract_strided_slice %374 {offsets = [0, 96], sizes = [8, 32], strides = [1, 1]} : vector<8x128xf32> to vector<8x32xf32>
    %390 = arith.negf %389 : vector<8x32xf32>
    %391 = math.exp %390 : vector<8x32xf32>
    %cst_85 = arith.constant 1.000000e+00 : f32
    %392 = vector.broadcast %cst_85 : f32 to vector<8x32xf32>
    %393 = arith.addf %392, %391 : vector<8x32xf32>
    %394 = arith.divf %392, %393 : vector<8x32xf32>
    %395 = arith.mulf %386, %317 : vector<8x32xf32>
    %396 = arith.mulf %380, %388 : vector<8x32xf32>
    %397 = arith.addf %395, %396 : vector<8x32xf32>
    %398 = math.tanh %397 : vector<8x32xf32>
    %399 = arith.mulf %394, %398 : vector<8x32xf32>
    %c4_i32_86 = arith.constant 4 : i32
    %400 = vector.broadcast %c4_i32_86 : i32 to vector<8x1xi32>
    %401 = arith.cmpi sgt, %0, %400 : vector<8x1xi32>
    %402 = vector.shape_cast %401 : vector<8x1xi1> to vector<8x1xi1>
    %403 = vector.broadcast %402 : vector<8x1xi1> to vector<8x32xi1>
    %404 = arith.select %403, %399, %314 : vector<8x32xi1>, vector<8x32xf32>
    %405 = vector.shape_cast %401 : vector<8x1xi1> to vector<8x1xi1>
    %406 = vector.broadcast %405 : vector<8x1xi1> to vector<8x32xi1>
    %407 = arith.select %406, %397, %317 : vector<8x32xi1>, vector<8x32xf32>
    %cst_87 = arith.constant 0.000000e+00 : f32
    %408 = vector.shape_cast %401 : vector<8x1xi1> to vector<8x1xi1>
    %409 = vector.broadcast %408 : vector<8x1xi1> to vector<8x32xi1>
    %410 = vector.broadcast %cst_87 : f32 to vector<8x32xf32>
    %411 = arith.select %409, %399, %410 : vector<8x32xi1>, vector<8x32xf32>
    %412 = arith.addf %322, %411 : vector<8x32xf32>
    %c3_88 = arith.constant 3 : index
    %c0_89 = arith.constant 0 : index
    %c0_90 = arith.constant 0 : index
    %413 = vector.load %arg1[%c3_88, %c0_89, %c0_90] : memref<8x8x32xf32, #tpu.memory_space<vmem>>, vector<1x8x32xf32>
    %414 = vector.shape_cast %413 : vector<1x8x32xf32> to vector<8x32xf32>
    %cst_91 = arith.constant dense<0.000000e+00> : vector<8x128xf32>
    %415 = tpu.matmul %414, %4, %cst_91 {dimension_numbers = #tpu.dot_dimension_numbers<[1], [0], [0], [1], [0, 0, 1, 1], [], []>} : vector<8x32xf32>, vector<32x128xf32>, vector<8x128xf32> -> vector<8x128xf32>
    %cst_92 = arith.constant dense<0.000000e+00> : vector<8x128xf32>
    %416 = tpu.matmul %359, %5, %cst_92 {dimension_numbers = #tpu.dot_dimension_numbers<[1], [0], [0], [1], [0, 0, 1, 1], [], []>} : vector<8x32xf32>, vector<32x128xf32>, vector<8x128xf32> -> vector<8x128xf32>
    %417 = arith.addf %415, %416 : vector<8x128xf32>
    %418 = vector.broadcast %6 : vector<1x128xf32> to vector<8x128xf32>
    %419 = arith.addf %417, %418 : vector<8x128xf32>
    %420 = vector.extract_strided_slice %419 {offsets = [0, 0], sizes = [8, 32], strides = [1, 1]} : vector<8x128xf32> to vector<8x32xf32>
    %421 = arith.negf %420 : vector<8x32xf32>
    %422 = math.exp %421 : vector<8x32xf32>
    %cst_93 = arith.constant 1.000000e+00 : f32
    %423 = vector.broadcast %cst_93 : f32 to vector<8x32xf32>
    %424 = arith.addf %423, %422 : vector<8x32xf32>
    %425 = arith.divf %423, %424 : vector<8x32xf32>
    %426 = vector.extract_strided_slice %419 {offsets = [0, 32], sizes = [8, 32], strides = [1, 1]} : vector<8x128xf32> to vector<8x32xf32>
    %427 = arith.negf %426 : vector<8x32xf32>
    %428 = math.exp %427 : vector<8x32xf32>
    %cst_94 = arith.constant 1.000000e+00 : f32
    %429 = vector.broadcast %cst_94 : f32 to vector<8x32xf32>
    %430 = arith.addf %429, %428 : vector<8x32xf32>
    %431 = arith.divf %429, %430 : vector<8x32xf32>
    %432 = vector.extract_strided_slice %419 {offsets = [0, 64], sizes = [8, 32], strides = [1, 1]} : vector<8x128xf32> to vector<8x32xf32>
    %433 = math.tanh %432 : vector<8x32xf32>
    %434 = vector.extract_strided_slice %419 {offsets = [0, 96], sizes = [8, 32], strides = [1, 1]} : vector<8x128xf32> to vector<8x32xf32>
    %435 = arith.negf %434 : vector<8x32xf32>
    %436 = math.exp %435 : vector<8x32xf32>
    %cst_95 = arith.constant 1.000000e+00 : f32
    %437 = vector.broadcast %cst_95 : f32 to vector<8x32xf32>
    %438 = arith.addf %437, %436 : vector<8x32xf32>
    %439 = arith.divf %437, %438 : vector<8x32xf32>
    %440 = arith.mulf %431, %362 : vector<8x32xf32>
    %441 = arith.mulf %425, %433 : vector<8x32xf32>
    %442 = arith.addf %440, %441 : vector<8x32xf32>
    %443 = math.tanh %442 : vector<8x32xf32>
    %444 = arith.mulf %439, %443 : vector<8x32xf32>
    %c3_i32_96 = arith.constant 3 : i32
    %445 = vector.broadcast %c3_i32_96 : i32 to vector<8x1xi32>
    %446 = arith.cmpi sgt, %0, %445 : vector<8x1xi32>
    %447 = vector.shape_cast %446 : vector<8x1xi1> to vector<8x1xi1>
    %448 = vector.broadcast %447 : vector<8x1xi1> to vector<8x32xi1>
    %449 = arith.select %448, %444, %359 : vector<8x32xi1>, vector<8x32xf32>
    %450 = vector.shape_cast %446 : vector<8x1xi1> to vector<8x1xi1>
    %451 = vector.broadcast %450 : vector<8x1xi1> to vector<8x32xi1>
    %452 = arith.select %451, %442, %362 : vector<8x32xi1>, vector<8x32xf32>
    %cst_97 = arith.constant 0.000000e+00 : f32
    %453 = vector.shape_cast %446 : vector<8x1xi1> to vector<8x1xi1>
    %454 = vector.broadcast %453 : vector<8x1xi1> to vector<8x32xi1>
    %455 = vector.broadcast %cst_97 : f32 to vector<8x32xf32>
    %456 = arith.select %454, %444, %455 : vector<8x32xi1>, vector<8x32xf32>
    %457 = arith.addf %367, %456 : vector<8x32xf32>
    %c5_98 = arith.constant 5 : index
    %c0_99 = arith.constant 0 : index
    %c0_100 = arith.constant 0 : index
    %458 = vector.load %arg1[%c5_98, %c0_99, %c0_100] : memref<8x8x32xf32, #tpu.memory_space<vmem>>, vector<1x8x32xf32>
    %459 = vector.shape_cast %458 : vector<1x8x32xf32> to vector<8x32xf32>
    %cst_101 = arith.constant dense<0.000000e+00> : vector<8x128xf32>
    %460 = tpu.matmul %459, %1, %cst_101 {dimension_numbers = #tpu.dot_dimension_numbers<[1], [0], [0], [1], [0, 0, 1, 1], [], []>} : vector<8x32xf32>, vector<32x128xf32>, vector<8x128xf32> -> vector<8x128xf32>
    %cst_102 = arith.constant dense<0.000000e+00> : vector<8x128xf32>
    %461 = tpu.matmul %404, %2, %cst_102 {dimension_numbers = #tpu.dot_dimension_numbers<[1], [0], [0], [1], [0, 0, 1, 1], [], []>} : vector<8x32xf32>, vector<32x128xf32>, vector<8x128xf32> -> vector<8x128xf32>
    %462 = arith.addf %460, %461 : vector<8x128xf32>
    %463 = vector.broadcast %3 : vector<1x128xf32> to vector<8x128xf32>
    %464 = arith.addf %462, %463 : vector<8x128xf32>
    %465 = vector.extract_strided_slice %464 {offsets = [0, 0], sizes = [8, 32], strides = [1, 1]} : vector<8x128xf32> to vector<8x32xf32>
    %466 = arith.negf %465 : vector<8x32xf32>
    %467 = math.exp %466 : vector<8x32xf32>
    %cst_103 = arith.constant 1.000000e+00 : f32
    %468 = vector.broadcast %cst_103 : f32 to vector<8x32xf32>
    %469 = arith.addf %468, %467 : vector<8x32xf32>
    %470 = arith.divf %468, %469 : vector<8x32xf32>
    %471 = vector.extract_strided_slice %464 {offsets = [0, 32], sizes = [8, 32], strides = [1, 1]} : vector<8x128xf32> to vector<8x32xf32>
    %472 = arith.negf %471 : vector<8x32xf32>
    %473 = math.exp %472 : vector<8x32xf32>
    %cst_104 = arith.constant 1.000000e+00 : f32
    %474 = vector.broadcast %cst_104 : f32 to vector<8x32xf32>
    %475 = arith.addf %474, %473 : vector<8x32xf32>
    %476 = arith.divf %474, %475 : vector<8x32xf32>
    %477 = vector.extract_strided_slice %464 {offsets = [0, 64], sizes = [8, 32], strides = [1, 1]} : vector<8x128xf32> to vector<8x32xf32>
    %478 = math.tanh %477 : vector<8x32xf32>
    %479 = vector.extract_strided_slice %464 {offsets = [0, 96], sizes = [8, 32], strides = [1, 1]} : vector<8x128xf32> to vector<8x32xf32>
    %480 = arith.negf %479 : vector<8x32xf32>
    %481 = math.exp %480 : vector<8x32xf32>
    %cst_105 = arith.constant 1.000000e+00 : f32
    %482 = vector.broadcast %cst_105 : f32 to vector<8x32xf32>
    %483 = arith.addf %482, %481 : vector<8x32xf32>
    %484 = arith.divf %482, %483 : vector<8x32xf32>
    %485 = arith.mulf %476, %407 : vector<8x32xf32>
    %486 = arith.mulf %470, %478 : vector<8x32xf32>
    %487 = arith.addf %485, %486 : vector<8x32xf32>
    %488 = math.tanh %487 : vector<8x32xf32>
    %489 = arith.mulf %484, %488 : vector<8x32xf32>
    %c5_i32_106 = arith.constant 5 : i32
    %490 = vector.broadcast %c5_i32_106 : i32 to vector<8x1xi32>
    %491 = arith.cmpi sgt, %0, %490 : vector<8x1xi32>
    %492 = vector.shape_cast %491 : vector<8x1xi1> to vector<8x1xi1>
    %493 = vector.broadcast %492 : vector<8x1xi1> to vector<8x32xi1>
    %494 = arith.select %493, %489, %404 : vector<8x32xi1>, vector<8x32xf32>
    %495 = vector.shape_cast %491 : vector<8x1xi1> to vector<8x1xi1>
    %496 = vector.broadcast %495 : vector<8x1xi1> to vector<8x32xi1>
    %497 = arith.select %496, %487, %407 : vector<8x32xi1>, vector<8x32xf32>
    %cst_107 = arith.constant 0.000000e+00 : f32
    %498 = vector.shape_cast %491 : vector<8x1xi1> to vector<8x1xi1>
    %499 = vector.broadcast %498 : vector<8x1xi1> to vector<8x32xi1>
    %500 = vector.broadcast %cst_107 : f32 to vector<8x32xf32>
    %501 = arith.select %499, %489, %500 : vector<8x32xi1>, vector<8x32xf32>
    %502 = arith.addf %412, %501 : vector<8x32xf32>
    %c2_108 = arith.constant 2 : index
    %c0_109 = arith.constant 0 : index
    %c0_110 = arith.constant 0 : index
    %503 = vector.load %arg1[%c2_108, %c0_109, %c0_110] : memref<8x8x32xf32, #tpu.memory_space<vmem>>, vector<1x8x32xf32>
    %504 = vector.shape_cast %503 : vector<1x8x32xf32> to vector<8x32xf32>
    %cst_111 = arith.constant dense<0.000000e+00> : vector<8x128xf32>
    %505 = tpu.matmul %504, %4, %cst_111 {dimension_numbers = #tpu.dot_dimension_numbers<[1], [0], [0], [1], [0, 0, 1, 1], [], []>} : vector<8x32xf32>, vector<32x128xf32>, vector<8x128xf32> -> vector<8x128xf32>
    %cst_112 = arith.constant dense<0.000000e+00> : vector<8x128xf32>
    %506 = tpu.matmul %449, %5, %cst_112 {dimension_numbers = #tpu.dot_dimension_numbers<[1], [0], [0], [1], [0, 0, 1, 1], [], []>} : vector<8x32xf32>, vector<32x128xf32>, vector<8x128xf32> -> vector<8x128xf32>
    %507 = arith.addf %505, %506 : vector<8x128xf32>
    %508 = vector.broadcast %6 : vector<1x128xf32> to vector<8x128xf32>
    %509 = arith.addf %507, %508 : vector<8x128xf32>
    %510 = vector.extract_strided_slice %509 {offsets = [0, 0], sizes = [8, 32], strides = [1, 1]} : vector<8x128xf32> to vector<8x32xf32>
    %511 = arith.negf %510 : vector<8x32xf32>
    %512 = math.exp %511 : vector<8x32xf32>
    %cst_113 = arith.constant 1.000000e+00 : f32
    %513 = vector.broadcast %cst_113 : f32 to vector<8x32xf32>
    %514 = arith.addf %513, %512 : vector<8x32xf32>
    %515 = arith.divf %513, %514 : vector<8x32xf32>
    %516 = vector.extract_strided_slice %509 {offsets = [0, 32], sizes = [8, 32], strides = [1, 1]} : vector<8x128xf32> to vector<8x32xf32>
    %517 = arith.negf %516 : vector<8x32xf32>
    %518 = math.exp %517 : vector<8x32xf32>
    %cst_114 = arith.constant 1.000000e+00 : f32
    %519 = vector.broadcast %cst_114 : f32 to vector<8x32xf32>
    %520 = arith.addf %519, %518 : vector<8x32xf32>
    %521 = arith.divf %519, %520 : vector<8x32xf32>
    %522 = vector.extract_strided_slice %509 {offsets = [0, 64], sizes = [8, 32], strides = [1, 1]} : vector<8x128xf32> to vector<8x32xf32>
    %523 = math.tanh %522 : vector<8x32xf32>
    %524 = vector.extract_strided_slice %509 {offsets = [0, 96], sizes = [8, 32], strides = [1, 1]} : vector<8x128xf32> to vector<8x32xf32>
    %525 = arith.negf %524 : vector<8x32xf32>
    %526 = math.exp %525 : vector<8x32xf32>
    %cst_115 = arith.constant 1.000000e+00 : f32
    %527 = vector.broadcast %cst_115 : f32 to vector<8x32xf32>
    %528 = arith.addf %527, %526 : vector<8x32xf32>
    %529 = arith.divf %527, %528 : vector<8x32xf32>
    %530 = arith.mulf %521, %452 : vector<8x32xf32>
    %531 = arith.mulf %515, %523 : vector<8x32xf32>
    %532 = arith.addf %530, %531 : vector<8x32xf32>
    %533 = math.tanh %532 : vector<8x32xf32>
    %534 = arith.mulf %529, %533 : vector<8x32xf32>
    %c2_i32_116 = arith.constant 2 : i32
    %535 = vector.broadcast %c2_i32_116 : i32 to vector<8x1xi32>
    %536 = arith.cmpi sgt, %0, %535 : vector<8x1xi32>
    %537 = vector.shape_cast %536 : vector<8x1xi1> to vector<8x1xi1>
    %538 = vector.broadcast %537 : vector<8x1xi1> to vector<8x32xi1>
    %539 = arith.select %538, %534, %449 : vector<8x32xi1>, vector<8x32xf32>
    %540 = vector.shape_cast %536 : vector<8x1xi1> to vector<8x1xi1>
    %541 = vector.broadcast %540 : vector<8x1xi1> to vector<8x32xi1>
    %542 = arith.select %541, %532, %452 : vector<8x32xi1>, vector<8x32xf32>
    %cst_117 = arith.constant 0.000000e+00 : f32
    %543 = vector.shape_cast %536 : vector<8x1xi1> to vector<8x1xi1>
    %544 = vector.broadcast %543 : vector<8x1xi1> to vector<8x32xi1>
    %545 = vector.broadcast %cst_117 : f32 to vector<8x32xf32>
    %546 = arith.select %544, %534, %545 : vector<8x32xi1>, vector<8x32xf32>
    %547 = arith.addf %457, %546 : vector<8x32xf32>
    %c6_118 = arith.constant 6 : index
    %c0_119 = arith.constant 0 : index
    %c0_120 = arith.constant 0 : index
    %548 = vector.load %arg1[%c6_118, %c0_119, %c0_120] : memref<8x8x32xf32, #tpu.memory_space<vmem>>, vector<1x8x32xf32>
    %549 = vector.shape_cast %548 : vector<1x8x32xf32> to vector<8x32xf32>
    %cst_121 = arith.constant dense<0.000000e+00> : vector<8x128xf32>
    %550 = tpu.matmul %549, %1, %cst_121 {dimension_numbers = #tpu.dot_dimension_numbers<[1], [0], [0], [1], [0, 0, 1, 1], [], []>} : vector<8x32xf32>, vector<32x128xf32>, vector<8x128xf32> -> vector<8x128xf32>
    %cst_122 = arith.constant dense<0.000000e+00> : vector<8x128xf32>
    %551 = tpu.matmul %494, %2, %cst_122 {dimension_numbers = #tpu.dot_dimension_numbers<[1], [0], [0], [1], [0, 0, 1, 1], [], []>} : vector<8x32xf32>, vector<32x128xf32>, vector<8x128xf32> -> vector<8x128xf32>
    %552 = arith.addf %550, %551 : vector<8x128xf32>
    %553 = vector.broadcast %3 : vector<1x128xf32> to vector<8x128xf32>
    %554 = arith.addf %552, %553 : vector<8x128xf32>
    %555 = vector.extract_strided_slice %554 {offsets = [0, 0], sizes = [8, 32], strides = [1, 1]} : vector<8x128xf32> to vector<8x32xf32>
    %556 = arith.negf %555 : vector<8x32xf32>
    %557 = math.exp %556 : vector<8x32xf32>
    %cst_123 = arith.constant 1.000000e+00 : f32
    %558 = vector.broadcast %cst_123 : f32 to vector<8x32xf32>
    %559 = arith.addf %558, %557 : vector<8x32xf32>
    %560 = arith.divf %558, %559 : vector<8x32xf32>
    %561 = vector.extract_strided_slice %554 {offsets = [0, 32], sizes = [8, 32], strides = [1, 1]} : vector<8x128xf32> to vector<8x32xf32>
    %562 = arith.negf %561 : vector<8x32xf32>
    %563 = math.exp %562 : vector<8x32xf32>
    %cst_124 = arith.constant 1.000000e+00 : f32
    %564 = vector.broadcast %cst_124 : f32 to vector<8x32xf32>
    %565 = arith.addf %564, %563 : vector<8x32xf32>
    %566 = arith.divf %564, %565 : vector<8x32xf32>
    %567 = vector.extract_strided_slice %554 {offsets = [0, 64], sizes = [8, 32], strides = [1, 1]} : vector<8x128xf32> to vector<8x32xf32>
    %568 = math.tanh %567 : vector<8x32xf32>
    %569 = vector.extract_strided_slice %554 {offsets = [0, 96], sizes = [8, 32], strides = [1, 1]} : vector<8x128xf32> to vector<8x32xf32>
    %570 = arith.negf %569 : vector<8x32xf32>
    %571 = math.exp %570 : vector<8x32xf32>
    %cst_125 = arith.constant 1.000000e+00 : f32
    %572 = vector.broadcast %cst_125 : f32 to vector<8x32xf32>
    %573 = arith.addf %572, %571 : vector<8x32xf32>
    %574 = arith.divf %572, %573 : vector<8x32xf32>
    %575 = arith.mulf %566, %497 : vector<8x32xf32>
    %576 = arith.mulf %560, %568 : vector<8x32xf32>
    %577 = arith.addf %575, %576 : vector<8x32xf32>
    %578 = math.tanh %577 : vector<8x32xf32>
    %579 = arith.mulf %574, %578 : vector<8x32xf32>
    %c6_i32_126 = arith.constant 6 : i32
    %580 = vector.broadcast %c6_i32_126 : i32 to vector<8x1xi32>
    %581 = arith.cmpi sgt, %0, %580 : vector<8x1xi32>
    %582 = vector.shape_cast %581 : vector<8x1xi1> to vector<8x1xi1>
    %583 = vector.broadcast %582 : vector<8x1xi1> to vector<8x32xi1>
    %584 = arith.select %583, %579, %494 : vector<8x32xi1>, vector<8x32xf32>
    %585 = vector.shape_cast %581 : vector<8x1xi1> to vector<8x1xi1>
    %586 = vector.broadcast %585 : vector<8x1xi1> to vector<8x32xi1>
    %587 = arith.select %586, %577, %497 : vector<8x32xi1>, vector<8x32xf32>
    %cst_127 = arith.constant 0.000000e+00 : f32
    %588 = vector.shape_cast %581 : vector<8x1xi1> to vector<8x1xi1>
    %589 = vector.broadcast %588 : vector<8x1xi1> to vector<8x32xi1>
    %590 = vector.broadcast %cst_127 : f32 to vector<8x32xf32>
    %591 = arith.select %589, %579, %590 : vector<8x32xi1>, vector<8x32xf32>
    %592 = arith.addf %502, %591 : vector<8x32xf32>
    %c1_128 = arith.constant 1 : index
    %c0_129 = arith.constant 0 : index
    %c0_130 = arith.constant 0 : index
    %593 = vector.load %arg1[%c1_128, %c0_129, %c0_130] : memref<8x8x32xf32, #tpu.memory_space<vmem>>, vector<1x8x32xf32>
    %594 = vector.shape_cast %593 : vector<1x8x32xf32> to vector<8x32xf32>
    %cst_131 = arith.constant dense<0.000000e+00> : vector<8x128xf32>
    %595 = tpu.matmul %594, %4, %cst_131 {dimension_numbers = #tpu.dot_dimension_numbers<[1], [0], [0], [1], [0, 0, 1, 1], [], []>} : vector<8x32xf32>, vector<32x128xf32>, vector<8x128xf32> -> vector<8x128xf32>
    %cst_132 = arith.constant dense<0.000000e+00> : vector<8x128xf32>
    %596 = tpu.matmul %539, %5, %cst_132 {dimension_numbers = #tpu.dot_dimension_numbers<[1], [0], [0], [1], [0, 0, 1, 1], [], []>} : vector<8x32xf32>, vector<32x128xf32>, vector<8x128xf32> -> vector<8x128xf32>
    %597 = arith.addf %595, %596 : vector<8x128xf32>
    %598 = vector.broadcast %6 : vector<1x128xf32> to vector<8x128xf32>
    %599 = arith.addf %597, %598 : vector<8x128xf32>
    %600 = vector.extract_strided_slice %599 {offsets = [0, 0], sizes = [8, 32], strides = [1, 1]} : vector<8x128xf32> to vector<8x32xf32>
    %601 = arith.negf %600 : vector<8x32xf32>
    %602 = math.exp %601 : vector<8x32xf32>
    %cst_133 = arith.constant 1.000000e+00 : f32
    %603 = vector.broadcast %cst_133 : f32 to vector<8x32xf32>
    %604 = arith.addf %603, %602 : vector<8x32xf32>
    %605 = arith.divf %603, %604 : vector<8x32xf32>
    %606 = vector.extract_strided_slice %599 {offsets = [0, 32], sizes = [8, 32], strides = [1, 1]} : vector<8x128xf32> to vector<8x32xf32>
    %607 = arith.negf %606 : vector<8x32xf32>
    %608 = math.exp %607 : vector<8x32xf32>
    %cst_134 = arith.constant 1.000000e+00 : f32
    %609 = vector.broadcast %cst_134 : f32 to vector<8x32xf32>
    %610 = arith.addf %609, %608 : vector<8x32xf32>
    %611 = arith.divf %609, %610 : vector<8x32xf32>
    %612 = vector.extract_strided_slice %599 {offsets = [0, 64], sizes = [8, 32], strides = [1, 1]} : vector<8x128xf32> to vector<8x32xf32>
    %613 = math.tanh %612 : vector<8x32xf32>
    %614 = vector.extract_strided_slice %599 {offsets = [0, 96], sizes = [8, 32], strides = [1, 1]} : vector<8x128xf32> to vector<8x32xf32>
    %615 = arith.negf %614 : vector<8x32xf32>
    %616 = math.exp %615 : vector<8x32xf32>
    %cst_135 = arith.constant 1.000000e+00 : f32
    %617 = vector.broadcast %cst_135 : f32 to vector<8x32xf32>
    %618 = arith.addf %617, %616 : vector<8x32xf32>
    %619 = arith.divf %617, %618 : vector<8x32xf32>
    %620 = arith.mulf %611, %542 : vector<8x32xf32>
    %621 = arith.mulf %605, %613 : vector<8x32xf32>
    %622 = arith.addf %620, %621 : vector<8x32xf32>
    %623 = math.tanh %622 : vector<8x32xf32>
    %624 = arith.mulf %619, %623 : vector<8x32xf32>
    %c1_i32_136 = arith.constant 1 : i32
    %625 = vector.broadcast %c1_i32_136 : i32 to vector<8x1xi32>
    %626 = arith.cmpi sgt, %0, %625 : vector<8x1xi32>
    %627 = vector.shape_cast %626 : vector<8x1xi1> to vector<8x1xi1>
    %628 = vector.broadcast %627 : vector<8x1xi1> to vector<8x32xi1>
    %629 = arith.select %628, %624, %539 : vector<8x32xi1>, vector<8x32xf32>
    %630 = vector.shape_cast %626 : vector<8x1xi1> to vector<8x1xi1>
    %631 = vector.broadcast %630 : vector<8x1xi1> to vector<8x32xi1>
    %632 = arith.select %631, %622, %542 : vector<8x32xi1>, vector<8x32xf32>
    %cst_137 = arith.constant 0.000000e+00 : f32
    %633 = vector.shape_cast %626 : vector<8x1xi1> to vector<8x1xi1>
    %634 = vector.broadcast %633 : vector<8x1xi1> to vector<8x32xi1>
    %635 = vector.broadcast %cst_137 : f32 to vector<8x32xf32>
    %636 = arith.select %634, %624, %635 : vector<8x32xi1>, vector<8x32xf32>
    %637 = arith.addf %547, %636 : vector<8x32xf32>
    %c7_138 = arith.constant 7 : index
    %c0_139 = arith.constant 0 : index
    %c0_140 = arith.constant 0 : index
    %638 = vector.load %arg1[%c7_138, %c0_139, %c0_140] : memref<8x8x32xf32, #tpu.memory_space<vmem>>, vector<1x8x32xf32>
    %639 = vector.shape_cast %638 : vector<1x8x32xf32> to vector<8x32xf32>
    %cst_141 = arith.constant dense<0.000000e+00> : vector<8x128xf32>
    %640 = tpu.matmul %639, %1, %cst_141 {dimension_numbers = #tpu.dot_dimension_numbers<[1], [0], [0], [1], [0, 0, 1, 1], [], []>} : vector<8x32xf32>, vector<32x128xf32>, vector<8x128xf32> -> vector<8x128xf32>
    %cst_142 = arith.constant dense<0.000000e+00> : vector<8x128xf32>
    %641 = tpu.matmul %584, %2, %cst_142 {dimension_numbers = #tpu.dot_dimension_numbers<[1], [0], [0], [1], [0, 0, 1, 1], [], []>} : vector<8x32xf32>, vector<32x128xf32>, vector<8x128xf32> -> vector<8x128xf32>
    %642 = arith.addf %640, %641 : vector<8x128xf32>
    %643 = vector.broadcast %3 : vector<1x128xf32> to vector<8x128xf32>
    %644 = arith.addf %642, %643 : vector<8x128xf32>
    %645 = vector.extract_strided_slice %644 {offsets = [0, 0], sizes = [8, 32], strides = [1, 1]} : vector<8x128xf32> to vector<8x32xf32>
    %646 = arith.negf %645 : vector<8x32xf32>
    %647 = math.exp %646 : vector<8x32xf32>
    %cst_143 = arith.constant 1.000000e+00 : f32
    %648 = vector.broadcast %cst_143 : f32 to vector<8x32xf32>
    %649 = arith.addf %648, %647 : vector<8x32xf32>
    %650 = arith.divf %648, %649 : vector<8x32xf32>
    %651 = vector.extract_strided_slice %644 {offsets = [0, 32], sizes = [8, 32], strides = [1, 1]} : vector<8x128xf32> to vector<8x32xf32>
    %652 = arith.negf %651 : vector<8x32xf32>
    %653 = math.exp %652 : vector<8x32xf32>
    %cst_144 = arith.constant 1.000000e+00 : f32
    %654 = vector.broadcast %cst_144 : f32 to vector<8x32xf32>
    %655 = arith.addf %654, %653 : vector<8x32xf32>
    %656 = arith.divf %654, %655 : vector<8x32xf32>
    %657 = vector.extract_strided_slice %644 {offsets = [0, 64], sizes = [8, 32], strides = [1, 1]} : vector<8x128xf32> to vector<8x32xf32>
    %658 = math.tanh %657 : vector<8x32xf32>
    %659 = vector.extract_strided_slice %644 {offsets = [0, 96], sizes = [8, 32], strides = [1, 1]} : vector<8x128xf32> to vector<8x32xf32>
    %660 = arith.negf %659 : vector<8x32xf32>
    %661 = math.exp %660 : vector<8x32xf32>
    %cst_145 = arith.constant 1.000000e+00 : f32
    %662 = vector.broadcast %cst_145 : f32 to vector<8x32xf32>
    %663 = arith.addf %662, %661 : vector<8x32xf32>
    %664 = arith.divf %662, %663 : vector<8x32xf32>
    %665 = arith.mulf %656, %587 : vector<8x32xf32>
    %666 = arith.mulf %650, %658 : vector<8x32xf32>
    %667 = arith.addf %665, %666 : vector<8x32xf32>
    %668 = math.tanh %667 : vector<8x32xf32>
    %669 = arith.mulf %664, %668 : vector<8x32xf32>
    %c7_i32_146 = arith.constant 7 : i32
    %670 = vector.broadcast %c7_i32_146 : i32 to vector<8x1xi32>
    %671 = arith.cmpi sgt, %0, %670 : vector<8x1xi32>
    %cst_147 = arith.constant 0.000000e+00 : f32
    %672 = vector.shape_cast %671 : vector<8x1xi1> to vector<8x1xi1>
    %673 = vector.broadcast %672 : vector<8x1xi1> to vector<8x32xi1>
    %674 = vector.broadcast %cst_147 : f32 to vector<8x32xf32>
    %675 = arith.select %673, %669, %674 : vector<8x32xi1>, vector<8x32xf32>
    %676 = arith.addf %592, %675 : vector<8x32xf32>
    %c0_148 = arith.constant 0 : index
    %c0_149 = arith.constant 0 : index
    %c0_150 = arith.constant 0 : index
    %677 = vector.load %arg1[%c0_148, %c0_149, %c0_150] : memref<8x8x32xf32, #tpu.memory_space<vmem>>, vector<1x8x32xf32>
    %678 = vector.shape_cast %677 : vector<1x8x32xf32> to vector<8x32xf32>
    %cst_151 = arith.constant dense<0.000000e+00> : vector<8x128xf32>
    %679 = tpu.matmul %678, %4, %cst_151 {dimension_numbers = #tpu.dot_dimension_numbers<[1], [0], [0], [1], [0, 0, 1, 1], [], []>} : vector<8x32xf32>, vector<32x128xf32>, vector<8x128xf32> -> vector<8x128xf32>
    %cst_152 = arith.constant dense<0.000000e+00> : vector<8x128xf32>
    %680 = tpu.matmul %629, %5, %cst_152 {dimension_numbers = #tpu.dot_dimension_numbers<[1], [0], [0], [1], [0, 0, 1, 1], [], []>} : vector<8x32xf32>, vector<32x128xf32>, vector<8x128xf32> -> vector<8x128xf32>
    %681 = arith.addf %679, %680 : vector<8x128xf32>
    %682 = vector.broadcast %6 : vector<1x128xf32> to vector<8x128xf32>
    %683 = arith.addf %681, %682 : vector<8x128xf32>
    %684 = vector.extract_strided_slice %683 {offsets = [0, 0], sizes = [8, 32], strides = [1, 1]} : vector<8x128xf32> to vector<8x32xf32>
    %685 = arith.negf %684 : vector<8x32xf32>
    %686 = math.exp %685 : vector<8x32xf32>
    %cst_153 = arith.constant 1.000000e+00 : f32
    %687 = vector.broadcast %cst_153 : f32 to vector<8x32xf32>
    %688 = arith.addf %687, %686 : vector<8x32xf32>
    %689 = arith.divf %687, %688 : vector<8x32xf32>
    %690 = vector.extract_strided_slice %683 {offsets = [0, 32], sizes = [8, 32], strides = [1, 1]} : vector<8x128xf32> to vector<8x32xf32>
    %691 = arith.negf %690 : vector<8x32xf32>
    %692 = math.exp %691 : vector<8x32xf32>
    %cst_154 = arith.constant 1.000000e+00 : f32
    %693 = vector.broadcast %cst_154 : f32 to vector<8x32xf32>
    %694 = arith.addf %693, %692 : vector<8x32xf32>
    %695 = arith.divf %693, %694 : vector<8x32xf32>
    %696 = vector.extract_strided_slice %683 {offsets = [0, 64], sizes = [8, 32], strides = [1, 1]} : vector<8x128xf32> to vector<8x32xf32>
    %697 = math.tanh %696 : vector<8x32xf32>
    %698 = vector.extract_strided_slice %683 {offsets = [0, 96], sizes = [8, 32], strides = [1, 1]} : vector<8x128xf32> to vector<8x32xf32>
    %699 = arith.negf %698 : vector<8x32xf32>
    %700 = math.exp %699 : vector<8x32xf32>
    %cst_155 = arith.constant 1.000000e+00 : f32
    %701 = vector.broadcast %cst_155 : f32 to vector<8x32xf32>
    %702 = arith.addf %701, %700 : vector<8x32xf32>
    %703 = arith.divf %701, %702 : vector<8x32xf32>
    %704 = arith.mulf %695, %632 : vector<8x32xf32>
    %705 = arith.mulf %689, %697 : vector<8x32xf32>
    %706 = arith.addf %704, %705 : vector<8x32xf32>
    %707 = math.tanh %706 : vector<8x32xf32>
    %708 = arith.mulf %703, %707 : vector<8x32xf32>
    %c0_i32_156 = arith.constant 0 : i32
    %709 = vector.broadcast %c0_i32_156 : i32 to vector<8x1xi32>
    %710 = arith.cmpi sgt, %0, %709 : vector<8x1xi32>
    %cst_157 = arith.constant 0.000000e+00 : f32
    %711 = vector.shape_cast %710 : vector<8x1xi1> to vector<8x1xi1>
    %712 = vector.broadcast %711 : vector<8x1xi1> to vector<8x32xi1>
    %713 = vector.broadcast %cst_157 : f32 to vector<8x32xf32>
    %714 = arith.select %712, %708, %713 : vector<8x32xi1>, vector<8x32xf32>
    %715 = arith.addf %637, %714 : vector<8x32xf32>
    %716 = arith.sitofp %0 : vector<8x1xi32> to vector<8x1xf32>
    %717 = vector.shape_cast %716 : vector<8x1xf32> to vector<1x8x1xf32>
    %cst_158 = arith.constant dense<0xFF800000> : vector<1xf32>
    %718 = vector.multi_reduction <maximumf>, %717, %cst_158 [1, 2] : vector<1x8x1xf32> to vector<1xf32>
    %719 = vector.shape_cast %718 : vector<1xf32> to vector<1x1x1xf32>
    %720 = vector.extract %719[0, 0, 0] : f32 from vector<1x1x1xf32>
    %cst_159 = arith.constant 1.000000e+00 : f32
    %721 = arith.divf %cst_159, %720 : f32
    %722 = vector.broadcast %721 : f32 to vector<8x32xf32>
    %723 = arith.mulf %676, %722 : vector<8x32xf32>
    %724 = vector.broadcast %721 : f32 to vector<8x32xf32>
    %725 = arith.mulf %715, %724 : vector<8x32xf32>
    %c0_160 = arith.constant 0 : index
    %c0_161 = arith.constant 0 : index
    %726 = vector.load %arg8[%c0_160, %c0_161] : memref<8x512xf32, #tpu.memory_space<vmem>>, vector<8x512xf32>
    %c0_162 = arith.constant 0 : index
    %c0_163 = arith.constant 0 : index
    %727 = vector.load %arg9[%c0_162, %c0_163] : memref<512x8xf32, #tpu.memory_space<vmem>>, vector<512x8xf32>
    %cst_164 = arith.constant dense<0.000000e+00> : vector<8x8xf32>
    %728 = tpu.matmul %726, %727, %cst_164 {dimension_numbers = #tpu.dot_dimension_numbers<[1], [0], [0], [1], [0, 0, 1, 1], [], []>} : vector<8x512xf32>, vector<512x8xf32>, vector<8x8xf32> -> vector<8x8xf32>
    %c0_165 = arith.constant 0 : index
    %c0_166 = arith.constant 0 : index
    %729 = vector.load %arg10[%c0_165, %c0_166] : memref<1x8xf32, #tpu.memory_space<vmem>>, vector<1x8xf32>
    %730 = vector.broadcast %729 : vector<1x8xf32> to vector<8x8xf32>
    %731 = arith.addf %728, %730 : vector<8x8xf32>
    %c0_167 = arith.constant 0 : index
    %c0_168 = arith.constant 0 : index
    %732 = vector.load %arg11[%c0_167, %c0_168] : memref<8x32xf32, #tpu.memory_space<vmem>>, vector<8x32xf32>
    %733 = arith.mulf %723, %732 : vector<8x32xf32>
    %c0_169 = arith.constant 0 : index
    %c0_170 = arith.constant 0 : index
    %734 = vector.load %arg14[%c0_169, %c0_170] : memref<32x32xf32, #tpu.memory_space<vmem>>, vector<32x32xf32>
    %cst_171 = arith.constant dense<0.000000e+00> : vector<8x32xf32>
    %735 = tpu.matmul %733, %734, %cst_171 {dimension_numbers = #tpu.dot_dimension_numbers<[1], [0], [0], [1], [0, 0, 1, 1], [], []>} : vector<8x32xf32>, vector<32x32xf32>, vector<8x32xf32> -> vector<8x32xf32>
    %c0_172 = arith.constant 0 : index
    %c0_173 = arith.constant 0 : index
    %736 = vector.load %arg12[%c0_172, %c0_173] : memref<8x32xf32, #tpu.memory_space<vmem>>, vector<8x32xf32>
    %737 = arith.mulf %725, %736 : vector<8x32xf32>
    %c0_174 = arith.constant 0 : index
    %c0_175 = arith.constant 0 : index
    %738 = vector.load %arg15[%c0_174, %c0_175] : memref<32x32xf32, #tpu.memory_space<vmem>>, vector<32x32xf32>
    %cst_176 = arith.constant dense<0.000000e+00> : vector<8x32xf32>
    %739 = tpu.matmul %737, %738, %cst_176 {dimension_numbers = #tpu.dot_dimension_numbers<[1], [0], [0], [1], [0, 0, 1, 1], [], []>} : vector<8x32xf32>, vector<32x32xf32>, vector<8x32xf32> -> vector<8x32xf32>
    %740 = arith.addf %735, %739 : vector<8x32xf32>
    %c0_177 = arith.constant 0 : index
    %c0_178 = arith.constant 0 : index
    %741 = vector.load %arg13[%c0_177, %c0_178] : memref<8x8xf32, #tpu.memory_space<vmem>>, vector<8x8xf32>
    %742 = arith.mulf %731, %741 : vector<8x8xf32>
    %c0_179 = arith.constant 0 : index
    %c0_180 = arith.constant 0 : index
    %743 = vector.load %arg16[%c0_179, %c0_180] : memref<8x32xf32, #tpu.memory_space<vmem>>, vector<8x32xf32>
    %cst_181 = arith.constant dense<0.000000e+00> : vector<8x32xf32>
    %744 = tpu.matmul %742, %743, %cst_181 {dimension_numbers = #tpu.dot_dimension_numbers<[1], [0], [0], [1], [0, 0, 1, 1], [], []>} : vector<8x8xf32>, vector<8x32xf32>, vector<8x32xf32> -> vector<8x32xf32>
    %745 = arith.addf %740, %744 : vector<8x32xf32>
    %c0_182 = arith.constant 0 : index
    %c0_183 = arith.constant 0 : index
    %746 = vector.load %arg17[%c0_182, %c0_183] : memref<1x32xf32, #tpu.memory_space<vmem>>, vector<1x32xf32>
    %747 = vector.broadcast %746 : vector<1x32xf32> to vector<8x32xf32>
    %748 = arith.addf %745, %747 : vector<8x32xf32>
    %cst_184 = arith.constant 0.000000e+00 : f32
    %749 = vector.broadcast %cst_184 : f32 to vector<8x32xf32>
    %750 = arith.maximumf %748, %749 : vector<8x32xf32>
    %c0_185 = arith.constant 0 : index
    %c0_186 = arith.constant 0 : index
    %751 = vector.load %arg18[%c0_185, %c0_186] : memref<32x128xf32, #tpu.memory_space<vmem>>, vector<32x128xf32>
    %cst_187 = arith.constant dense<0.000000e+00> : vector<8x128xf32>
    %752 = tpu.matmul %750, %751, %cst_187 {dimension_numbers = #tpu.dot_dimension_numbers<[1], [0], [0], [1], [0, 0, 1, 1], [], []>} : vector<8x32xf32>, vector<32x128xf32>, vector<8x128xf32> -> vector<8x128xf32>
    %c0_188 = arith.constant 0 : index
    %c0_189 = arith.constant 0 : index
    %753 = vector.load %arg19[%c0_188, %c0_189] : memref<1x128xf32, #tpu.memory_space<vmem>>, vector<1x128xf32>
    %754 = vector.broadcast %753 : vector<1x128xf32> to vector<8x128xf32>
    %755 = arith.addf %752, %754 : vector<8x128xf32>
    %c0_190 = arith.constant 0 : index
    %c0_191 = arith.constant 0 : index
    %756 = vector.load %arg20[%c0_190, %c0_191] : memref<8x128xf32, #tpu.memory_space<vmem>>, vector<8x128xf32>
    tpu.vector_store %arg20[%c0_190, %c0_191], %755 {strides = array<i32>} : memref<8x128xf32, #tpu.memory_space<vmem>>, vector<8x128xf32>,
    return
  }
}

</mosaic_0001>

<bundles_post_ra>
// kernel: tpu_custom_call.1
= control target key start
LH: loop header
LB: loop body
LE: loop exit
PB: predicated region body
PF: predicated region fallthrough
CT: control target
= control target key end

     0   :  { %s5865_s0 = inlined_call_operand.vmem [shape: s32[8,1], index: 0, kind: input, shape index: {}]   ;;  %s5866_s1 = inlined_call_operand.vmem [shape: f32[8,8,32], index: 1, kind: input, shape index: {}]   ;;  %s5867_s2 = inlined_call_operand.vmem [shape: f32[32,128], index: 2, kind: input, shape index: {}]   ;;  %s5868_s3 = inlined_call_operand.vmem [shape: f32[32,128], index: 3, kind: input, shape index: {}]   ;;  %s5869_s4 = inlined_call_operand.vmem [shape: f32[1,128], index: 4, kind: input, shape index: {}]   ;;  %s5870_s5 = inlined_call_operand.vmem [shape: f32[32,128], index: 5, kind: input, shape index: {}]   ;;  %s5871_s6 = inlined_call_operand.vmem [shape: f32[32,128], index: 6, kind: input, shape index: {}]   ;;  %s5872_s7 = inlined_call_operand.vmem [shape: f32[1,128], index: 7, kind: input, shape index: {}]   ;;  %s5873_s8 = inlined_call_operand.vmem [shape: f32[8,512], index: 8, kind: input, shape index: {}]   ;;  %s5874_s9 = inlined_call_operand.vmem [shape: f32[512,8], index: 9, kind: input, shape index: {}]   ;;  %s5875_s10 = inlined_call_operand.vmem [shape: f32[1,8], index: 10, kind: input, shape index: {}]   ;;  %s5876_s11 = inlined_call_operand.vmem [shape: f32[8,32], index: 11, kind: input, shape index: {}]   ;;  %s5877_s12 = inlined_call_operand.vmem [shape: f32[8,32], index: 12, kind: input, shape index: {}]   ;;  %s5878_s13 = inlined_call_operand.vmem [shape: f32[8,8], index: 13, kind: input, shape index: {}]   ;;  %s5879_s14 = inlined_call_operand.vmem [shape: f32[32,32], index: 14, kind: input, shape index: {}]   ;;  %s5880_s15 = inlined_call_operand.vmem [shape: f32[32,32], index: 15, kind: input, shape index: {}]   ;;  %s5881_s16 = inlined_call_operand.vmem [shape: f32[8,32], index: 16, kind: input, shape index: {}]   ;;  %s5882_s17 = inlined_call_operand.vmem [shape: f32[1,32], index: 17, kind: input, shape index: {}]   ;;  %s5883_s18 = inlined_call_operand.vmem [shape: f32[32,128], index: 18, kind: input, shape index: {}]   ;;  %s5884_s19 = inlined_call_operand.vmem [shape: f32[1,128], index: 19, kind: input, shape index: {}]   ;;  %s5885_s20 = inlined_call_operand.hbm [shape: f32[8,128], index: 20, kind: output, shape index: {}]  }
   0x1   :  { %5891 = sst [smem:[#allocation5_spill]] %s5865_s0 }
   0x2   :  { %5892 = sst [smem:[#allocation6_spill]] %s5866_s1 }
   0x3   :  { %5893 = sst [smem:[#allocation7_spill]] %s5867_s2 }
   0x4   :  { %5894 = sst [smem:[#allocation8_spill]] %s5868_s3 }
   0x5   :  { %5895 = sst [smem:[#allocation9_spill]] %s5869_s4 }
   0x6   :  { %s5896_s23 = sld [smem:[#allocation8_spill]]  ;;  %s5897_s26 = sld [smem:[#allocation7_spill]]  ;;  %v4689_v3 = vmov 0.0|0.0   ;;  %vm4690_vm0 = vmmov 0   ;;  %v4691_v11 = vmov 0.0   ;;  %v80_v14 = vld [vmem:[%s5871_s6] sm:$0xff] }
   0x7   :  { %4244 = vmatprep.subr.bf16.mxu0 %v4689_v3  ;;  %4250 = vmatprep.subr.bf16.mxu1 %v4689_v3  ;;  %v81_v15 = vld [vmem:[%s5871_s6 + $0x8] sm:$0xff]  ;;  %v76_v16 = vld [vmem:[%s5870_s5] sm:$0xff] }
   0x8   :  { %3862 = vmatprep.mubr.msk.f32.mxu0 %vm4690_vm0, %v4691_v11  ;;  %3873 = vmatprep.mubr.msk.f32.mxu1 %vm4690_vm0, %v4691_v11  ;;  %v77_v17 = vld [vmem:[%s5870_s5 + $0x8] sm:$0xff] }
   0xc   :  { %v71_v0 = vld [vmem:[%s5896_s23] sm:$0xff]  ;;  %v72_v1 = vld [vmem:[%s5896_s23 + $0x8] sm:$0xff]  ;;  %v73_v6 = vld [vmem:[%s5896_s23 + $0x10] sm:$0xff] }
   0xd   :  { %v67_v2 = vld [vmem:[%s5897_s26] sm:$0xff]  ;;  %v4813_v4 = vpack.c.bf16 %v72_v1, %v71_v0  ;;  %v68_v5 = vld [vmem:[%s5897_s26 + $0x8] sm:$0xff]  ;;  %v74_v7 = vld [vmem:[%s5896_s23 + $0x18] sm:$0xff] }
   0xe   :  { %v4824_v8 = vpack.c.bf16 %v68_v5, %v67_v2  ;;  %v69_v9 = vld [vmem:[%s5897_s26 + $0x10] sm:$0xff]  ;;  %v70_v10 = vld [vmem:[%s5897_s26 + $0x18] sm:$0xff]  ;;  %v4837_v12 = vpack.c.bf16 %v74_v7, %v73_v6 }
   0xf   :  { %4246 = vmatpush3.bf16.msra.mxu0 %v4813_v4  ;;  %v4841_v13 = vpack.c.bf16 %v70_v10, %v69_v9 }
  0x10   :  { %4252 = vmatpush3.bf16.msra.mxu1 %v4824_v8  ;;  %4247 = vmatprep.subr.bf16.mxu0 %v4689_v3 }
  0x11   :  { %4253 = vmatprep.subr.bf16.mxu1 %v4689_v3 }
  0x12   :  { %25 = vsyncpa [#allocation3], 0  ;;  %v4857_v18 = vpack.c.bf16 %v81_v15, %v80_v14  ;;  %s5898_s0 = sld [smem:[#allocation6_spill]]  ;;  %vm86_vm1 = vcmask 261120   ;;  %v4866_v20 = vpack.c.bf16 %v77_v17, %v76_v16  ;;  %v82_v21 = vld [vmem:[%s5871_s6 + $0x10] sm:$0xff]  ;;  %v83_v22 = vld [vmem:[%s5871_s6 + $0x18] sm:$0xff] }
  0x13   :  { %4249 = vmatpush3.bf16.msra.mxu0 %v4837_v12  ;;  %v78_v23 = vld [vmem:[%s5870_s5 + $0x10] sm:$0xff]  ;;  %v79_v24 = vld [vmem:[%s5870_s5 + $0x18] sm:$0xff]  ;;  %v4885_v25 = vpack.c.bf16 %v83_v22, %v82_v21  ;;  %v4692_v28 = vmov 0   ;;  %s5899_s28 = sld [smem:[#allocation9_spill]]  ;;  %v4931_v37 = vld [vmem:[%s5872_s7] ss:$0 sm:$0xff] }
  0x14   :  { %4255 = vmatpush3.bf16.msra.mxu1 %v4841_v13  ;;  %4256 = vmatprep.subr.bf16.mxu0 %v4689_v3  ;;  %v4889_v26 = vpack.c.bf16 %v79_v24, %v78_v23  ;;  %s4693_s30 = smov 64   ;;  %s5900_s22 = sld [smem:[#allocation5_spill]] }
  0x15   :  { %4262 = vmatprep.subr.bf16.mxu1 %v4689_v3  ;;  %4530 = vset.pattern.permute.xlu0 %v4692_v28  ;;  %s4694_s24 = smov 32   ;;  %s4696_s6 = smov [#allocation2]  }
  0x16   :  { %3863 = vmatmul.mubr.f32.vlgmr.msra.gmra.mrb[0].mxu0 %v4691_v11  ;;  %4531 = vset.pattern.permute.xlu1 %v4692_v28  ;;  %s3537_s26 = sshll.u32 %s4696_s6, 4  ;;  %s3538_s26 = int_to_ptr.vmem [resolvable:$true] %s3537_s26 }
  0x17   :  { %4258 = vmatpush3.bf16.msra.mxu0 %v4857_v18  ;;  %3884 = vmatprep.mubr.msk.f32.mxu0 %vm4690_vm0, %v4691_v11  ;;  %p4670_p1 = scmp.lt.s32.totalorder %s3538_s26, %s3538_s26 }
  0x18   :  { %v4863_v19 = vld [vmem:[%s5898_s0] sm:$0xff]  ;;  %4259 = vmatprep.subr.bf16.mxu0 %v4689_v3  ;;  %v4901_v27 = vld [vmem:[%s5898_s0 + $0x38] sm:$0xff]  ;;  %v4958_v6 = vld [vmem:[%s5898_s0 + $0x8] sm:$0xff] }
  0x19   :  { %3874 = vmatmul.mubr.msk.f32.vlgmr.msra.gmra.mrb[0].mxu1 %vm86_vm1, %v4863_v19  ;;  %v4925_v30 = vld [vmem:[%s5899_s28] ss:$0 sm:$0xff]  ;;  %v4970_v7 = vld [vmem:[%s5898_s0 + $0x30] sm:$0xff] }
  0x1a   :  { %4264 = vmatpush3.bf16.msra.mxu1 %v4866_v20  ;;  %3895 = vmatprep.mubr.msk.f32.mxu1 %vm4690_vm0, %v4691_v11  ;;  %v4938_v44 = vld [vmem:[%s5900_s22] sm:$0xff] }
  0x1b   :  { %4265 = vmatprep.subr.bf16.mxu1 %v4689_v3  ;;  %4261 = vmatpush3.bf16.msra.mxu0 %v4885_v25  ;;  %vm264_vm2 = vcmp.gt.s32.totalorder %v4938_v44, 0  ;;  %vm449_vm3 = vcmp.gt.s32.totalorder %v4938_v44, 7  ;;  %vm633_vm6 = vcmp.gt.s32.totalorder %v4938_v44, 1  ;;  %vm818_vm7 = vcmp.gt.s32.totalorder %v4938_v44, 6 }
  0x1c   :  { %4268 = vmatprep.subr.bf16.mxu0 %v4689_v3  ;;  %v265_v46 = vsel %vm264_vm2, 1, %v4692_v28  ;;  %v450_v2 = vsel %vm449_vm3, 1, %v4692_v28  ;;  %vm1003_vm10 = vcmp.gt.s32.totalorder %v4938_v44, 2  ;;  %vm1188_vm11 = vcmp.gt.s32.totalorder %v4938_v44, 5 }
  0x1d   :  { %vm1373_vm14 = vcmp.gt.s32.totalorder %v4938_v44, 3  ;;  %vm1558_vm15 = vcmp.gt.s32.totalorder %v4938_v44, 4 }
  0x1e   :  { %4267 = vmatpush3.bf16.msra.mxu1 %v4889_v26  ;;  %3885 = vmatmul.mubr.f32.vlgmr.msra.gmra.mrb[2].mxu0 %v4691_v11 }
  0x1f   :  { %4274 = vmatprep.subr.bf16.mxu1 %v4689_v3  ;;  %4270 = vmatpush3.bf16.msra.mxu0 %v4813_v4 }
  0x20   :  { %4271 = vmatprep.subr.bf16.mxu0 %v4689_v3  ;;  %3906 = vmatprep.mubr.msk.f32.mxu0 %vm4690_vm0, %v4691_v11 }
  0x21   :  { %3896 = vmatmul.mubr.msk.f32.vlgmr.msra.gmra.mrb[2].mxu1 %vm86_vm1, %v4901_v27 }
  0x22   :  { %4276 = vmatpush3.bf16.msra.mxu1 %v4824_v8  ;;  %3917 = vmatprep.mubr.msk.f32.mxu1 %vm4690_vm0, %v4691_v11 }
  0x23   :  { %4277 = vmatprep.subr.bf16.mxu1 %v4689_v3  ;;  %4273 = vmatpush3.bf16.msra.mxu0 %v4837_v12 }
  0x24   :  { %4280 = vmatprep.subr.bf16.mxu0 %v4689_v3 }
  0x26   :  { %4279 = vmatpush3.bf16.msra.mxu1 %v4841_v13 }
  0x27   :  { %4286 = vmatprep.subr.bf16.mxu1 %v4689_v3 }
  0x29   :  { %3918 = vmatmul.mubr.msk.f32.vlgmr.msra.gmra.mrb[4].mxu1 %vm86_vm1, %v4958_v6 }
  0x2a   :  { %4288 = vmatpush3.bf16.msra.mxu1 %v4866_v20  ;;  %3939 = vmatprep.mubr.msk.f32.mxu1 %vm4690_vm0, %v4691_v11 }
  0x2b   :  { %4289 = vmatprep.subr.bf16.mxu1 %v4689_v3 }
  0x2e   :  { %4291 = vmatpush3.bf16.msra.mxu1 %v4889_v26 }
  0x2f   :  { %4298 = vmatprep.subr.bf16.mxu1 %v4689_v3 }
  0x31   :  { %3940 = vmatmul.mubr.msk.f32.vlgmr.msra.gmra.mrb[6].mxu1 %vm86_vm1, %v4970_v7 }
  0x32   :  { %4300 = vmatpush3.bf16.msra.mxu1 %v4824_v8  ;;  %3961 = vmatprep.mubr.msk.f32.mxu1 %vm4690_vm0, %v4691_v11 }
  0x33   :  { %4301 = vmatprep.subr.bf16.mxu1 %v4689_v3 }
  0x36   :  { %4303 = vmatpush3.bf16.msra.mxu1 %v4841_v13 }
  0x37   :  { %4310 = vmatprep.subr.bf16.mxu1 %v4689_v3 }
  0xe9   :  { %v156_v29 = vpop.f32.mrb[0].mxu0 }
  0xea   :  { %v3864_v32 = vpop.f32.mrb[1].mxu0 }
  0xec   :  { %v229_v31 = vpop.f32.mrb[0].mxu1 }
  0xed   :  { %v230_v33 = vadd.f32 %v229_v31, %v156_v29  ;;  %v3875_v34 = vpop.f32.mrb[1].mxu1 }
  0xef   :  { %v239_v35 = vadd.f32 %v4925_v30, %v230_v33 }
  0xf1   :  { %4532 = vtanh.f32 %v239_v35  ;;  %v341_v36 = vpop.f32.mrb[2].mxu0  ;;  %v3547_v47 = vmul.f32 -1.442695, %v239_v35 }
  0xf2   :  { %v3886_v39 = vpop.f32.mrb[3].mxu0 }
  0xf4   :  { %v414_v38 = vpop.f32.mrb[2].mxu1 }
  0xf5   :  { %v415_v40 = vadd.f32 %v414_v38, %v341_v36  ;;  %v3897_v41 = vpop.f32.mrb[3].mxu1 }
  0xf7   :  { %v424_v42 = vadd.f32 %v4931_v37, %v415_v40 }
  0xf9   :  { %4534 = vtanh.f32 %v424_v42  ;;  %v3551_v48 = vmul.f32 -1.442695, %v424_v42 }
  0xfa   :  { %4536 = vpow2.f32 %v3547_v47 }
  0xfb   :  { %v4533_v43 = vpop.eup %4532  ;;  %4538 = vpow2.f32 %v3551_v48 }
  0xfc   :  { %249 = vrot.lane.b32.xlu0 %v4533_v43, %s4693_s30  ;;  %v604_v29 = vpop.f32.mrb[4].mxu1 }
  0xfd   :  { %v3919_v31 = vpop.f32.mrb[5].mxu1 }
 0x103   :  { %v4535_v45 = vpop.eup %4534 }
 0x104   :  { %434 = vrot.lane.b32.xlu0 %v4535_v45, %s4693_s30  ;;  %v4537_v49 = vpop.eup %4536  ;;  %v789_v32 = vpop.f32.mrb[6].mxu1 }
 0x105   :  { %v243_v50 = vadd.f32 1.0, %v4537_v49  ;;  %v4539_v51 = vpop.eup %4538  ;;  %v3941_v33 = vpop.f32.mrb[7].mxu1 }
 0x106   :  { %v428_v52 = vadd.f32 1.0, %v4539_v51 }
 0x107   :  { %4540 = vrcp.f32 %v243_v50 }
 0x108   :  { %267 = vperm.xlu0 %4530, %v265_v46   ;;  %4542 = vrcp.f32 %v428_v52 }
 0x111   :  { %v4541_v53 = vpop.eup %4540 }
 0x112   :  { %v4543_v56 = vpop.eup %4542  ;;  %v247_v59 = vmul.f32 0.0, %v4541_v53 }
 0x113   :  { %v432_v62 = vmul.f32 0.0, %v4543_v56 }
 0x16e   :  { %v250_v54 = vpop.permute.xlu0 %249 }
 0x16f   :  { %v252_v55 = vmul.f32 %v4541_v53, %v250_v54 }
 0x171   :  { %254 = vrot.lane.b32.xlu1 %v252_v55, %s4694_s24  ;;  %v634_v55 = vsel %vm633_vm6, 1, %v4692_v28  ;;  %vm2957_vm6 = vcmask 7168  }
 0x176   :  { %v435_v57 = vpop.permute.xlu0 %434 }
 0x177   :  { %v437_v58 = vmul.f32 %v4543_v56, %v435_v57 }
 0x179   :  { %439 = vrot.lane.b32.xlu1 %v437_v58, %s4694_s24 }
 0x187   :  { %v4973_v9 = vpop.permute.xlu0 %267 }
 0x188   :  { %vm269_vm4 = vcmp.eq.s32.totalorder %v4973_v9, 1 }
 0x1e3   :  { %v255_v60 = vpop.permute.xlu1 %254 }
 0x1e4   :  { %v4945_v61 = vadd.f32 %v255_v60, %v247_v59 }
 0x1e6   :  { %4544 = vtanh.f32 %v4945_v61  ;;  %v5026_v60 = vsel %vm269_vm4, %v4945_v61, 0.0 }
 0x1eb   :  { %v440_v63 = vpop.permute.xlu1 %439 }
 0x1ec   :  { %v4948_v0 = vadd.f32 %v440_v63, %v432_v62 }
 0x1ee   :  { %4546 = vtanh.f32 %v4948_v0 }
 0x1f0   :  { %v4545_v1 = vpop.eup %4544 }
 0x1f1   :  { %260 = vrot.lane.b32.xlu1 %v4545_v1, %s4693_s30 }
 0x1f5   :  { %452 = vperm.xlu1 %4531, %v450_v2  }
 0x1f8   :  { %v4547_v5 = vpop.eup %4546 }
 0x1f9   :  { %445 = vrot.lane.b32.xlu0 %v4547_v5, %s4693_s30 }
 0x263   :  { %v261_v10 = vpop.permute.xlu1 %260 }
 0x264   :  { %v263_v14 = vmul.f32 %v4541_v53, %v261_v10 }
 0x266   :  { %v4984_v15 = vsel %vm269_vm4, %v263_v14, 0.0 }
 0x267   :  { %461 = vrot.lane.b32.xlu1 %v4984_v15, %s4694_s24 }
 0x26b   :  { %v446_v16 = vpop.permute.xlu0 %445 }
 0x26c   :  { %v448_v17 = vmul.f32 %v4543_v56, %v446_v16  ;;  %v819_v56 = vsel %vm818_vm7, 1, %v4692_v28 }
 0x274   :  { %v4990_v21 = vpop.permute.xlu1 %452 }
 0x275   :  { %vm454_vm5 = vcmp.eq.s32.totalorder %v4990_v21, 1  ;;  %v3361_v21 = vld [vmem:[%s5881_s16] sm:$0xff] }
 0x276   :  { %v4995_v22 = vsel %vm454_vm5, %v448_v17, 0.0  ;;  %v5035_v5 = vsel %vm454_vm5, %v4948_v0, 0.0  ;;  %v5046_v17 = vld [vmem:[%s5898_s0 + $0x10] sm:$0xff]  ;;  %v5058_v0 = vld [vmem:[%s5898_s0 + $0x28] sm:$0xff] }
 0x277   :  { %646 = vrot.lane.b32.xlu0 %v4995_v22, %s4694_s24  ;;  %3962 = vmatmul.mubr.msk.f32.vlgmr.msra.gmra.mrb[8].mxu1 %vm86_vm1, %v5046_v17 }
 0x278   :  { %4312 = vmatpush3.bf16.msra.mxu1 %v4866_v20  ;;  %3983 = vmatprep.mubr.msk.f32.mxu1 %vm4690_vm0, %v4691_v11 }
 0x279   :  { %4313 = vmatprep.subr.bf16.mxu1 %v4689_v3 }
 0x27c   :  { %4315 = vmatpush3.bf16.msra.mxu1 %v4889_v26 }
 0x27d   :  { %4322 = vmatprep.subr.bf16.mxu1 %v4689_v3 }
 0x27f   :  { %3984 = vmatmul.mubr.msk.f32.vlgmr.msra.gmra.mrb[10].mxu1 %vm86_vm1, %v5058_v0 }
 0x280   :  { %4324 = vmatpush3.bf16.msra.mxu1 %v4824_v8  ;;  %4005 = vmatprep.mubr.msk.f32.mxu1 %vm4690_vm0, %v4691_v11 }
 0x281   :  { %4325 = vmatprep.subr.bf16.mxu1 %v4689_v3 }
 0x284   :  { %4327 = vmatpush3.bf16.msra.mxu1 %v4841_v13 }
 0x285   :  { %4334 = vmatprep.subr.bf16.mxu1 %v4689_v3 }
 0x2d9   :  { %v462_v23 = vpop.permute.xlu1 %461 }
 0x2da   :  { %3907 = vmatmul.mubr.msk.f32.vlgmr.msra.gmra.mrb[4].mxu0 %vm86_vm1, %v462_v23 }
 0x2db   :  { %4282 = vmatpush3.bf16.msra.mxu0 %v4857_v18  ;;  %3928 = vmatprep.mubr.msk.f32.mxu0 %vm4690_vm0, %v4691_v11 }
 0x2dc   :  { %4283 = vmatprep.subr.bf16.mxu0 %v4689_v3 }
 0x2df   :  { %4285 = vmatpush3.bf16.msra.mxu0 %v4885_v25 }
 0x2e0   :  { %4292 = vmatprep.subr.bf16.mxu0 %v4689_v3 }
 0x2e9   :  { %v647_v24 = vpop.permute.xlu0 %646 }
 0x2ea   :  { %3929 = vmatmul.mubr.msk.f32.vlgmr.msra.gmra.mrb[6].mxu0 %vm86_vm1, %v647_v24 }
 0x2eb   :  { %4294 = vmatpush3.bf16.msra.mxu0 %v4813_v4  ;;  %3950 = vmatprep.mubr.msk.f32.mxu0 %vm4690_vm0, %v4691_v11 }
 0x2ec   :  { %4295 = vmatprep.subr.bf16.mxu0 %v4689_v3 }
 0x2ef   :  { %4297 = vmatpush3.bf16.msra.mxu0 %v4837_v12 }
 0x2f0   :  { %4304 = vmatprep.subr.bf16.mxu0 %v4689_v3 }
 0x3ad   :  { %v531_v34 = vpop.f32.mrb[4].mxu0 }
 0x3ae   :  { %v605_v35 = vadd.f32 %v604_v29, %v531_v34  ;;  %v3908_v36 = vpop.f32.mrb[5].mxu0 }
 0x3b0   :  { %v608_v38 = vadd.f32 %v4925_v30, %v605_v35 }
 0x3b2   :  { %4548 = vtanh.f32 %v608_v38  ;;  %v3555_v46 = vmul.f32 -1.442695, %v608_v38 }
 0x3bc   :  { %v4549_v39 = vpop.eup %4548 }
 0x3bd   :  { %618 = vrot.lane.b32.xlu1 %v4549_v39, %s4693_s30  ;;  %v716_v40 = vpop.f32.mrb[6].mxu0  ;;  %v974_v39 = vpop.f32.mrb[8].mxu1 }
 0x3be   :  { %v790_v41 = vadd.f32 %v789_v32, %v716_v40  ;;  %v3930_v42 = vpop.f32.mrb[7].mxu0  ;;  %v3963_v40 = vpop.f32.mrb[9].mxu1 }
 0x3c0   :  { %v793_v43 = vadd.f32 %v4931_v37, %v790_v41  ;;  %v1159_v41 = vpop.f32.mrb[10].mxu1 }
 0x3c1   :  { %v3985_v42 = vpop.f32.mrb[11].mxu1 }
 0x3c2   :  { %4550 = vtanh.f32 %v793_v43  ;;  %v3559_v48 = vmul.f32 -1.442695, %v793_v43 }
 0x3c3   :  { %4552 = vpow2.f32 %v3555_v46 }
 0x3c4   :  { %4554 = vpow2.f32 %v3559_v48 }
 0x3cc   :  { %v4551_v45 = vpop.eup %4550 }
 0x3cd   :  { %803 = vrot.lane.b32.xlu0 %v4551_v45, %s4693_s30  ;;  %v4553_v47 = vpop.eup %4552 }
 0x3ce   :  { %v612_v49 = vadd.f32 1.0, %v4553_v47  ;;  %v4555_v50 = vpop.eup %4554 }
 0x3cf   :  { %v797_v54 = vadd.f32 1.0, %v4555_v50 }
 0x3d0   :  { %4556 = vrcp.f32 %v612_v49 }
 0x3d1   :  { %4558 = vrcp.f32 %v797_v54 }
 0x3da   :  { %v4557_v51 = vpop.eup %4556 }
 0x3db   :  { %v4559_v57 = vpop.eup %4558  ;;  %v616_v62 = vmul.f32 %v4557_v51, %v5026_v60 }
 0x3dc   :  { %v801_v10 = vmul.f32 %v4559_v57, %v5035_v5 }
 0x42f   :  { %v619_v52 = vpop.permute.xlu1 %618 }
 0x430   :  { %v621_v53 = vmul.f32 %v4557_v51, %v619_v52 }
 0x432   :  { %623 = vrot.lane.b32.xlu1 %v621_v53, %s4694_s24 }
 0x436   :  { %636 = vperm.xlu1 %4531, %v634_v55  }
 0x43a   :  { %821 = vperm.xlu1 %4531, %v819_v56  }
 0x43f   :  { %v804_v58 = vpop.permute.xlu0 %803 }
 0x440   :  { %v806_v59 = vmul.f32 %v4559_v57, %v804_v58 }
 0x442   :  { %808 = vrot.lane.b32.xlu0 %v806_v59, %s4694_s24 }
 0x4a4   :  { %v624_v63 = vpop.permute.xlu1 %623 }
 0x4a5   :  { %v5029_v1 = vadd.f32 %v624_v63, %v616_v62 }
 0x4a7   :  { %4560 = vtanh.f32 %v5029_v1 }
 0x4b1   :  { %v4561_v2 = vpop.eup %4560 }
 0x4b2   :  { %629 = vrot.lane.b32.xlu0 %v4561_v2, %s4693_s30 }
 0x4b4   :  { %v809_v14 = vpop.permute.xlu0 %808 }
 0x4b5   :  { %v5039_v61 = vadd.f32 %v809_v14, %v801_v10  ;;  %v5061_v23 = vpop.permute.xlu1 %636  ;;  %v1004_v10 = vsel %vm1003_vm10, 1, %v4692_v28  ;;  %v1189_v14 = vsel %vm1188_vm11, 1, %v4692_v28 }
 0x4b6   :  { %vm638_vm8 = vcmp.eq.s32.totalorder %v5061_v23, 1  ;;  %v3205_v23 = vld [vmem:[%s5880_s15] sm:$0xff] }
 0x4b7   :  { %4562 = vtanh.f32 %v5039_v61 }
 0x4b9   :  { %v5082_v32 = vpop.permute.xlu1 %821 }
 0x4ba   :  { %vm823_vm9 = vcmp.eq.s32.totalorder %v5082_v32, 1  ;;  %v3207_v32 = vld [vmem:[%s5880_s15 + $0x10] sm:$0xff] }
 0x4bb   :  { %v5134_v42 = vsel %vm823_vm9, %v5039_v61, %v5035_v5  ;;  %v3572_v5 = vld [vmem:[%s5898_s0 + $0x20] sm:$0xff] }
 0x4c1   :  { %v4563_v16 = vpop.eup %4562 }
 0x4c2   :  { %814 = vrot.lane.b32.xlu0 %v4563_v16, %s4693_s30 }
 0x524   :  { %v630_v24 = vpop.permute.xlu0 %629 }
 0x525   :  { %v5068_v29 = vmul.f32 %v4557_v51, %v630_v24 }
 0x527   :  { %v5076_v31 = vsel %vm638_vm8, %v5068_v29, %v4984_v15  ;;  %v641_v61 = vsel %vm638_vm8, %v5068_v29, 0.0 }
 0x528   :  { %831 = vrot.lane.b32.xlu1 %v5076_v31, %s4694_s24 }
 0x534   :  { %v815_v33 = vpop.permute.xlu0 %814 }
 0x535   :  { %v5084_v34 = vmul.f32 %v4559_v57, %v815_v33 }
 0x537   :  { %v5091_v35 = vsel %vm823_vm9, %v5084_v34, %v4995_v22 }
 0x538   :  { %1016 = vrot.lane.b32.xlu0 %v5091_v35, %s4694_s24 }
 0x59a   :  { %v832_v36 = vpop.permute.xlu1 %831 }
 0x59b   :  { %3951 = vmatmul.mubr.msk.f32.vlgmr.msra.gmra.mrb[8].mxu0 %vm86_vm1, %v832_v36  ;;  %v5123_v36 = vsel %vm638_vm8, %v5029_v1, %v5026_v60 }
 0x59c   :  { %4306 = vmatpush3.bf16.msra.mxu0 %v4857_v18  ;;  %3972 = vmatprep.mubr.msk.f32.mxu0 %vm4690_vm0, %v4691_v11 }
 0x59d   :  { %4307 = vmatprep.subr.bf16.mxu0 %v4689_v3 }
 0x5a0   :  { %4309 = vmatpush3.bf16.msra.mxu0 %v4885_v25 }
 0x5a1   :  { %4316 = vmatprep.subr.bf16.mxu0 %v4689_v3 }
 0x5aa   :  { %v1017_v38 = vpop.permute.xlu0 %1016 }
 0x5ab   :  { %3973 = vmatmul.mubr.msk.f32.vlgmr.msra.gmra.mrb[10].mxu0 %vm86_vm1, %v1017_v38 }
 0x5ac   :  { %4318 = vmatpush3.bf16.msra.mxu0 %v4813_v4  ;;  %3994 = vmatprep.mubr.msk.f32.mxu0 %vm4690_vm0, %v4691_v11 }
 0x5ad   :  { %4319 = vmatprep.subr.bf16.mxu0 %v4689_v3 }
 0x5b0   :  { %4321 = vmatpush3.bf16.msra.mxu0 %v4837_v12 }
 0x5b1   :  { %4328 = vmatprep.subr.bf16.mxu0 %v4689_v3 }
 0x66e   :  { %v901_v43 = vpop.f32.mrb[8].mxu0 }
 0x66f   :  { %v975_v45 = vadd.f32 %v974_v39, %v901_v43  ;;  %v3952_v46 = vpop.f32.mrb[9].mxu0 }
 0x670   :  { %v3568_v46 = vld [vmem:[%s5898_s0 + $0x18] sm:$0xff] }
 0x671   :  { %v978_v47 = vadd.f32 %v4925_v30, %v975_v45  ;;  %4006 = vmatmul.mubr.msk.f32.vlgmr.msra.gmra.mrb[12].mxu1 %vm86_vm1, %v3568_v46 }
 0x672   :  { %4336 = vmatpush3.bf16.msra.mxu1 %v4866_v20  ;;  %4027 = vmatprep.mubr.msk.f32.mxu1 %vm4690_vm0, %v4691_v11 }
 0x673   :  { %4564 = vtanh.f32 %v978_v47  ;;  %v3563_v54 = vmul.f32 -1.442695, %v978_v47  ;;  %4337 = vmatprep.subr.bf16.mxu1 %v4689_v3 }
 0x676   :  { %4339 = vmatpush3.bf16.msra.mxu1 %v4889_v26 }
 0x677   :  { %4346 = vmatprep.subr.bf16.mxu1 %v4689_v3 }
 0x679   :  { %4028 = vmatmul.mubr.msk.f32.vlgmr.msra.gmra.mrb[14].mxu1 %vm86_vm1, %v3572_v5 }
 0x67a   :  { %4348 = vmatpush3.bf16.msra.mxu1 %v4824_v8  ;;  %4049 = vmatprep.mubr.msk.f32.mxu1 %vm4690_vm0, %v4691_v11 }
 0x67b   :  { %4349 = vmatprep.subr.bf16.mxu1 %v4689_v3 }
 0x67d   :  { %v4565_v48 = vpop.eup %4564 }
 0x67e   :  { %988 = vrot.lane.b32.xlu1 %v4565_v48, %s4693_s30  ;;  %v1086_v49 = vpop.f32.mrb[10].mxu0  ;;  %4351 = vmatpush3.bf16.msra.mxu1 %v4841_v13 }
 0x67f   :  { %v1160_v50 = vadd.f32 %v1159_v41, %v1086_v49  ;;  %v3974_v51 = vpop.f32.mrb[11].mxu0  ;;  %4358 = vmatprep.subr.bf16.mxu1 %v4689_v3 }
 0x681   :  { %v1163_v52 = vadd.f32 %v4931_v37, %v1160_v50  ;;  %v642_v50 = vadd.f32 %v641_v61, %v4984_v15  ;;  %4050 = vmatmul.mubr.msk.f32.vlgmr.msra.gmra.mrb[16].mxu1 %vm86_vm1, %v3572_v5  ;;  %v826_v15 = vsel %vm823_vm9, %v5084_v34, 0.0 }
 0x682   :  { %4360 = vmatpush3.bf16.msra.mxu1 %v4866_v20  ;;  %4071 = vmatprep.mubr.msk.f32.mxu1 %vm4690_vm0, %v4691_v11 }
 0x683   :  { %4566 = vtanh.f32 %v1163_v52  ;;  %v3567_v56 = vmul.f32 -1.442695, %v1163_v52  ;;  %4361 = vmatprep.subr.bf16.mxu1 %v4689_v3 }
 0x684   :  { %4568 = vpow2.f32 %v3563_v54 }
 0x685   :  { %4570 = vpow2.f32 %v3567_v56 }
 0x686   :  { %4363 = vmatpush3.bf16.msra.mxu1 %v4889_v26 }
 0x687   :  { %4370 = vmatprep.subr.bf16.mxu1 %v4689_v3 }
 0x689   :  { %4072 = vmatmul.mubr.msk.f32.vlgmr.msra.gmra.mrb[18].mxu1 %vm86_vm1, %v3568_v46 }
 0x68a   :  { %4372 = vmatpush3.bf16.msra.mxu1 %v4824_v8  ;;  %4093 = vmatprep.mubr.msk.f32.mxu1 %vm4690_vm0, %v4691_v11 }
 0x68b   :  { %4373 = vmatprep.subr.bf16.mxu1 %v4689_v3 }
 0x68d   :  { %v4567_v53 = vpop.eup %4566 }
 0x68e   :  { %1173 = vrot.lane.b32.xlu0 %v4567_v53, %s4693_s30  ;;  %v4569_v55 = vpop.eup %4568  ;;  %4375 = vmatpush3.bf16.msra.mxu1 %v4841_v13 }
 0x68f   :  { %v982_v57 = vadd.f32 1.0, %v4569_v55  ;;  %v4571_v58 = vpop.eup %4570  ;;  %v827_v55 = vadd.f32 %v826_v15, %v4995_v22  ;;  %4382 = vmatprep.subr.bf16.mxu1 %v4689_v3 }
 0x690   :  { %v1167_v2 = vadd.f32 1.0, %v4571_v58 }
 0x691   :  { %4572 = vrcp.f32 %v982_v57  ;;  %4094 = vmatmul.mubr.msk.f32.vlgmr.msra.gmra.mrb[20].mxu1 %vm86_vm1, %v5058_v0 }
 0x692   :  { %4574 = vrcp.f32 %v1167_v2  ;;  %4384 = vmatpush3.bf16.msra.mxu1 %v4866_v20  ;;  %4115 = vmatprep.mubr.msk.f32.mxu1 %vm4690_vm0, %v4691_v11 }
 0x693   :  { %4385 = vmatprep.subr.bf16.mxu1 %v4689_v3 }
 0x696   :  { %4387 = vmatpush3.bf16.msra.mxu1 %v4889_v26 }
 0x697   :  { %4394 = vmatprep.subr.bf16.mxu1 %v4689_v3 }
 0x699   :  { %4116 = vmatmul.mubr.msk.f32.vlgmr.msra.gmra.mrb[22].mxu1 %vm86_vm1, %v5046_v17 }
 0x69a   :  { %4396 = vmatpush3.bf16.msra.mxu1 %v4824_v8  ;;  %4137 = vmatprep.mubr.msk.f32.mxu1 %vm4690_vm0, %v4691_v11 }
 0x69b   :  { %v4573_v59 = vpop.eup %4572  ;;  %4397 = vmatprep.subr.bf16.mxu1 %v4689_v3 }
 0x69c   :  { %v4575_v16 = vpop.eup %4574  ;;  %v986_v38 = vmul.f32 %v4573_v59, %v5123_v36 }
 0x69d   :  { %v1171_v43 = vmul.f32 %v4575_v16, %v5134_v42 }
 0x69e   :  { %4399 = vmatpush3.bf16.msra.mxu1 %v4841_v13 }
 0x69f   :  { %4406 = vmatprep.subr.bf16.mxu1 %v4689_v3 }
 0x6a1   :  { %4138 = vmatmul.mubr.msk.f32.vlgmr.msra.gmra.mrb[24].mxu1 %vm86_vm1, %v4970_v7 }
 0x6a2   :  { %4408 = vmatpush3.bf16.msra.mxu1 %v4866_v20  ;;  %4159 = vmatprep.mubr.msk.f32.mxu1 %vm4690_vm0, %v4691_v11 }
 0x6a3   :  { %4409 = vmatprep.subr.bf16.mxu1 %v4689_v3 }
 0x6a6   :  { %4411 = vmatpush3.bf16.msra.mxu1 %v4889_v26 }
 0x6a7   :  { %4418 = vmatprep.subr.bf16.mxu1 %v4689_v3 }
 0x6a9   :  { %4160 = vmatmul.mubr.msk.f32.vlgmr.msra.gmra.mrb[26].mxu1 %vm86_vm1, %v4958_v6 }
 0x6aa   :  { %4420 = vmatpush3.bf16.msra.mxu1 %v4824_v8  ;;  %4181 = vmatprep.mubr.msk.f32.mxu1 %vm4690_vm0, %v4691_v11 }
 0x6ab   :  { %4421 = vmatprep.subr.bf16.mxu1 %v4689_v3 }
 0x6ae   :  { %4423 = vmatpush3.bf16.msra.mxu1 %v4841_v13 }
 0x6af   :  { %4430 = vmatprep.subr.bf16.mxu1 %v4689_v3 }
 0x6b1   :  { %4182 = vmatmul.mubr.msk.f32.vlgmr.msra.gmra.mrb[28].mxu1 %vm86_vm1, %v4901_v27 }
 0x6b2   :  { %4432 = vmatpush3.bf16.msra.mxu1 %v4866_v20  ;;  %4203 = vmatprep.mubr.msk.f32.mxu1 %vm4690_vm0, %v4691_v11 }
 0x6b3   :  { %4433 = vmatprep.subr.bf16.mxu1 %v4689_v3 }
 0x6b6   :  { %4435 = vmatpush3.bf16.msra.mxu1 %v4889_v26 }
 0x6b9   :  { %4204 = vmatmul.mubr.msk.f32.vlgmr.msra.gmra.mrb[30].mxu1 %vm86_vm1, %v4863_v19 }
 0x6f0   :  { %v989_v62 = vpop.permute.xlu1 %988 }
 0x6f1   :  { %v991_v63 = vmul.f32 %v4573_v59, %v989_v62 }
 0x6f3   :  { %993 = vrot.lane.b32.xlu1 %v991_v63, %s4694_s24 }
 0x6f7   :  { %1006 = vperm.xlu1 %4531, %v1004_v10  }
 0x6fb   :  { %1191 = vperm.xlu1 %4531, %v1189_v14  }
 0x700   :  { %v1174_v24 = vpop.permute.xlu0 %1173 }
 0x701   :  { %v1176_v33 = vmul.f32 %v4575_v16, %v1174_v24 }
 0x703   :  { %1178 = vrot.lane.b32.xlu0 %v1176_v33, %s4694_s24 }
 0x744   :  { %v1344_v19 = vpop.f32.mrb[12].mxu1 }
 0x745   :  { %v4007_v20 = vpop.f32.mrb[13].mxu1 }
 0x74c   :  { %v1529_v26 = vpop.f32.mrb[14].mxu1 }
 0x74d   :  { %v4029_v27 = vpop.f32.mrb[15].mxu1 }
 0x765   :  { %v994_v39 = vpop.permute.xlu1 %993 }
 0x766   :  { %v5126_v40 = vadd.f32 %v994_v39, %v986_v38 }
 0x768   :  { %4576 = vtanh.f32 %v5126_v40 }
 0x772   :  { %v4577_v41 = vpop.eup %4576 }
 0x773   :  { %999 = vrot.lane.b32.xlu0 %v4577_v41, %s4693_s30 }
 0x775   :  { %v1179_v60 = vpop.permute.xlu0 %1178 }
 0x776   :  { %v5137_v1 = vadd.f32 %v1179_v60, %v1171_v43  ;;  %v5157_v47 = vpop.permute.xlu1 %1006  ;;  %v1374_v43 = vsel %vm1373_vm14, 1, %v4692_v28  ;;  %v1559_v60 = vsel %vm1558_vm15, 1, %v4692_v28 }
 0x777   :  { %vm1008_vm12 = vcmp.eq.s32.totalorder %v5157_v47, 1 }
 0x778   :  { %4578 = vtanh.f32 %v5137_v1  ;;  %v5280_v61 = vsel %vm1008_vm12, %v5126_v40, %v5123_v36 }
 0x782   :  { %v4579_v45 = vpop.eup %4578 }
 0x783   :  { %1184 = vrot.lane.b32.xlu0 %v4579_v45, %s4693_s30 }
 0x7e5   :  { %v1000_v48 = vpop.permute.xlu0 %999 }
 0x7e6   :  { %v1002_v49 = vmul.f32 %v4573_v59, %v1000_v48 }
 0x7e8   :  { %v1011_v29 = vsel %vm1008_vm12, %v1002_v49, 0.0  ;;  %v5171_v51 = vsel %vm1008_vm12, %v1002_v49, %v5076_v31  ;;  %v5189_v31 = vpop.permute.xlu1 %1191 }
 0x7e9   :  { %v5173_v52 = vadd.f32 %v1011_v29, %v642_v50  ;;  %1201 = vrot.lane.b32.xlu1 %v5171_v51, %s4694_s24  ;;  %vm1193_vm13 = vcmp.eq.s32.totalorder %v5189_v31, 1 }
 0x7ea   :  { %v5291_v50 = vsel %vm1193_vm13, %v5137_v1, %v5134_v42 }
 0x7f5   :  { %v1185_v53 = vpop.permute.xlu0 %1184 }
 0x7f6   :  { %v1187_v54 = vmul.f32 %v4575_v16, %v1185_v53 }
 0x7f8   :  { %v1196_v34 = vsel %vm1193_vm13, %v1187_v54, 0.0  ;;  %v5203_v56 = vsel %vm1193_vm13, %v1187_v54, %v5091_v35 }
 0x7f9   :  { %v5205_v57 = vadd.f32 %v1196_v34, %v827_v55  ;;  %1386 = vrot.lane.b32.xlu0 %v5203_v56, %s4694_s24 }
 0x85b   :  { %v1202_v8 = vpop.permute.xlu1 %1201 }
 0x85c   :  { %3995 = vmatmul.mubr.msk.f32.vlgmr.msra.gmra.mrb[12].mxu0 %vm86_vm1, %v1202_v8 }
 0x85d   :  { %4330 = vmatpush3.bf16.msra.mxu0 %v4857_v18  ;;  %4016 = vmatprep.mubr.msk.f32.mxu0 %vm4690_vm0, %v4691_v11 }
 0x85e   :  { %4331 = vmatprep.subr.bf16.mxu0 %v4689_v3 }
 0x861   :  { %4333 = vmatpush3.bf16.msra.mxu0 %v4885_v25 }
 0x862   :  { %4340 = vmatprep.subr.bf16.mxu0 %v4689_v3 }
 0x86b   :  { %v1387_v13 = vpop.permute.xlu0 %1386 }
 0x86c   :  { %4017 = vmatmul.mubr.msk.f32.vlgmr.msra.gmra.mrb[14].mxu0 %vm86_vm1, %v1387_v13 }
 0x86d   :  { %4342 = vmatpush3.bf16.msra.mxu0 %v4813_v4  ;;  %4038 = vmatprep.mubr.msk.f32.mxu0 %vm4690_vm0, %v4691_v11 }
 0x86e   :  { %4343 = vmatprep.subr.bf16.mxu0 %v4689_v3 }
 0x871   :  { %4345 = vmatpush3.bf16.msra.mxu0 %v4837_v12 }
 0x872   :  { %4352 = vmatprep.subr.bf16.mxu0 %v4689_v3 }
 0x92f   :  { %v1271_v6 = vpop.f32.mrb[12].mxu0 }
 0x930   :  { %v1345_v7 = vadd.f32 %v1344_v19, %v1271_v6  ;;  %v3996_v22 = vpop.f32.mrb[13].mxu0 }
 0x932   :  { %v1348_v17 = vadd.f32 %v4925_v30, %v1345_v7 }
 0x934   :  { %4580 = vtanh.f32 %v1348_v17  ;;  %v3571_v2 = vmul.f32 -1.442695, %v1348_v17 }
 0x93e   :  { %v4581_v0 = vpop.eup %4580 }
 0x93f   :  { %1358 = vrot.lane.b32.xlu1 %v4581_v0, %s4693_s30  ;;  %v1456_v35 = vpop.f32.mrb[14].mxu0 }
 0x940   :  { %v1530_v58 = vadd.f32 %v1529_v26, %v1456_v35  ;;  %v4018_v59 = vpop.f32.mrb[15].mxu0 }
 0x942   :  { %v1533_v62 = vadd.f32 %v4931_v37, %v1530_v58 }
 0x944   :  { %4582 = vtanh.f32 %v1533_v62  ;;  %v3575_v14 = vmul.f32 -1.442695, %v1533_v62 }
 0x945   :  { %4584 = vpow2.f32 %v3571_v2 }
 0x946   :  { %4586 = vpow2.f32 %v3575_v14 }
 0x94e   :  { %v4583_v63 = vpop.eup %4582 }
 0x94f   :  { %1543 = vrot.lane.b32.xlu0 %v4583_v63, %s4693_s30  ;;  %v4585_v10 = vpop.eup %4584 }
 0x950   :  { %v1352_v16 = vadd.f32 1.0, %v4585_v10  ;;  %v4587_v24 = vpop.eup %4586 }
 0x951   :  { %v1537_v41 = vadd.f32 1.0, %v4587_v24 }
 0x952   :  { %4588 = vrcp.f32 %v1352_v16 }
 0x953   :  { %4590 = vrcp.f32 %v1537_v41 }
 0x95c   :  { %v4589_v33 = vpop.eup %4588 }
 0x95d   :  { %v4591_v45 = vpop.eup %4590  ;;  %v1356_v48 = vmul.f32 %v4589_v33, %v5280_v61 }
 0x95e   :  { %v1541_v29 = vmul.f32 %v4591_v45, %v5291_v50 }
 0x9b1   :  { %v1359_v38 = vpop.permute.xlu1 %1358 }
 0x9b2   :  { %v1361_v39 = vmul.f32 %v4589_v33, %v1359_v38 }
 0x9b4   :  { %1363 = vrot.lane.b32.xlu1 %v1361_v39, %s4694_s24 }
 0x9b8   :  { %1376 = vperm.xlu1 %4531, %v1374_v43  }
 0x9bc   :  { %1561 = vperm.xlu1 %4531, %v1559_v60  }
 0x9c1   :  { %v1544_v46 = vpop.permute.xlu0 %1543 }
 0x9c2   :  { %v1546_v5 = vmul.f32 %v4591_v45, %v1544_v46 }
 0x9c4   :  { %1548 = vrot.lane.b32.xlu0 %v1546_v5, %s4694_s24 }
 0xa26   :  { %v1364_v49 = vpop.permute.xlu1 %1363 }
 0xa27   :  { %v5283_v44 = vadd.f32 %v1364_v49, %v1356_v48 }
 0xa29   :  { %4592 = vtanh.f32 %v5283_v44 }
 0xa33   :  { %v4593_v28 = vpop.eup %4592 }
 0xa34   :  { %1369 = vrot.lane.b32.xlu0 %v4593_v28, %s4693_s30 }
 0xa36   :  { %v1549_v36 = vpop.permute.xlu0 %1548 }
 0xa37   :  { %v5294_v40 = vadd.f32 %v1549_v36, %v1541_v29  ;;  %v5298_v53 = vpop.permute.xlu1 %1376 }
 0xa38   :  { %vm1378_vm2 = vcmp.eq.s32.totalorder %v5298_v53, 1 }
 0xa39   :  { %4594 = vtanh.f32 %v5294_v40  ;;  %v5352_v48 = vsel %vm1378_vm2, %v5283_v44, %v5280_v61 }
 0xa3b   :  { %v5313_v8 = vpop.permute.xlu1 %1561 }
 0xa3c   :  { %vm1563_vm3 = vcmp.eq.s32.totalorder %v5313_v8, 1 }
 0xa43   :  { %v4595_v15 = vpop.eup %4594 }
 0xa44   :  { %1554 = vrot.lane.b32.xlu0 %v4595_v15, %s4693_s30  ;;  %v5363_v15 = vsel %vm1563_vm3, %v5294_v40, %v5291_v50 }
 0xaa6   :  { %v1370_v54 = vpop.permute.xlu0 %1369 }
 0xaa7   :  { %v1372_v55 = vmul.f32 %v4589_v33, %v1370_v54 }
 0xaa9   :  { %v1381_v42 = vsel %vm1378_vm2, %v1372_v55, 0.0  ;;  %v5306_v1 = vsel %vm1378_vm2, %v1372_v55, %v5171_v51 }
 0xaaa   :  { %v5309_v34 = vadd.f32 %v1381_v42, %v5173_v52  ;;  %1569 = vrot.lane.b32.xlu1 %v5306_v1, %s4694_s24 }
 0xab6   :  { %v1555_v13 = vpop.permute.xlu0 %1554 }
 0xab7   :  { %v1557_v19 = vmul.f32 %v4591_v45, %v1555_v13 }
 0xab9   :  { %v1566_v20 = vsel %vm1563_vm3, %v1557_v19, 0.0  ;;  %v5321_v51 = vsel %vm1563_vm3, %v1557_v19, %v5203_v56 }
 0xaba   :  { %v5324_v52 = vadd.f32 %v1566_v20, %v5205_v57  ;;  %1743 = vrot.lane.b32.xlu0 %v5321_v51, %s4694_s24  ;;  %v1709_v57 = vpop.f32.mrb[16].mxu1 }
 0xabb   :  { %v4051_v27 = vpop.f32.mrb[17].mxu1 }
 0xabc   :  { %v1883_v6 = vpop.f32.mrb[18].mxu1 }
 0xabd   :  { %v4073_v7 = vpop.f32.mrb[19].mxu1 }
 0xb1c   :  { %v1570_v26 = vpop.permute.xlu1 %1569 }
 0xb1d   :  { %4039 = vmatmul.mubr.msk.f32.vlgmr.msra.gmra.mrb[16].mxu0 %vm86_vm1, %v1570_v26 }
 0xb1e   :  { %4354 = vmatpush3.bf16.msra.mxu0 %v4857_v18  ;;  %4060 = vmatprep.mubr.msk.f32.mxu0 %vm4690_vm0, %v4691_v11 }
 0xb1f   :  { %4355 = vmatprep.subr.bf16.mxu0 %v4689_v3 }
 0xb22   :  { %4357 = vmatpush3.bf16.msra.mxu0 %v4885_v25 }
 0xb23   :  { %4364 = vmatprep.subr.bf16.mxu0 %v4689_v3 }
 0xb2c   :  { %v1744_v56 = vpop.permute.xlu0 %1743 }
 0xb2d   :  { %4061 = vmatmul.mubr.msk.f32.vlgmr.msra.gmra.mrb[18].mxu0 %vm86_vm1, %v1744_v56 }
 0xb2e   :  { %4366 = vmatpush3.bf16.msra.mxu0 %v4813_v4  ;;  %4082 = vmatprep.mubr.msk.f32.mxu0 %vm4690_vm0, %v4691_v11 }
 0xb2f   :  { %4367 = vmatprep.subr.bf16.mxu0 %v4689_v3 }
 0xb32   :  { %4369 = vmatpush3.bf16.msra.mxu0 %v4837_v12 }
 0xb33   :  { %4376 = vmatprep.subr.bf16.mxu0 %v4689_v3 }
 0xbf0   :  { %v1639_v22 = vpop.f32.mrb[16].mxu0 }
 0xbf1   :  { %v1710_v17 = vadd.f32 %v1709_v57, %v1639_v22  ;;  %v4040_v0 = vpop.f32.mrb[17].mxu0 }
 0xbf3   :  { %v1713_v35 = vadd.f32 %v4925_v30, %v1710_v17 }
 0xbf5   :  { %4596 = vtanh.f32 %v1713_v35  ;;  %v3578_v14 = vmul.f32 -1.442695, %v1713_v35 }
 0xbff   :  { %v4597_v58 = vpop.eup %4596 }
 0xc00   :  { %1723 = vrot.lane.b32.xlu1 %v4597_v58, %s4693_s30  ;;  %v1813_v59 = vpop.f32.mrb[18].mxu0 }
 0xc01   :  { %v1884_v62 = vadd.f32 %v1883_v6, %v1813_v59  ;;  %v4062_v63 = vpop.f32.mrb[19].mxu0 }
 0xc03   :  { %v1887_v2 = vadd.f32 %v4931_v37, %v1884_v62 }
 0xc05   :  { %4598 = vtanh.f32 %v1887_v2  ;;  %v3581_v24 = vmul.f32 -1.442695, %v1887_v2 }
 0xc06   :  { %4600 = vpow2.f32 %v3578_v14 }
 0xc07   :  { %4602 = vpow2.f32 %v3581_v24 }
 0xc0f   :  { %v4599_v10 = vpop.eup %4598 }
 0xc10   :  { %1897 = vrot.lane.b32.xlu0 %v4599_v10, %s4693_s30  ;;  %v4601_v16 = vpop.eup %4600 }
 0xc11   :  { %v1717_v33 = vadd.f32 1.0, %v4601_v16  ;;  %v4603_v38 = vpop.eup %4602 }
 0xc12   :  { %v1891_v60 = vadd.f32 1.0, %v4603_v38 }
 0xc13   :  { %4604 = vrcp.f32 %v1717_v33 }
 0xc14   :  { %4606 = vrcp.f32 %v1891_v60 }
 0xc1d   :  { %v4605_v39 = vpop.eup %4604 }
 0xc1e   :  { %v4607_v45 = vpop.eup %4606  ;;  %v1721_v49 = vmul.f32 %v4605_v39, %v5352_v48 }
 0xc1f   :  { %v1895_v54 = vmul.f32 %v4607_v45, %v5363_v15 }
 0xc72   :  { %v1724_v41 = vpop.permute.xlu1 %1723 }
 0xc73   :  { %v1726_v43 = vmul.f32 %v4605_v39, %v1724_v41 }
 0xc75   :  { %1728 = vrot.lane.b32.xlu1 %v1726_v43, %s4694_s24 }
 0xc82   :  { %v1898_v46 = vpop.permute.xlu0 %1897 }
 0xc83   :  { %v1900_v5 = vmul.f32 %v4607_v45, %v1898_v46 }
 0xc85   :  { %1902 = vrot.lane.b32.xlu0 %v1900_v5, %s4694_s24 }
 0xce7   :  { %v1729_v28 = vpop.permute.xlu1 %1728 }
 0xce8   :  { %v5355_v29 = vadd.f32 %v1729_v28, %v1721_v49 }
 0xcea   :  { %4608 = vtanh.f32 %v5355_v29  ;;  %v5418_v46 = vsel %vm1563_vm3, %v5355_v29, %v5352_v48 }
 0xcf4   :  { %v4609_v36 = vpop.eup %4608 }
 0xcf5   :  { %1734 = vrot.lane.b32.xlu1 %v4609_v36, %s4693_s30 }
 0xcf7   :  { %v1903_v61 = vpop.permute.xlu0 %1902 }
 0xcf8   :  { %v5366_v44 = vadd.f32 %v1903_v61, %v1895_v54 }
 0xcfa   :  { %4610 = vtanh.f32 %v5366_v44  ;;  %v5429_v54 = vsel %vm1378_vm2, %v5366_v44, %v5363_v15 }
 0xd04   :  { %v4611_v55 = vpop.eup %4610 }
 0xd05   :  { %1908 = vrot.lane.b32.xlu0 %v4611_v55, %s4693_s30 }
 0xd67   :  { %v1735_v42 = vpop.permute.xlu1 %1734 }
 0xd68   :  { %v1737_v13 = vmul.f32 %v4605_v39, %v1735_v42 }
 0xd6a   :  { %v1740_v19 = vsel %vm1563_vm3, %v1737_v13, 0.0  ;;  %v5375_v50 = vsel %vm1563_vm3, %v1737_v13, %v5306_v1 }
 0xd6b   :  { %v5378_v40 = vadd.f32 %v1740_v19, %v5309_v34  ;;  %1917 = vrot.lane.b32.xlu1 %v5375_v50, %s4694_s24 }
 0xd77   :  { %v1909_v20 = vpop.permute.xlu0 %1908 }
 0xd78   :  { %v1911_v26 = vmul.f32 %v4607_v45, %v1909_v20 }
 0xd7a   :  { %v1914_v56 = vsel %vm1378_vm2, %v1911_v26, 0.0  ;;  %v5387_v57 = vsel %vm1378_vm2, %v1911_v26, %v5321_v51  ;;  %v2057_v51 = vpop.f32.mrb[20].mxu1 }
 0xd7b   :  { %v5390_v27 = vadd.f32 %v1914_v56, %v5324_v52  ;;  %2091 = vrot.lane.b32.xlu0 %v5387_v57, %s4694_s24  ;;  %v4095_v52 = vpop.f32.mrb[21].mxu1 }
 0xd7c   :  { %v2231_v6 = vpop.f32.mrb[22].mxu1 }
 0xd7d   :  { %v4117_v7 = vpop.f32.mrb[23].mxu1 }
 0xddd   :  { %v1918_v1 = vpop.permute.xlu1 %1917 }
 0xdde   :  { %4083 = vmatmul.mubr.msk.f32.vlgmr.msra.gmra.mrb[20].mxu0 %vm86_vm1, %v1918_v1 }
 0xddf   :  { %4378 = vmatpush3.bf16.msra.mxu0 %v4857_v18  ;;  %4104 = vmatprep.mubr.msk.f32.mxu0 %vm4690_vm0, %v4691_v11 }
 0xde0   :  { %4379 = vmatprep.subr.bf16.mxu0 %v4689_v3 }
 0xde3   :  { %4381 = vmatpush3.bf16.msra.mxu0 %v4885_v25 }
 0xde4   :  { %4388 = vmatprep.subr.bf16.mxu0 %v4689_v3 }
 0xded   :  { %v2092_v34 = vpop.permute.xlu0 %2091 }
 0xdee   :  { %4105 = vmatmul.mubr.msk.f32.vlgmr.msra.gmra.mrb[22].mxu0 %vm86_vm1, %v2092_v34 }
 0xdef   :  { %4390 = vmatpush3.bf16.msra.mxu0 %v4813_v4  ;;  %4126 = vmatprep.mubr.msk.f32.mxu0 %vm4690_vm0, %v4691_v11 }
 0xdf0   :  { %4391 = vmatprep.subr.bf16.mxu0 %v4689_v3 }
 0xdf3   :  { %4393 = vmatpush3.bf16.msra.mxu0 %v4837_v12 }
 0xdf4   :  { %4400 = vmatprep.subr.bf16.mxu0 %v4689_v3 }
 0xeb1   :  { %v1987_v22 = vpop.f32.mrb[20].mxu0 }
 0xeb2   :  { %v2058_v17 = vadd.f32 %v2057_v51, %v1987_v22  ;;  %v4084_v0 = vpop.f32.mrb[21].mxu0 }
 0xeb4   :  { %v2061_v35 = vadd.f32 %v4925_v30, %v2058_v17 }
 0xeb6   :  { %4612 = vtanh.f32 %v2061_v35  ;;  %v3584_v14 = vmul.f32 -1.442695, %v2061_v35  ;;  %v5484_v35 = vld [vmem:[%s5872_s7] ss:$0 sm:$0xff] }
 0xec0   :  { %v4613_v58 = vpop.eup %4612 }
 0xec1   :  { %2071 = vrot.lane.b32.xlu1 %v4613_v58, %s4693_s30  ;;  %v2161_v59 = vpop.f32.mrb[22].mxu0 }
 0xec2   :  { %v2232_v62 = vadd.f32 %v2231_v6, %v2161_v59  ;;  %v4106_v63 = vpop.f32.mrb[23].mxu0 }
 0xec4   :  { %v2235_v2 = vadd.f32 %v4931_v37, %v2232_v62 }
 0xec6   :  { %4614 = vtanh.f32 %v2235_v2  ;;  %v3587_v24 = vmul.f32 -1.442695, %v2235_v2 }
 0xec7   :  { %4616 = vpow2.f32 %v3584_v14 }
 0xec8   :  { %4618 = vpow2.f32 %v3587_v24 }
 0xed0   :  { %v4615_v10 = vpop.eup %4614 }
 0xed1   :  { %2245 = vrot.lane.b32.xlu0 %v4615_v10, %s4693_s30  ;;  %v4617_v16 = vpop.eup %4616 }
 0xed2   :  { %v2065_v33 = vadd.f32 1.0, %v4617_v16  ;;  %v4619_v30 = vpop.eup %4618 }
 0xed3   :  { %v2239_v43 = vadd.f32 1.0, %v4619_v30 }
 0xed4   :  { %4620 = vrcp.f32 %v2065_v33 }
 0xed5   :  { %4622 = vrcp.f32 %v2239_v43 }
 0xede   :  { %v4621_v38 = vpop.eup %4620 }
 0xedf   :  { %v4623_v37 = vpop.eup %4622  ;;  %v2069_v5 = vmul.f32 %v4621_v38, %v5418_v46 }
 0xee0   :  { %v2243_v8 = vmul.f32 %v4623_v37, %v5429_v54 }
 0xf33   :  { %v2072_v39 = vpop.permute.xlu1 %2071 }
 0xf34   :  { %v2074_v41 = vmul.f32 %v4621_v38, %v2072_v39 }
 0xf36   :  { %2076 = vrot.lane.b32.xlu1 %v2074_v41, %s4694_s24 }
 0xf43   :  { %v2246_v60 = vpop.permute.xlu0 %2245 }
 0xf44   :  { %v2248_v45 = vmul.f32 %v4623_v37, %v2246_v60 }
 0xf46   :  { %2250 = vrot.lane.b32.xlu0 %v2248_v45, %s4694_s24 }
 0xfa8   :  { %v2077_v49 = vpop.permute.xlu1 %2076 }
 0xfa9   :  { %v5421_v28 = vadd.f32 %v2077_v49, %v2069_v5 }
 0xfab   :  { %4624 = vtanh.f32 %v5421_v28  ;;  %v5494_v43 = vsel %vm1193_vm13, %v5421_v28, %v5418_v46 }
 0xfb5   :  { %v4625_v36 = vpop.eup %4624 }
 0xfb6   :  { %2082 = vrot.lane.b32.xlu1 %v4625_v36, %s4693_s30 }
 0xfb8   :  { %v2251_v48 = vpop.permute.xlu0 %2250 }
 0xfb9   :  { %v5432_v29 = vadd.f32 %v2251_v48, %v2243_v8 }
 0xfbb   :  { %4626 = vtanh.f32 %v5432_v29  ;;  %v5505_v49 = vsel %vm1008_vm12, %v5432_v29, %v5429_v54 }
 0xfc5   :  { %v4627_v61 = vpop.eup %4626 }
 0xfc6   :  { %2256 = vrot.lane.b32.xlu0 %v4627_v61, %s4693_s30 }
0x1028   :  { %v2083_v55 = vpop.permute.xlu1 %2082 }
0x1029   :  { %v2085_v42 = vmul.f32 %v4621_v38, %v2083_v55 }
0x102b   :  { %v2088_v13 = vsel %vm1193_vm13, %v2085_v42, 0.0  ;;  %v5441_v53 = vsel %vm1193_vm13, %v2085_v42, %v5375_v50 }
0x102c   :  { %v5444_v15 = vadd.f32 %v2088_v13, %v5378_v40  ;;  %2265 = vrot.lane.b32.xlu1 %v5441_v53, %s4694_s24 }
0x1038   :  { %v2257_v44 = vpop.permute.xlu0 %2256 }
0x1039   :  { %v2259_v19 = vmul.f32 %v4623_v37, %v2257_v44 }
0x103b   :  { %v2262_v20 = vsel %vm1008_vm12, %v2259_v19, 0.0  ;;  %v5453_v26 = vsel %vm1008_vm12, %v2259_v19, %v5387_v57  ;;  %v2405_v57 = vpop.f32.mrb[24].mxu1 }
0x103c   :  { %v5456_v56 = vadd.f32 %v2262_v20, %v5390_v27  ;;  %2439 = vrot.lane.b32.xlu0 %v5453_v26, %s4694_s24  ;;  %v4139_v27 = vpop.f32.mrb[25].mxu1 }
0x103d   :  { %v2579_v1 = vpop.f32.mrb[26].mxu1 }
0x103e   :  { %v4161_v34 = vpop.f32.mrb[27].mxu1 }
0x103f   :  { %v2753_v19 = vpop.f32.mrb[28].mxu1 }
0x1040   :  { %v4183_v20 = vpop.f32.mrb[29].mxu1 }
0x109e   :  { %v2266_v50 = vpop.permute.xlu1 %2265 }
0x109f   :  { %4127 = vmatmul.mubr.msk.f32.vlgmr.msra.gmra.mrb[24].mxu0 %vm86_vm1, %v2266_v50  ;;  %v4664_v50 = vld [vmem:[%s5900_s22] sm:$0xff] }
0x10a0   :  { %4402 = vmatpush3.bf16.msra.mxu0 %v4857_v18  ;;  %4148 = vmatprep.mubr.msk.f32.mxu0 %vm4690_vm0, %v4691_v11 }
0x10a1   :  { %4403 = vmatprep.subr.bf16.mxu0 %v4689_v3 }
0x10a4   :  { %4405 = vmatpush3.bf16.msra.mxu0 %v4885_v25 }
0x10a5   :  { %4412 = vmatprep.subr.bf16.mxu0 %v4689_v3 }
0x10ae   :  { %v2440_v40 = vpop.permute.xlu0 %2439 }
0x10af   :  { %4149 = vmatmul.mubr.msk.f32.vlgmr.msra.gmra.mrb[26].mxu0 %vm86_vm1, %v2440_v40  ;;  %v2956_v40 = vcvt.s32.f32 %v4664_v50 }
0x10b0   :  { %4414 = vmatpush3.bf16.msra.mxu0 %v4813_v4  ;;  %4170 = vmatprep.mubr.msk.f32.mxu0 %vm4690_vm0, %v4691_v11  ;;  %v5477_v4 = vld [vmem:[%s5899_s28] ss:$0 sm:$0xff] }
0x10b1   :  { %4415 = vmatprep.subr.bf16.mxu0 %v4689_v3 }
0x10b4   :  { %4417 = vmatpush3.bf16.msra.mxu0 %v4837_v12 }
0x10b5   :  { %4424 = vmatprep.subr.bf16.mxu0 %v4689_v3 }
0x1172   :  { %v2335_v51 = vpop.f32.mrb[24].mxu0 }
0x1173   :  { %v2406_v52 = vadd.f32 %v2405_v57, %v2335_v51  ;;  %v4128_v6 = vpop.f32.mrb[25].mxu0 }
0x1175   :  { %v2409_v7 = vadd.f32 %v5477_v4, %v2406_v52 }
0x1177   :  { %4628 = vtanh.f32 %v2409_v7  ;;  %v3590_v62 = vmul.f32 -1.442695, %v2409_v7 }
0x1181   :  { %v4629_v22 = vpop.eup %4628 }
0x1182   :  { %2419 = vrot.lane.b32.xlu1 %v4629_v22, %s4693_s30  ;;  %v2509_v12 = vpop.f32.mrb[26].mxu0 }
0x1183   :  { %v2580_v17 = vadd.f32 %v2579_v1, %v2509_v12  ;;  %v4150_v0 = vpop.f32.mrb[27].mxu0 }
0x1185   :  { %v2583_v58 = vadd.f32 %v5484_v35, %v2580_v17 }
0x1187   :  { %4630 = vtanh.f32 %v2583_v58  ;;  %v3593_v2 = vmul.f32 -1.442695, %v2583_v58 }
0x1188   :  { %4632 = vpow2.f32 %v3590_v62 }
0x1189   :  { %4634 = vpow2.f32 %v3593_v2  ;;  %v2978_v2 = vld [vmem:[%s5874_s9] sm:$0xff] }
0x1191   :  { %v4631_v59 = vpop.eup %4630 }
0x1192   :  { %2593 = vrot.lane.b32.xlu0 %v4631_v59, %s4693_s30  ;;  %v4633_v63 = vpop.eup %4632 }
0x1193   :  { %v2413_v10 = vadd.f32 1.0, %v4633_v63  ;;  %v4635_v14 = vpop.eup %4634 }
0x1194   :  { %v2587_v30 = vadd.f32 1.0, %v4635_v14 }
0x1195   :  { %4636 = vrcp.f32 %v2413_v10  ;;  %v2979_v10 = vld [vmem:[%s5874_s9 + $0x8] sm:$0xff] }
0x1196   :  { %4638 = vrcp.f32 %v2587_v30  ;;  %v4438_v14 = vpack.c.bf16 %v2979_v10, %v2978_v2  ;;  %v3032_v2 = vld [vmem:[%s5874_s9 + $0x1b0] sm:$0xff]  ;;  %v3033_v10 = vld [vmem:[%s5874_s9 + $0x1b8] sm:$0xff] }
0x119f   :  { %v4637_v16 = vpop.eup %4636 }
0x11a0   :  { %v4639_v38 = vpop.eup %4638  ;;  %v2417_v37 = vmul.f32 %v4637_v16, %v5494_v43 }
0x11a1   :  { %v2591_v31 = vmul.f32 %v4639_v38, %v5505_v49 }
0x11f4   :  { %v2420_v24 = vpop.permute.xlu1 %2419 }
0x11f5   :  { %v2422_v33 = vmul.f32 %v4637_v16, %v2420_v24  ;;  %v3027_v24 = vld [vmem:[%s5874_s9 + $0x188] sm:$0xff] }
0x11f7   :  { %2424 = vrot.lane.b32.xlu1 %v2422_v33, %s4694_s24 }
0x1204   :  { %v2594_v39 = vpop.permute.xlu0 %2593 }
0x1205   :  { %v2596_v41 = vmul.f32 %v4639_v38, %v2594_v39  ;;  %v3011_v39 = vld [vmem:[%s5874_s9 + $0x108] sm:$0xff] }
0x1207   :  { %2598 = vrot.lane.b32.xlu0 %v2596_v41, %s4694_s24 }
0x1269   :  { %v2425_v60 = vpop.permute.xlu1 %2424 }
0x126a   :  { %v5497_v45 = vadd.f32 %v2425_v60, %v2417_v37  ;;  %v2996_v60 = vld [vmem:[%s5874_s9 + $0x90] sm:$0xff] }
0x126c   :  { %4640 = vtanh.f32 %v5497_v45 }
0x1276   :  { %v4641_v5 = vpop.eup %4640 }
0x1277   :  { %2430 = vrot.lane.b32.xlu1 %v4641_v5, %s4693_s30  ;;  %v2997_v5 = vld [vmem:[%s5874_s9 + $0x98] sm:$0xff] }
0x1279   :  { %v2599_v46 = vpop.permute.xlu0 %2598 }
0x127a   :  { %v5508_v28 = vadd.f32 %v2599_v46, %v2591_v31  ;;  %v4440_v31 = vpack.c.bf16 %v2997_v5, %v2996_v60  ;;  %v2980_v46 = vld [vmem:[%s5874_s9 + $0x10] sm:$0xff]  ;;  %v3034_v5 = vld [vmem:[%s5874_s9 + $0x1c0] sm:$0xff] }
0x127c   :  { %4642 = vtanh.f32 %v5508_v28 }
0x1286   :  { %v4643_v36 = vpop.eup %4642 }
0x1287   :  { %2604 = vrot.lane.b32.xlu0 %v4643_v36, %s4693_s30  ;;  %v2981_v36 = vld [vmem:[%s5874_s9 + $0x18] sm:$0xff] }
0x12e9   :  { %v2431_v8 = vpop.permute.xlu1 %2430 }
0x12ea   :  { %v2433_v48 = vmul.f32 %v4637_v16, %v2431_v8  ;;  %v3026_v16 = vld [vmem:[%s5874_s9 + $0x180] sm:$0xff]  ;;  %v3028_v8 = vld [vmem:[%s5874_s9 + $0x190] sm:$0xff] }
0x12eb   :  { %v4468_v30 = vpack.c.bf16 %v3027_v24, %v3026_v16  ;;  %v3016_v16 = vld [vmem:[%s5874_s9 + $0x130] sm:$0xff]  ;;  %v3017_v24 = vld [vmem:[%s5874_s9 + $0x138] sm:$0xff] }
0x12ec   :  { %v2436_v61 = vsel %vm823_vm9, %v2433_v48, 0.0  ;;  %v2434_v47 = vsel %vm823_vm9, %v2433_v48, %v5441_v53 }
0x12ed   :  { %v5518_v54 = vadd.f32 %v2436_v61, %v5444_v15  ;;  %2613 = vrot.lane.b32.xlu1 %v2434_v47, %s4694_s24  ;;  %4469 = vmatprep.subr.bf16.mxu1 %v4468_v30  ;;  %v4442_v61 = vpack.c.bf16 %v2981_v36, %v2980_v46  ;;  %v3029_v47 = vld [vmem:[%s5874_s9 + $0x198] sm:$0xff]  ;;  %v3002_v30 = vld [vmem:[%s5874_s9 + $0xc0] sm:$0xff] }
0x12ee   :  { %v3018_v36 = vld [vmem:[%s5874_s9 + $0x140] sm:$0xff] }
0x12f9   :  { %v2605_v29 = vpop.permute.xlu0 %2604 }
0x12fa   :  { %v2607_v55 = vmul.f32 %v4639_v38, %v2605_v29  ;;  %v3010_v38 = vld [vmem:[%s5874_s9 + $0x100] sm:$0xff]  ;;  %v3012_v29 = vld [vmem:[%s5874_s9 + $0x110] sm:$0xff] }
0x12fb   :  { %v4470_v37 = vpack.c.bf16 %v3011_v39, %v3010_v38  ;;  %v3003_v38 = vld [vmem:[%s5874_s9 + $0xc8] sm:$0xff]  ;;  %v2986_v39 = vld [vmem:[%s5874_s9 + $0x40] sm:$0xff] }
0x12fc   :  { %v2610_v42 = vsel %vm638_vm8, %v2607_v55, 0.0  ;;  %v2608_v13 = vsel %vm638_vm8, %v2607_v55, %v5453_v26  ;;  %v2925_v26 = vpop.f32.mrb[30].mxu1  ;;  %v3013_v55 = vld [vmem:[%s5874_s9 + $0x118] sm:$0xff] }
0x12fd   :  { %v5527_v44 = vadd.f32 %v2610_v42, %v5456_v56  ;;  %2785 = vrot.lane.b32.xlu0 %v2608_v13, %s4694_s24  ;;  %v4205_v56 = vpop.f32.mrb[31].mxu1  ;;  %4471 = vmatpush3.bf16.msra.mxu1 %v4470_v37  ;;  %v4472_v42 = vpack.c.bf16 %v3029_v47, %v3028_v8  ;;  %v4474_v13 = vpack.c.bf16 %v3013_v55, %v3012_v29  ;;  %v2987_v37 = vld [vmem:[%s5874_s9 + $0x48] sm:$0xff]  ;;  %v3005_v47 = vld [vmem:[%s5874_s9 + $0xd8] sm:$0xff]  ;;  %v2988_v29 = vld [vmem:[%s5874_s9 + $0x50] sm:$0xff] }
0x12fe   :  { %v2983_v56 = vld [vmem:[%s5874_s9 + $0x28] sm:$0xff]  ;;  %v4454_v60 = vpack.c.bf16 %v2987_v37, %v2986_v39  ;;  %v2609_v37 = vsel %vm638_vm8, %v5508_v28, %v5505_v49 }
0x12ff   :  { %4473 = vmatprep.subr.bf16.mxu1 %v4472_v42  ;;  %v3019_v8 = vld [vmem:[%s5874_s9 + $0x148] sm:$0xff]  ;;  %v2989_v42 = vld [vmem:[%s5874_s9 + $0x58] sm:$0xff] }
0x1300   :  { %v3206_v49 = vld [vmem:[%s5880_s15 + $0x8] sm:$0xff] }
0x1301   :  { %4475 = vmatpush3.bf16.msra.mxu1 %v4474_v13  ;;  %v4458_v13 = vpack.c.bf16 %v2989_v42, %v2988_v29  ;;  %v4501_v28 = vpack.c.bf16 %v3206_v49, %v3205_v23  ;;  %v3196_v29 = vld [vmem:[%s5879_s14 + $0x8] sm:$0xff] }
0x135f   :  { %v2614_v53 = vpop.permute.xlu1 %2613 }
0x1360   :  { %4171 = vmatmul.mubr.msk.f32.vlgmr.msra.gmra.mrb[28].mxu0 %vm86_vm1, %v2614_v53  ;;  %v2998_v53 = vld [vmem:[%s5874_s9 + $0xa0] sm:$0xff] }
0x1361   :  { %4426 = vmatpush3.bf16.msra.mxu0 %v4857_v18  ;;  %4192 = vmatprep.mubr.msk.f32.mxu0 %vm4690_vm0, %v4691_v11  ;;  %v2958_v18 = vsel %vm2957_vm6, %v2956_v40, -inf }
0x1362   :  { %4427 = vmatprep.subr.bf16.mxu0 %v4689_v3  ;;  %2959 = vmax.xlane.f32.xlu1 %v2958_v18 }
0x1365   :  { %4429 = vmatpush3.bf16.msra.mxu0 %v4885_v25 }
0x136f   :  { %v2786_v15 = vpop.permute.xlu0 %2785 }
0x1370   :  { %4193 = vmatmul.mubr.msk.f32.vlgmr.msra.gmra.mrb[30].mxu0 %vm86_vm1, %v2786_v15  ;;  %v2999_v15 = vld [vmem:[%s5874_s9 + $0xa8] sm:$0xff] }
0x13ef   :  { %v2960_v33 = vpop.xlane.xlu1 %2959 }
0x13f0   :  { %v2961_v41 = vrot.slane %v2960_v33, 4 }
0x13f2   :  { %v2962_v48 = vmax.f32 %v2960_v33, %v2961_v41  ;;  %v4482_v33 = vpack.c.bf16 %v3017_v24, %v3016_v16  ;;  %v4452_v41 = vpack.c.bf16 %v3003_v38, %v3002_v30  ;;  %v3025_v16 = vld [vmem:[%s5874_s9 + $0x178] sm:$0xff]  ;;  %v2974_v30 = vld [vmem:[%s5873_s8] sm:$0xff]  ;;  %v2976_v38 = vld [vmem:[%s5873_s8 + $0x10] sm:$0xff] }
0x13f4   :  { %v2963_v20 = vrot.slane %v2962_v48, 2 }
0x1433   :  { %v2683_v57 = vpop.f32.mrb[28].mxu0 }
0x1434   :  { %v2754_v27 = vadd.f32 %v2753_v19, %v2683_v57  ;;  %v4172_v1 = vpop.f32.mrb[29].mxu0  ;;  %v2982_v19 = vld [vmem:[%s5874_s9 + $0x20] sm:$0xff] }
0x1435   :  { %v4446_v18 = vpack.c.bf16 %v2983_v56, %v2982_v19  ;;  %v3031_v1 = vld [vmem:[%s5874_s9 + $0x1a8] sm:$0xff] }
0x1436   :  { %v2757_v6 = vadd.f32 %v5477_v4, %v2754_v27  ;;  %v2994_v4 = vld [vmem:[%s5874_s9 + $0x80] sm:$0xff] }
0x1437   :  { %v3030_v27 = vld [vmem:[%s5874_s9 + $0x1a0] sm:$0xff] }
0x1438   :  { %v3596_v17 = vmul.f32 -1.442695, %v2757_v6 }
0x1443   :  { %v2855_v34 = vpop.f32.mrb[30].mxu0 }
0x1444   :  { %v2926_v25 = vadd.f32 %v2925_v26, %v2855_v34  ;;  %v4194_v51 = vpop.f32.mrb[31].mxu0  ;;  %v4444_v26 = vpack.c.bf16 %v2999_v15, %v2998_v53  ;;  %v2964_v34 = vmax.f32 %v2962_v48, %v2963_v20  ;;  %v4486_v48 = vpack.c.bf16 %v3019_v8, %v3018_v36  ;;  %v3036_v53 = vld [vmem:[%s5874_s9 + $0x1d0] sm:$0xff]  ;;  %v3037_v15 = vld [vmem:[%s5874_s9 + $0x1d8] sm:$0xff] }
0x1445   :  { %v3014_v51 = vld [vmem:[%s5874_s9 + $0x120] sm:$0xff]  ;;  %v4488_v19 = vpack.c.bf16 %v3037_v15, %v3036_v53  ;;  %v3020_v20 = vld [vmem:[%s5874_s9 + $0x150] sm:$0xff] }
0x1446   :  { %v2929_v52 = vadd.f32 %v5484_v35, %v2926_v25  ;;  %v2995_v35 = vld [vmem:[%s5874_s9 + $0x88] sm:$0xff]  ;;  %v4476_v25 = vpack.c.bf16 %v3031_v1, %v3030_v27  ;;  %v3189_v53 = vld [vmem:[%s5876_s11] sm:$0xff] }
0x1447   :  { %v4436_v63 = vpack.c.bf16 %v2995_v35, %v2994_v4  ;;  %v2991_v1 = vld [vmem:[%s5874_s9 + $0x68] sm:$0xff] }
0x1448   :  { %4644 = vtanh.f32 %v2929_v52  ;;  %v3599_v12 = vmul.f32 -1.442695, %v2929_v52  ;;  %v3015_v52 = vld [vmem:[%s5874_s9 + $0x128] sm:$0xff]  ;;  %4477 = vmatprep.subr.bf16.mxu1 %v4476_v25 }
0x1449   :  { %4646 = vtanh.f32 %v2757_v6  ;;  %4437 = vmatprep.subr.bf16.mxu0 %v4436_v63  ;;  %v4478_v6 = vpack.c.bf16 %v3015_v52, %v3014_v51  ;;  %v3039_v25 = vld [vmem:[%s5874_s9 + $0x1e8] sm:$0xff] }
0x144a   :  { %4648 = vpow2.f32 %v3599_v12  ;;  %4439 = vmatpush3.bf16.msra.mxu0 %v4438_v14  ;;  %v2965_v12 = vrot.slane %v2964_v34, 1  ;;  %v4480_v14 = vpack.c.bf16 %v3033_v10, %v3032_v2  ;;  %v2975_v2 = vld [vmem:[%s5873_s8 + $0x8] sm:$0xff] }
0x144b   :  { %4650 = vpow2.f32 %v3596_v17  ;;  %4441 = vmatprep.subr.bf16.mxu0 %v4440_v31  ;;  %v2984_v17 = vld [vmem:[%s5874_s9 + $0x30] sm:$0xff]  ;;  %4479 = vmatpush3.bf16.msra.mxu1 %v4478_v6  ;;  %v3035_v31 = vld [vmem:[%s5874_s9 + $0x1c8] sm:$0xff]  ;;  %v3022_v6 = vld [vmem:[%s5874_s9 + $0x160] sm:$0xff] }
0x144c   :  { %v2966_v35 = vmax.f32 %v2964_v34, %v2965_v12  ;;  %4481 = vmatprep.subr.bf16.mxu1 %v4480_v14  ;;  %v4484_v46 = vpack.c.bf16 %v3035_v31, %v3034_v5  ;;  %v3038_v34 = vld [vmem:[%s5874_s9 + $0x1e0] sm:$0xff]  ;;  %3113 = vmatprep.mubr.f32.mxu0 %v2975_v2  ;;  %v3024_v14 = vld [vmem:[%s5874_s9 + $0x170] sm:$0xff] }
0x144d   :  { %v4492_v52 = vpack.c.bf16 %v3039_v25, %v3038_v34  ;;  %v4498_v24 = vpack.c.bf16 %v3025_v16, %v3024_v14  ;;  %v3447_v14 = vld [vmem:[%s5883_s18 + $0x8] sm:$0xff] }
0x144e   :  { %4443 = vmatpush3.bf16.msra.mxu0 %v4442_v61  ;;  %4518 = vpush %v2966_v35  ;;  %v3004_v61 = vld [vmem:[%s5874_s9 + $0xd0] sm:$0xff] }
0x144f   :  { %4445 = vmatprep.subr.bf16.mxu0 %v4444_v26  ;;  %4483 = vmatpush3.bf16.msra.mxu1 %v4482_v33  ;;  %v4456_v55 = vpack.c.bf16 %v3005_v47, %v3004_v61  ;;  %v3021_v26 = vld [vmem:[%s5874_s9 + $0x158] sm:$0xff]  ;;  %v3040_v35 = vld [vmem:[%s5874_s9 + $0x1f0] sm:$0xff]  ;;  %v3195_v47 = vld [vmem:[%s5879_s14] sm:$0xff] }
0x1450   :  { %4485 = vmatprep.subr.bf16.mxu1 %v4484_v46  ;;  %v4490_v56 = vpack.c.bf16 %v3021_v26, %v3020_v20  ;;  %v2977_v33 = vld [vmem:[%s5873_s8 + $0x18] sm:$0xff]  ;;  %v2435_v46 = vsel %vm823_vm9, %v5497_v45, %v5494_v43  ;;  %v4507_v42 = vpack.c.bf16 %v3196_v29, %v3195_v47 }
0x1451   :  { %3183 = vmatprep.mubr.f32.mxu1 %v2977_v33  ;;  %v3208_v43 = vld [vmem:[%s5880_s15 + $0x18] sm:$0xff]  ;;  %s4695_s15 = smov 96  }
0x1452   :  { %v4645_v7 = vpop.eup %4644  ;;  %4447 = vmatpush3.bf16.msra.mxu0 %v4446_v18  ;;  %v3007_v18 = vld [vmem:[%s5874_s9 + $0xe8] sm:$0xff] }
0x1453   :  { %2939 = vrot.lane.b32.xlu0 %v4645_v7, %s4693_s30  ;;  %v4647_v22 = vpop.eup %4646  ;;  %v3000_v7 = vld [vmem:[%s5874_s9 + $0xb0] sm:$0xff]  ;;  %4487 = vmatpush3.bf16.msra.mxu1 %v4486_v48 }
0x1454   :  { %v4649_v0 = vpop.eup %4648  ;;  %4489 = vmatprep.subr.bf16.mxu1 %v4488_v19  ;;  %v3600_v19 = vld [vmem:[%s5875_s10] ss:$0 sm:$0xff] }
0x1455   :  { %v2933_v58 = vadd.f32 1.0, %v4649_v0  ;;  %v4651_v59 = vpop.eup %4650 }
0x1456   :  { %v2761_v62 = vadd.f32 1.0, %v4651_v59 }
0x1457   :  { %2767 = vrot.lane.b32.xlu0 %v4647_v22, %s4693_s30  ;;  %4652 = vrcp.f32 %v2933_v58  ;;  %v3001_v22 = vld [vmem:[%s5874_s9 + $0xb8] sm:$0xff]  ;;  %4491 = vmatpush3.bf16.msra.mxu1 %v4490_v56 }
0x1458   :  { %4654 = vrcp.f32 %v2761_v62  ;;  %v4448_v59 = vpack.c.bf16 %v3001_v22, %v3000_v7  ;;  %v2985_v62 = vld [vmem:[%s5874_s9 + $0x38] sm:$0xff]  ;;  %v3023_v7 = vld [vmem:[%s5874_s9 + $0x168] sm:$0xff]  ;;  %v3008_v22 = vld [vmem:[%s5874_s9 + $0xf0] sm:$0xff]  ;;  %4493 = vmatprep.subr.bf16.mxu1 %v4492_v52 }
0x1459   :  { %v4450_v63 = vpack.c.bf16 %v2985_v62, %v2984_v17  ;;  %v4494_v12 = vpack.c.bf16 %v3023_v7, %v3022_v6  ;;  %v3009_v17 = vld [vmem:[%s5874_s9 + $0xf8] sm:$0xff] }
0x145a   :  { %4449 = vmatprep.subr.bf16.mxu0 %v4448_v59  ;;  %v2993_v59 = vld [vmem:[%s5874_s9 + $0x78] sm:$0xff]  ;;  %v4464_v62 = vpack.c.bf16 %v3009_v17, %v3008_v22 }
0x145b   :  { %4451 = vmatpush3.bf16.msra.mxu0 %v4450_v63  ;;  %v3041_v63 = vld [vmem:[%s5874_s9 + $0x1f8] sm:$0xff]  ;;  %4495 = vmatpush3.bf16.msra.mxu1 %v4494_v12 }
0x145c   :  { %4453 = vmatprep.subr.bf16.mxu0 %v4452_v41  ;;  %v4496_v10 = vpack.c.bf16 %v3041_v63, %v3040_v35 }
0x145e   :  { %4497 = vmatprep.subr.bf16.mxu1 %v4496_v10  ;;  %v3446_v10 = vld [vmem:[%s5883_s18] sm:$0xff] }
0x145f   :  { %4455 = vmatpush3.bf16.msra.mxu0 %v4454_v60  ;;  %4499 = vmatpush3.bf16.msra.mxu1 %v4498_v24  ;;  %v4513_v16 = vpack.c.bf16 %v3447_v14, %v3446_v10  ;;  %v3448_v24 = vld [vmem:[%s5883_s18 + $0x10] sm:$0xff] }
0x1460   :  { %4457 = vmatprep.subr.bf16.mxu0 %v4456_v55  ;;  %4506 = vmatprep.subr.bf16.mxu1 %v4689_v3  ;;  %v4504_v55 = vpack.c.bf16 %v3208_v43, %v3207_v32 }
0x1461   :  { %v5604_v50 = vpop.eup %4652 }
0x1462   :  { %v5629_v0 = vpop.eup %4654  ;;  %3184 = vmatmul.mubr.f32.vlgmr.msra.gmra.mrb[32].mxu1 %v2976_v38  ;;  %v2937_v60 = vmul.f32 %v5604_v50, %v2609_v37 }
0x1463   :  { %4459 = vmatpush3.bf16.msra.mxu0 %v4458_v13  ;;  %4225 = vmatprep.mubr.msk.f32.mxu1 %vm4690_vm0, %v4691_v11  ;;  %v2765_v36 = vmul.f32 %v5629_v0, %v2435_v46  ;;  %v3199_v13 = vld [vmem:[%s5877_s12] sm:$0xff] }
0x1464   :  { %4508 = vmatpush3.bf16.msra.mxu1 %v4507_v42 }
0x1465   :  { %4509 = vmatprep.subr.bf16.mxu1 %v4689_v3 }
0x14c5   :  { %v2940_v40 = vpop.permute.xlu0 %2939 }
0x14c6   :  { %v2942_v57 = vmul.f32 %v5604_v50, %v2940_v40  ;;  %v3006_v40 = vld [vmem:[%s5874_s9 + $0xe0] sm:$0xff] }
0x14c7   :  { %v4460_v27 = vpack.c.bf16 %v3007_v18, %v3006_v40 }
0x14c8   :  { %2944 = vrot.lane.b32.xlu0 %v2942_v57, %s4694_s24  ;;  %v2990_v57 = vld [vmem:[%s5874_s9 + $0x60] sm:$0xff] }
0x14c9   :  { %v2768_v58 = vpop.permute.xlu0 %2767  ;;  %v4462_v51 = vpack.c.bf16 %v2991_v1, %v2990_v57  ;;  %4461 = vmatprep.subr.bf16.mxu0 %v4460_v27  ;;  %v3197_v27 = vld [vmem:[%s5879_s14 + $0x10] sm:$0xff]  ;;  %v3198_v1 = vld [vmem:[%s5879_s14 + $0x18] sm:$0xff] }
0x14ca   :  { %v2770_v4 = vmul.f32 %v5629_v0, %v2768_v58  ;;  %v2992_v58 = vld [vmem:[%s5874_s9 + $0x70] sm:$0xff]  ;;  %s4519_s9 = spop %4518  ;;  %v4510_v34 = vpack.c.bf16 %v3198_v1, %v3197_v27 }
0x14cb   :  { %4463 = vmatpush3.bf16.msra.mxu0 %v4462_v51  ;;  %v2968_v39 = vstv %s4519_s9 }
0x14cc   :  { %2772 = vrot.lane.b32.xlu0 %v2770_v4, %s4694_s24  ;;  %v4466_v4 = vpack.c.bf16 %v2993_v59, %v2992_v58  ;;  %4465 = vmatprep.subr.bf16.mxu0 %v4464_v62  ;;  %4656 = vrcp.f32 %v2968_v39 }
0x14cd   :  { %4511 = vmatpush3.bf16.msra.mxu1 %v4510_v34 }
0x14ce   :  { %4512 = vmatprep.subr.bf16.mxu1 %v4689_v3 }
0x14cf   :  { %4467 = vmatpush3.bf16.msra.mxu0 %v4466_v4 }
0x14d0   :  { %4500 = vmatprep.subr.bf16.mxu0 %v4689_v3 }
0x14d2   :  { %3114 = vmatmul.mubr.f32.vlgmr.msra.gmra.mrb[32].mxu0 %v2974_v30 }
0x14d3   :  { %4214 = vmatprep.mubr.msk.f32.mxu0 %vm4690_vm0, %v4691_v11  ;;  %4502 = vmatpush3.bf16.msra.mxu0 %v4501_v28 }
0x14d4   :  { %4503 = vmatprep.subr.bf16.mxu0 %v4689_v3 }
0x14d6   :  { %v4657_v41 = vpop.eup %4656 }
0x14d7   :  { %4520 = vpush %v4657_v41  ;;  %4505 = vmatpush3.bf16.msra.mxu0 %v4504_v55 }
0x14d8   :  { %4228 = vmatprep.subr.mxu0 %v4691_v11 }
0x1508   :  { %s4521_s10 = spop %4520 }
0x1509   :  { %v2971_v12 = vstv %s4521_s10 }
0x1535   :  { %v3834_v56 = vpop.f32.mrb[32].mxu1 }
0x1536   :  { %v3835_v40 = vpop.f32.mrb[33].mxu1 }
0x1537   :  { %v3836_v57 = vadd.f32 %v3835_v40, %v3834_v56 }
0x153a   :  { %v2945_v5 = vpop.permute.xlu0 %2944 }
0x153b   :  { %v2947_v31 = vadd.f32 %v2945_v5, %v2937_v60 }
0x153d   :  { %4658 = vtanh.f32 %v2947_v31 }
0x153e   :  { %v2773_v8 = vpop.permute.xlu0 %2772 }
0x153f   :  { %v2775_v48 = vadd.f32 %v2773_v8, %v2765_v36  ;;  %v3605_v8 = vld [vmem:[%s5884_s19] ss:$0 sm:$0xff] }
0x1541   :  { %4660 = vtanh.f32 %v2775_v48 }
0x1547   :  { %v4659_v61 = vpop.eup %4658 }
0x1548   :  { %2950 = vrot.lane.b32.xlu0 %v4659_v61, %s4693_s30 }
0x154b   :  { %v4661_v45 = vpop.eup %4660 }
0x154c   :  { %2778 = vrot.lane.b32.xlu0 %v4661_v45, %s4693_s30 }
0x1550   :  { %3201 = vrot.lane.b32.xlu0 %v3199_v13, %s4695_s15 }
0x1554   :  { %3191 = vrot.lane.b32.xlu0 %v3189_v53, %s4695_s15  ;;  %s4665_s15 = scalar_lea.vmem %s3538_s26, 128 }
0x1555   :  { %p4666_p0 = scmp.ne.s32.totalorder %s3538_s26, %s4665_s15  ;;  %p4671_p2 = scmp.lt.s32.totalorder %s4665_s15, %s4665_s15 }
0x1557   :  { %p4672_p3 = por %p4671_p2, %p4670_p1 }
0x1559   :  { %p4673_p4 = pnand %p4672_p3, %p4666_p0 }
0x15a5   :  { %v3799_v15 = vpop.f32.mrb[32].mxu0 }
0x15a6   :  { %v3800_v20 = vpop.f32.mrb[33].mxu0 }
0x15a7   :  { %v3801_v26 = vadd.f32 %v3800_v20, %v3799_v15 }
0x15a9   :  { %v3116_v18 = vadd.f32 %v3801_v26, %v3600_v19 }
0x15ab   :  { %v3186_v25 = vadd.f32 %v3836_v57, %v3116_v18 }
0x15ba   :  { %v2951_v51 = vpop.permute.xlu0 %2950 }
0x15bb   :  { %v2953_v52 = vmul.f32 %v5604_v50, %v2951_v51 }
0x15bd   :  { %v2954_v6 = vsel %vm269_vm4, %v2953_v52, 0.0  ;;  %vm3362_vm4 = vcmask 64512  }
0x15be   :  { %v2955_v7 = vadd.f32 %v2954_v6, %v5527_v44  ;;  %v2779_v22 = vpop.permute.xlu0 %2778  ;;  %v3359_v44 = vld [vmem:[%s5878_s13] sm:$0xff] }
0x15bf   :  { %v2781_v17 = vmul.f32 %v5629_v0, %v2779_v22  ;;  %v3360_v2 = vmul.f32 %v3359_v44, %v3186_v25 }
0x15c0   :  { %v2973_v58 = vmul.f32 %v2971_v12, %v2955_v7 }
0x15c1   :  { %v2782_v59 = vsel %vm454_vm5, %v2781_v17, 0.0 }
0x15c2   :  { %v2783_v62 = vadd.f32 %v2782_v59, %v5518_v54  ;;  %v3202_v4 = vpop.permute.xlu0 %3201 }
0x15c3   :  { %v3204_v35 = vmul.f32 %v3202_v4, %v2973_v58 }
0x15c4   :  { %v2972_v63 = vmul.f32 %v2971_v12, %v2783_v62 }
0x15c5   :  { %3210 = vrot.lane.b32.xlu0 %v3204_v35, %s4694_s24 }
0x15c6   :  { %v3192_v50 = vpop.permute.xlu0 %3191 }
0x15c7   :  { %v3194_v9 = vmul.f32 %v3192_v50, %v2972_v63 }
0x15c9   :  { %3285 = vrot.lane.b32.xlu1 %v3194_v9, %s4694_s24 }
0x1637   :  { %v3211_v0 = vpop.permute.xlu0 %3210 }
0x1638   :  { %4215 = vmatmul.mubr.msk.f32.vlgmr.msra.gmra.mrb[34].mxu0 %vm86_vm1, %v3211_v0 }
0x1639   :  { %4229 = vmatpush3.msra.mxu0 %v3361_v21  ;;  %4230 = vmatprep.mubr.msk.f32.mxu0 %vm4690_vm0, %v4691_v11 }
0x163b   :  { %v3286_v54 = vpop.permute.xlu1 %3285 }
0x163c   :  { %4226 = vmatmul.mubr.msk.f32.vlgmr.msra.gmra.mrb[34].mxu1 %vm86_vm1, %v3286_v54  ;;  %4231 = vmatmul.mubr.msk.f32.vlgmr.msra.gmra.mrb[36].mxu0 %vm3362_vm4, %v3360_v2 }
0x163d   :  { %4241 = vmatprep.mubr.msk.f32.mxu1 %vm4690_vm0, %v4691_v11  ;;  %4514 = vmatpush3.bf16.msra.mxu1 %v4513_v16  ;;  %v3449_v11 = vld [vmem:[%s5883_s18 + $0x18] sm:$0xff] }
0x163e   :  { %4515 = vmatprep.subr.bf16.mxu1 %v4689_v3  ;;  %v4516_v33 = vpack.c.bf16 %v3449_v11, %v3448_v24  ;;  %v3604_v3 = vld [vmem:[%s5882_s17] ss:$0 sm:$0xff] }
0x1641   :  { %4517 = vmatpush3.bf16.msra.mxu1 %v4516_v33 }
0x170b   :  { %v3280_v30 = vpop.f32.mrb[34].mxu0 }
0x170c   :  { %v4216_v38 = vpop.f32.mrb[35].mxu0 }
0x170f   :  { %v3355_v39 = vpop.f32.mrb[34].mxu1  ;;  %v3432_v41 = vpop.f32.mrb[36].mxu0 }
0x1710   :  { %v3356_v37 = vadd.f32 %v3355_v39, %v3280_v30  ;;  %v4227_v60 = vpop.f32.mrb[35].mxu1  ;;  %v4232_v5 = vpop.f32.mrb[37].mxu0 }
0x1712   :  { %v3436_v31 = vadd.f32 %v3432_v41, %v3356_v37 }
0x1714   :  { %v3444_v46 = vadd.f32 %v3604_v3, %v3436_v31 }
0x1716   :  { %v3445_v36 = vmax.f32 %v3444_v46, 0.0 }
0x1718   :  { %4242 = vmatmul.mubr.msk.f32.vlgmr.msra.gmra.mrb[36].mxu1 %vm86_vm1, %v3445_v36 }
0x17eb   :  { %v3526_v48 = vpop.f32.mrb[36].mxu1 }
0x17ec   :  { %v3527_v61 = vadd.f32 %v3605_v8, %v3526_v48  ;;  %v4243_v23 = vpop.f32.mrb[37].mxu1 }
0x17ee   :  { %3530 = vst [vmem:[#allocation2] sm:$0xff] %v3527_v61 }
0x17ef   :  { %4676 = shalt.err (!%p4673_p4)
}
0x17f0   :  { %s4677_s4 = scalar_lea.hbm %s5885_s20, 128 }
0x17f1   :  { %p4678_p5 = scmp.ne.s32.totalorder %s5885_s20, %s4677_s4  ;;  %p4681_p6 = scmp.lt.u32.totalorder %s4677_s4, %s5885_s20 }
0x17f3   :  { %p4683_p7 = pnand %p4681_p6, %p4678_p5 }
0x17f5   :  { %4686 = shalt.err (!%p4683_p7)
}
0x17f6   :  { %3540 = dma.vmem_to_hbm [thread:$0]  %s3538_s26, 128, %s5885_s20, [#allocation3]  }
0x17f7   :  { %4687 = dma.done.wait [#allocation3], 128  }
0x17f8   :  { %4688 = vsyncadd [#allocation3], 4294967168 }
0x17f9   :  { %3544 = vsyncpa [#allocation3], 1 }

</bundles_post_ra>
